<compile_context>
chip_gen: v7x
topology: tpu7x:2x2x1
jax: 0.10.0
libtpu: 0.0.40
codegen_flags: <defaults>
</compile_context>

<pallas_src>
import jax
import jax.numpy as jnp
from jax import lax
from jax.experimental import pallas as pl
from jax.experimental.pallas import tpu as pltpu

# ----------------------------- model config ---------------------------------
VOCAB_SIZE = 97          # stand-in for len(voc_model)
PAD_IDX = 0              # stand-in for voc_model.PAD
EMBED_DIM = 32           # embedding_dim / input_size
HIDDEN = 64              # hidden_size  (fc1 = Linear(64 * 2, 64) => H = 64)
NUM_LAYERS = 2           # num_layers

_H2 = 2 * HIDDEN         # packed hidden width [fwd | bwd]   = 128 lanes
_G = 8 * HIDDEN          # packed gate width (4 gates x 2 dirs) = 512 lanes

_VMEM_SPEC = pl.BlockSpec(memory_space=pltpu.MemorySpace.VMEM)


# --------------------- fused bi-directional recurrence -----------------------
def _bilstm_recurrence(p1_ref, p2_ref, wrec, S, B, hseq_ref=None):
    """Fused fwd+bwd LSTM recurrence over S steps with lane-packed state.

    p1_ref[t]  : (B, 8H) hoisted input projection consumed at step t
                 (carries the full packed bias).
    p2_ref[rt] : (B, 8H) complementary projection consumed at rt = S-1-t
                 (feeds the reversed chain).
    wrec       : (2H, 8H) block-structured recurrent weights
                 (fwd rows -> fwd gate cols, bwd rows -> bwd gate cols).
    Returns the final packed hidden state (B, 2H) = [h_fwd_final | h_bwd_final].
    If hseq_ref is given, stores the packed per-step hidden state at index t
    (fwd half is original time t, bwd half is original time S-1-t).
    """
    H2 = _H2

    def step(t, carry):
        h, c = carry                                               # (B, 2H)
        rt = S - 1 - t
        g = (p1_ref[t] + p2_ref[rt]
             + jnp.dot(h, wrec, preferred_element_type=jnp.float32))  # (B, 8H)
        # 128-lane-wide (vreg-aligned) gate slices, PyTorch gate order i,f,g,o.
        i_g = jax.nn.sigmoid(g[:, 0 * H2:1 * H2])
        f_g = jax.nn.sigmoid(g[:, 1 * H2:2 * H2])
        g_g = jnp.tanh(g[:, 2 * H2:3 * H2])
        o_g = jax.nn.sigmoid(g[:, 3 * H2:4 * H2])
        c_new = f_g * c + i_g * g_g
        h_new = o_g * jnp.tanh(c_new)
        if hseq_ref is not None:
            hseq_ref[t] = h_new        # single lane-dense (B, 128) store
        return (h_new, c_new)

    zero = jnp.zeros((B, H2), jnp.float32)
    # TODO(synk): for long sequences (e.g. S~500 on v7x) switch to a
    # time-chunked grid (BlockSpec over S, state in scratch) and/or bf16
    # activations instead of full unroll + whole-sequence VMEM residency.
    h_fin, _ = lax.fori_loop(0, S, step, (zero, zero), unroll=True)
    return h_fin


# ------------------------------ fused kernel ---------------------------------
def _imdb_fwd_kernel(tok_ref, emb_ref,
                     p1w0_ref, p2w0_ref, b0_ref, wrec0_ref,
                     p1w1_ref, p2w1_ref, b1l_ref, wrec1_ref,
                     w1_ref, b1_ref, w2_ref, b2_ref,
                     out_ref,
                     p1_ref, p2_ref, hseq_ref):
    S, B, H2 = hseq_ref.shape
    V = emb_ref.shape[0]
    SB = S * B

    # ---- fused embedding lookup: one-hot @ table on the MXU (vocab is tiny).
    # TODO(synk): for a large real vocab keep the gather outside the kernel or
    # use a DMA gather instead of the one-hot matmul.
    tok = tok_ref[...]                                             # (SB, 1) i32
    onehot = (lax.broadcasted_iota(jnp.int32, (SB, V), 1)
              == tok).astype(jnp.float32)                          # (SB, V)
    emb = jnp.dot(onehot, emb_ref[...],
                  preferred_element_type=jnp.float32)              # (SB, E)

    # ---- layer 0: hoisted input projections (bias folded in once) ----------
    p1_ref[...] = (jnp.dot(emb, p1w0_ref[...],
                           preferred_element_type=jnp.float32)
                   + b0_ref[...]).reshape(S, B, _G)
    p2_ref[...] = jnp.dot(emb, p2w0_ref[...],
                          preferred_element_type=jnp.float32).reshape(S, B, _G)
    _bilstm_recurrence(p1_ref, p2_ref, wrec0_ref[...], S, B, hseq_ref=hseq_ref)

    # ---- layer 1 (reuses the projection scratch buffers) --------------------
    x_flat = hseq_ref[...].reshape(SB, H2)
    p1_ref[...] = (jnp.dot(x_flat, p1w1_ref[...],
                           preferred_element_type=jnp.float32)
                   + b1l_ref[...]).reshape(S, B, _G)
    p2_ref[...] = jnp.dot(x_flat, p2w1_ref[...],
                          preferred_element_type=jnp.float32).reshape(S, B, _G)
    h_fin = _bilstm_recurrence(p1_ref, p2_ref, wrec1_ref[...], S, B)  # (B, 2H)

    # ---- fused classifier head: fc1 -> relu -> fc2 -> log_softmax ----------
    # fc1 weights are pre-permuted so the packed [fwd | bwd] final state
    # matches torch's cat([h_n[-1] (bwd), h_n[-2] (fwd)]).
    h1 = jnp.dot(h_fin, w1_ref[...],
                 preferred_element_type=jnp.float32) + b1_ref[...]
    h1 = jnp.maximum(h1, 0.0)
    logits = jnp.dot(h1, w2_ref[...],
                     preferred_element_type=jnp.float32) + b2_ref[...]
    m = jnp.max(logits, axis=-1, keepdims=True)
    z = logits - m
    out_ref[...] = z - jnp.log(jnp.sum(jnp.exp(z), axis=-1, keepdims=True))


# --------------------------- weight packing (init) ---------------------------
def _pack_input_cols(w_ih, direction):
    """torch W_ih (4H, in) -> (in, 8H): gate-k block placed at the fwd (0) /
    bwd (1) sub-columns of the packed gate layout; other columns zero."""
    H = HIDDEN
    in_sz = w_ih.shape[1]
    out = jnp.zeros((in_sz, _G), jnp.float32)
    for k in range(4):
        c0 = k * _H2 + direction * H
        out = out.at[:, c0:c0 + H].set(w_ih[k * H:(k + 1) * H, :].T)
    return out


def _pack_bias(b_f, b_b):
    """Per-direction (4H,) combined biases (b_ih + b_hh) -> (1, 8H) packed."""
    H = HIDDEN
    out = jnp.zeros((_G,), jnp.float32)
    for k in range(4):
        out = out.at[k * _H2:k * _H2 + H].set(b_f[k * H:(k + 1) * H])
        out = out.at[k * _H2 + H:(k + 1) * _H2].set(b_b[k * H:(k + 1) * H])
    return out.reshape(1, _G)


def _pack_recurrent(whh_f, whh_b):
    """torch W_hh (4H, H) per direction -> (2H, 8H) block-structured."""
    H = HIDDEN
    out = jnp.zeros((_H2, _G), jnp.float32)
    for k in range(4):
        fc0 = k * _H2
        bc0 = k * _H2 + H
        out = out.at[:H, fc0:fc0 + H].set(whh_f[k * H:(k + 1) * H, :].T)
        out = out.at[H:, bc0:bc0 + H].set(whh_b[k * H:(k + 1) * H, :].T)
    return out


def init_params(key):
    H = HIDDEN
    keys = iter(jax.random.split(key, 64))

    def uni(shape, bound):
        return jax.random.uniform(next(keys), shape, jnp.float32, -bound, bound)

    # Embedding (padding row zeroed, like padding_idx).
    emb = jax.random.normal(next(keys), (VOCAB_SIZE, EMBED_DIM), jnp.float32)
    emb = emb.at[PAD_IDX].set(0.0)

    kb = 1.0 / float(H) ** 0.5
    raw = []
    for layer in range(NUM_LAYERS):
        in_sz = EMBED_DIM if layer == 0 else 2 * H
        per_dir = {}
        for d in ("fwd", "bwd"):
            per_dir[d] = dict(w_ih=uni((4 * H, in_sz), kb),
                              w_hh=uni((4 * H, H), kb),
                              b_ih=uni((4 * H,), kb),
                              b_hh=uni((4 * H,), kb))
        raw.append(per_dir)

    # Layer 0 (input = embedding): fwd projection consumed at t, bwd at S-1-t.
    l0f, l0b = raw[0]["fwd"], raw[0]["bwd"]
    layer0 = dict(
        p1w=_pack_input_cols(l0f["w_ih"], 0),
        p2w=_pack_input_cols(l0b["w_ih"], 1),
        bias=_pack_bias(l0f["b_ih"] + l0f["b_hh"], l0b["b_ih"] + l0b["b_hh"]),
        wrec=_pack_recurrent(l0f["w_hh"], l0b["w_hh"]),
    )

    # Layer 1: the layer-0 kernel emits h_packed[t] = [h_fwd(t) | h_bwd(S-1-t)],
    # so the input-projection weights are re-mixed (M1 / M2) such that
    #   gates(t) = x_raw[t] @ M1 + x_raw[S-1-t] @ M2 (+ bias)
    # equals the torch projection of the properly time-ordered layer-0 output.
    l1f, l1b = raw[1]["fwd"], raw[1]["bwd"]
    w1f_p = _pack_input_cols(l1f["w_ih"], 0)          # (2H, 8H)
    w1b_p = _pack_input_cols(l1b["w_ih"], 1)          # (2H, 8H)
    layer1 = dict(
        p1w=jnp.concatenate([w1f_p[:H], w1b_p[H:]], axis=0),   # M1
        p2w=jnp.concatenate([w1b_p[:H], w1f_p[H:]], axis=0),   # M2
        bias=_pack_bias(l1f["b_ih"] + l1f["b_hh"], l1b["b_ih"] + l1b["b_hh"]),
        wrec=_pack_recurrent(l1f["w_hh"], l1b["w_hh"]),
    )

    # Classifier head: fc1 (128 -> 64), fc2 (64 -> 2), stored pre-transposed.
    b1b = 1.0 / float(2 * H) ** 0.5
    b2b = 1.0 / float(H) ** 0.5
    fc1_w = uni((H, 2 * H), b1b)      # torch (out, in); in order = [bwd, fwd]
    fc1_b = uni((1, H), b1b)
    fc2_w = uni((2, H), b2b)
    fc2_b = uni((1, 2), b2b)
    fc1_wt = fc1_w.T                  # (2H, H)
    # Swap input halves so it consumes the packed [fwd | bwd] final state.
    fc1_wp = jnp.concatenate([fc1_wt[H:], fc1_wt[:H]], axis=0)

    return dict(embedding=emb, layer0=layer0, layer1=layer1,
                fc1_w=fc1_wp, fc1_b=fc1_b, fc2_w=fc2_w.T, fc2_b=fc2_b)


# ------------------------------ forward pass ---------------------------------
def imdb_forward(params, token_ids):
    """token_ids: int32 [B, S] -> log-probs float32 [B, 2]."""
    B0, S = token_ids.shape
    Bp = ((B0 + 7) // 8) * 8                      # pad batch to sublane multiple
    tok = jnp.pad(token_ids.astype(jnp.int32), ((0, Bp - B0), (0, 0)),
                  constant_values=PAD_IDX)
    tok_tm = jnp.transpose(tok, (1, 0)).reshape(S * Bp, 1)   # time-major, flat

    l0, l1 = params["layer0"], params["layer1"]
    logp = pl.pallas_call(
        _imdb_fwd_kernel,
        out_shape=jax.ShapeDtypeStruct((Bp, 2), jnp.float32),
        in_specs=[_VMEM_SPEC] * 14,
        out_specs=_VMEM_SPEC,
        scratch_shapes=[pltpu.VMEM((S, Bp, _G), jnp.float32),    # proj slot 1
                        pltpu.VMEM((S, Bp, _G), jnp.float32),    # proj slot 2
                        pltpu.VMEM((S, Bp, _H2), jnp.float32)],  # layer-0 hseq
    )(tok_tm, params["embedding"],
      l0["p1w"], l0["p2w"], l0["bias"], l0["wrec"],
      l1["p1w"], l1["p2w"], l1["bias"], l1["wrec"],
      params["fc1_w"], params["fc1_b"], params["fc2_w"], params["fc2_b"])
    return logp[:B0]


# ---------------------------------- main --------------------------------------
if __name__ == "__main__":
    key = jax.random.PRNGKey(0)
    pkey, dkey = jax.random.split(key)

    params = init_params(pkey)

    B, S = 2, 8
    token_ids = jax.random.randint(dkey, (B, S), 0, VOCAB_SIZE, dtype=jnp.int32)

    logp = jax.jit(imdb_forward)(params, token_ids)
    jax.block_until_ready(logp)

    assert logp.shape == (B, 2) and logp.dtype == jnp.float32
    # log_softmax rows must sum (in prob space) to ~1
    assert bool(jnp.all(jnp.abs(jnp.sum(jnp.exp(logp), axis=-1) - 1.0) < 1e-4))
    print("KERNEL_OK")
</pallas_src>

<mosaic_0001>
module attributes {stable_mosaic.version = 11 : i64} {
  func.func @_imdb_fwd_kernel(%arg0: memref<64x1xi32, #tpu.memory_space<vmem>>, %arg1: memref<97x32xf32, #tpu.memory_space<vmem>>, %arg2: memref<32x512xf32, #tpu.memory_space<vmem>>, %arg3: memref<32x512xf32, #tpu.memory_space<vmem>>, %arg4: memref<1x512xf32, #tpu.memory_space<vmem>>, %arg5: memref<128x512xf32, #tpu.memory_space<vmem>>, %arg6: memref<128x512xf32, #tpu.memory_space<vmem>>, %arg7: memref<128x512xf32, #tpu.memory_space<vmem>>, %arg8: memref<1x512xf32, #tpu.memory_space<vmem>>, %arg9: memref<128x512xf32, #tpu.memory_space<vmem>>, %arg10: memref<128x64xf32, #tpu.memory_space<vmem>>, %arg11: memref<1x64xf32, #tpu.memory_space<vmem>>, %arg12: memref<64x2xf32, #tpu.memory_space<vmem>>, %arg13: memref<1x2xf32, #tpu.memory_space<vmem>>, %arg14: memref<8x2xf32, #tpu.memory_space<vmem>>, %arg15: memref<8x8x512xf32, #tpu.memory_space<vmem>>, %arg16: memref<8x8x512xf32, #tpu.memory_space<vmem>>, %arg17: memref<8x8x128xf32, #tpu.memory_space<vmem>>) attributes {dimension_semantics = [], scalar_prefetch = 0 : i64, scratch_operands = 3 : i64, tpu.core_type = #tpu.core_type<tc>} {
    %c0 = arith.constant 0 : index
    %c0_0 = arith.constant 0 : index
    %0 = vector.load %arg0[%c0, %c0_0] : memref<64x1xi32, #tpu.memory_space<vmem>>, vector<64x1xi32>
    %1 = tpu.iota {dimensions = array<i32: 1>} : vector<64x97xi32>
    %2 = vector.broadcast %0 : vector<64x1xi32> to vector<64x97xi32>
    %3 = arith.cmpi eq, %1, %2 : vector<64x97xi32>
    %4 = arith.extui %3 : vector<64x97xi1> to vector<64x97xi32>
    %5 = arith.sitofp %4 : vector<64x97xi32> to vector<64x97xf32>
    %c0_1 = arith.constant 0 : index
    %c0_2 = arith.constant 0 : index
    %6 = vector.load %arg1[%c0_1, %c0_2] : memref<97x32xf32, #tpu.memory_space<vmem>>, vector<97x32xf32>
    %cst = arith.constant dense<0.000000e+00> : vector<64x32xf32>
    %7 = tpu.matmul %5, %6, %cst {dimension_numbers = #tpu.dot_dimension_numbers<[1], [0], [0], [1], [0, 0, 1, 1], [], []>} : vector<64x97xf32>, vector<97x32xf32>, vector<64x32xf32> -> vector<64x32xf32>
    %c0_3 = arith.constant 0 : index
    %c0_4 = arith.constant 0 : index
    %8 = vector.load %arg2[%c0_3, %c0_4] : memref<32x512xf32, #tpu.memory_space<vmem>>, vector<32x512xf32>
    %cst_5 = arith.constant dense<0.000000e+00> : vector<64x512xf32>
    %9 = tpu.matmul %7, %8, %cst_5 {dimension_numbers = #tpu.dot_dimension_numbers<[1], [0], [0], [1], [0, 0, 1, 1], [], []>} : vector<64x32xf32>, vector<32x512xf32>, vector<64x512xf32> -> vector<64x512xf32>
    %c0_6 = arith.constant 0 : index
    %c0_7 = arith.constant 0 : index
    %10 = vector.load %arg4[%c0_6, %c0_7] : memref<1x512xf32, #tpu.memory_space<vmem>>, vector<1x512xf32>
    %11 = vector.broadcast %10 : vector<1x512xf32> to vector<64x512xf32>
    %12 = arith.addf %9, %11 : vector<64x512xf32>
    %13 = vector.shape_cast %12 : vector<64x512xf32> to vector<8x8x512xf32>
    %c0_8 = arith.constant 0 : index
    %c0_9 = arith.constant 0 : index
    %c0_10 = arith.constant 0 : index
    %14 = vector.load %arg15[%c0_8, %c0_9, %c0_10] : memref<8x8x512xf32, #tpu.memory_space<vmem>>, vector<8x8x512xf32>
    tpu.vector_store %arg15[%c0_8, %c0_9, %c0_10], %13 {strides = array<i32>} : memref<8x8x512xf32, #tpu.memory_space<vmem>>, vector<8x8x512xf32>,
    %c0_11 = arith.constant 0 : index
    %c0_12 = arith.constant 0 : index
    %15 = vector.load %arg3[%c0_11, %c0_12] : memref<32x512xf32, #tpu.memory_space<vmem>>, vector<32x512xf32>
    %cst_13 = arith.constant dense<0.000000e+00> : vector<64x512xf32>
    %16 = tpu.matmul %7, %15, %cst_13 {dimension_numbers = #tpu.dot_dimension_numbers<[1], [0], [0], [1], [0, 0, 1, 1], [], []>} : vector<64x32xf32>, vector<32x512xf32>, vector<64x512xf32> -> vector<64x512xf32>
    %17 = vector.shape_cast %16 : vector<64x512xf32> to vector<8x8x512xf32>
    %c0_14 = arith.constant 0 : index
    %c0_15 = arith.constant 0 : index
    %c0_16 = arith.constant 0 : index
    %18 = vector.load %arg16[%c0_14, %c0_15, %c0_16] : memref<8x8x512xf32, #tpu.memory_space<vmem>>, vector<8x8x512xf32>
    tpu.vector_store %arg16[%c0_14, %c0_15, %c0_16], %17 {strides = array<i32>} : memref<8x8x512xf32, #tpu.memory_space<vmem>>, vector<8x8x512xf32>,
    %c0_17 = arith.constant 0 : index
    %c0_18 = arith.constant 0 : index
    %19 = vector.load %arg5[%c0_17, %c0_18] : memref<128x512xf32, #tpu.memory_space<vmem>>, vector<128x512xf32>
    %cst_19 = arith.constant 0.000000e+00 : f32
    %20 = vector.broadcast %cst_19 : f32 to vector<8x128xf32>
    %c0_i32 = arith.constant 0 : i32
    %c7_i32 = arith.constant 7 : i32
    %21 = arith.subi %c7_i32, %c0_i32 : i32
    %22 = arith.index_cast %c0_i32 : i32 to index
    %c0_20 = arith.constant 0 : index
    %c0_21 = arith.constant 0 : index
    %23 = vector.load %arg15[%22, %c0_20, %c0_21] : memref<8x8x512xf32, #tpu.memory_space<vmem>>, vector<1x8x512xf32>
    %24 = vector.shape_cast %23 : vector<1x8x512xf32> to vector<8x512xf32>
    %25 = arith.index_cast %21 : i32 to index
    %c0_22 = arith.constant 0 : index
    %c0_23 = arith.constant 0 : index
    %26 = vector.load %arg16[%25, %c0_22, %c0_23] : memref<8x8x512xf32, #tpu.memory_space<vmem>>, vector<1x8x512xf32>
    %27 = vector.shape_cast %26 : vector<1x8x512xf32> to vector<8x512xf32>
    %28 = arith.addf %24, %27 : vector<8x512xf32>
    %cst_24 = arith.constant dense<0.000000e+00> : vector<8x512xf32>
    %29 = tpu.matmul %20, %19, %cst_24 {dimension_numbers = #tpu.dot_dimension_numbers<[1], [0], [0], [1], [0, 0, 1, 1], [], []>} : vector<8x128xf32>, vector<128x512xf32>, vector<8x512xf32> -> vector<8x512xf32>
    %30 = arith.addf %28, %29 : vector<8x512xf32>
    %31 = vector.extract_strided_slice %30 {offsets = [0, 0], sizes = [8, 128], strides = [1, 1]} : vector<8x512xf32> to vector<8x128xf32>
    %32 = arith.negf %31 : vector<8x128xf32>
    %33 = math.exp %32 : vector<8x128xf32>
    %cst_25 = arith.constant 1.000000e+00 : f32
    %34 = vector.broadcast %cst_25 : f32 to vector<8x128xf32>
    %35 = arith.addf %34, %33 : vector<8x128xf32>
    %36 = arith.divf %34, %35 : vector<8x128xf32>
    %37 = vector.extract_strided_slice %30 {offsets = [0, 128], sizes = [8, 128], strides = [1, 1]} : vector<8x512xf32> to vector<8x128xf32>
    %38 = arith.negf %37 : vector<8x128xf32>
    %39 = math.exp %38 : vector<8x128xf32>
    %cst_26 = arith.constant 1.000000e+00 : f32
    %40 = vector.broadcast %cst_26 : f32 to vector<8x128xf32>
    %41 = arith.addf %40, %39 : vector<8x128xf32>
    %42 = arith.divf %40, %41 : vector<8x128xf32>
    %43 = vector.extract_strided_slice %30 {offsets = [0, 256], sizes = [8, 128], strides = [1, 1]} : vector<8x512xf32> to vector<8x128xf32>
    %44 = math.tanh %43 : vector<8x128xf32>
    %45 = vector.extract_strided_slice %30 {offsets = [0, 384], sizes = [8, 128], strides = [1, 1]} : vector<8x512xf32> to vector<8x128xf32>
    %46 = arith.negf %45 : vector<8x128xf32>
    %47 = math.exp %46 : vector<8x128xf32>
    %cst_27 = arith.constant 1.000000e+00 : f32
    %48 = vector.broadcast %cst_27 : f32 to vector<8x128xf32>
    %49 = arith.addf %48, %47 : vector<8x128xf32>
    %50 = arith.divf %48, %49 : vector<8x128xf32>
    %51 = arith.mulf %42, %20 : vector<8x128xf32>
    %52 = arith.mulf %36, %44 : vector<8x128xf32>
    %53 = arith.addf %51, %52 : vector<8x128xf32>
    %54 = math.tanh %53 : vector<8x128xf32>
    %55 = arith.mulf %50, %54 : vector<8x128xf32>
    %56 = arith.index_cast %c0_i32 : i32 to index
    %c0_28 = arith.constant 0 : index
    %c0_29 = arith.constant 0 : index
    %57 = vector.load %arg17[%56, %c0_28, %c0_29] : memref<8x8x128xf32, #tpu.memory_space<vmem>>, vector<1x8x128xf32>
    %58 = vector.shape_cast %57 : vector<1x8x128xf32> to vector<8x128xf32>
    %59 = vector.shape_cast %55 : vector<8x128xf32> to vector<1x8x128xf32>
    tpu.vector_store %arg17[%56, %c0_28, %c0_29], %59 {strides = array<i32>} : memref<8x8x128xf32, #tpu.memory_space<vmem>>, vector<1x8x128xf32>,
    %c1_i32 = arith.constant 1 : i32
    %c7_i32_30 = arith.constant 7 : i32
    %60 = arith.subi %c7_i32_30, %c1_i32 : i32
    %61 = arith.index_cast %c1_i32 : i32 to index
    %c0_31 = arith.constant 0 : index
    %c0_32 = arith.constant 0 : index
    %62 = vector.load %arg15[%61, %c0_31, %c0_32] : memref<8x8x512xf32, #tpu.memory_space<vmem>>, vector<1x8x512xf32>
    %63 = vector.shape_cast %62 : vector<1x8x512xf32> to vector<8x512xf32>
    %64 = arith.index_cast %60 : i32 to index
    %c0_33 = arith.constant 0 : index
    %c0_34 = arith.constant 0 : index
    %65 = vector.load %arg16[%64, %c0_33, %c0_34] : memref<8x8x512xf32, #tpu.memory_space<vmem>>, vector<1x8x512xf32>
    %66 = vector.shape_cast %65 : vector<1x8x512xf32> to vector<8x512xf32>
    %67 = arith.addf %63, %66 : vector<8x512xf32>
    %cst_35 = arith.constant dense<0.000000e+00> : vector<8x512xf32>
    %68 = tpu.matmul %55, %19, %cst_35 {dimension_numbers = #tpu.dot_dimension_numbers<[1], [0], [0], [1], [0, 0, 1, 1], [], []>} : vector<8x128xf32>, vector<128x512xf32>, vector<8x512xf32> -> vector<8x512xf32>
    %69 = arith.addf %67, %68 : vector<8x512xf32>
    %70 = vector.extract_strided_slice %69 {offsets = [0, 0], sizes = [8, 128], strides = [1, 1]} : vector<8x512xf32> to vector<8x128xf32>
    %71 = arith.negf %70 : vector<8x128xf32>
    %72 = math.exp %71 : vector<8x128xf32>
    %cst_36 = arith.constant 1.000000e+00 : f32
    %73 = vector.broadcast %cst_36 : f32 to vector<8x128xf32>
    %74 = arith.addf %73, %72 : vector<8x128xf32>
    %75 = arith.divf %73, %74 : vector<8x128xf32>
    %76 = vector.extract_strided_slice %69 {offsets = [0, 128], sizes = [8, 128], strides = [1, 1]} : vector<8x512xf32> to vector<8x128xf32>
    %77 = arith.negf %76 : vector<8x128xf32>
    %78 = math.exp %77 : vector<8x128xf32>
    %cst_37 = arith.constant 1.000000e+00 : f32
    %79 = vector.broadcast %cst_37 : f32 to vector<8x128xf32>
    %80 = arith.addf %79, %78 : vector<8x128xf32>
    %81 = arith.divf %79, %80 : vector<8x128xf32>
    %82 = vector.extract_strided_slice %69 {offsets = [0, 256], sizes = [8, 128], strides = [1, 1]} : vector<8x512xf32> to vector<8x128xf32>
    %83 = math.tanh %82 : vector<8x128xf32>
    %84 = vector.extract_strided_slice %69 {offsets = [0, 384], sizes = [8, 128], strides = [1, 1]} : vector<8x512xf32> to vector<8x128xf32>
    %85 = arith.negf %84 : vector<8x128xf32>
    %86 = math.exp %85 : vector<8x128xf32>
    %cst_38 = arith.constant 1.000000e+00 : f32
    %87 = vector.broadcast %cst_38 : f32 to vector<8x128xf32>
    %88 = arith.addf %87, %86 : vector<8x128xf32>
    %89 = arith.divf %87, %88 : vector<8x128xf32>
    %90 = arith.mulf %81, %53 : vector<8x128xf32>
    %91 = arith.mulf %75, %83 : vector<8x128xf32>
    %92 = arith.addf %90, %91 : vector<8x128xf32>
    %93 = math.tanh %92 : vector<8x128xf32>
    %94 = arith.mulf %89, %93 : vector<8x128xf32>
    %95 = arith.index_cast %c1_i32 : i32 to index
    %c0_39 = arith.constant 0 : index
    %c0_40 = arith.constant 0 : index
    %96 = vector.load %arg17[%95, %c0_39, %c0_40] : memref<8x8x128xf32, #tpu.memory_space<vmem>>, vector<1x8x128xf32>
    %97 = vector.shape_cast %96 : vector<1x8x128xf32> to vector<8x128xf32>
    %98 = vector.shape_cast %94 : vector<8x128xf32> to vector<1x8x128xf32>
    tpu.vector_store %arg17[%95, %c0_39, %c0_40], %98 {strides = array<i32>} : memref<8x8x128xf32, #tpu.memory_space<vmem>>, vector<1x8x128xf32>,
    %c2_i32 = arith.constant 2 : i32
    %c7_i32_41 = arith.constant 7 : i32
    %99 = arith.subi %c7_i32_41, %c2_i32 : i32
    %100 = arith.index_cast %c2_i32 : i32 to index
    %c0_42 = arith.constant 0 : index
    %c0_43 = arith.constant 0 : index
    %101 = vector.load %arg15[%100, %c0_42, %c0_43] : memref<8x8x512xf32, #tpu.memory_space<vmem>>, vector<1x8x512xf32>
    %102 = vector.shape_cast %101 : vector<1x8x512xf32> to vector<8x512xf32>
    %103 = arith.index_cast %99 : i32 to index
    %c0_44 = arith.constant 0 : index
    %c0_45 = arith.constant 0 : index
    %104 = vector.load %arg16[%103, %c0_44, %c0_45] : memref<8x8x512xf32, #tpu.memory_space<vmem>>, vector<1x8x512xf32>
    %105 = vector.shape_cast %104 : vector<1x8x512xf32> to vector<8x512xf32>
    %106 = arith.addf %102, %105 : vector<8x512xf32>
    %cst_46 = arith.constant dense<0.000000e+00> : vector<8x512xf32>
    %107 = tpu.matmul %94, %19, %cst_46 {dimension_numbers = #tpu.dot_dimension_numbers<[1], [0], [0], [1], [0, 0, 1, 1], [], []>} : vector<8x128xf32>, vector<128x512xf32>, vector<8x512xf32> -> vector<8x512xf32>
    %108 = arith.addf %106, %107 : vector<8x512xf32>
    %109 = vector.extract_strided_slice %108 {offsets = [0, 0], sizes = [8, 128], strides = [1, 1]} : vector<8x512xf32> to vector<8x128xf32>
    %110 = arith.negf %109 : vector<8x128xf32>
    %111 = math.exp %110 : vector<8x128xf32>
    %cst_47 = arith.constant 1.000000e+00 : f32
    %112 = vector.broadcast %cst_47 : f32 to vector<8x128xf32>
    %113 = arith.addf %112, %111 : vector<8x128xf32>
    %114 = arith.divf %112, %113 : vector<8x128xf32>
    %115 = vector.extract_strided_slice %108 {offsets = [0, 128], sizes = [8, 128], strides = [1, 1]} : vector<8x512xf32> to vector<8x128xf32>
    %116 = arith.negf %115 : vector<8x128xf32>
    %117 = math.exp %116 : vector<8x128xf32>
    %cst_48 = arith.constant 1.000000e+00 : f32
    %118 = vector.broadcast %cst_48 : f32 to vector<8x128xf32>
    %119 = arith.addf %118, %117 : vector<8x128xf32>
    %120 = arith.divf %118, %119 : vector<8x128xf32>
    %121 = vector.extract_strided_slice %108 {offsets = [0, 256], sizes = [8, 128], strides = [1, 1]} : vector<8x512xf32> to vector<8x128xf32>
    %122 = math.tanh %121 : vector<8x128xf32>
    %123 = vector.extract_strided_slice %108 {offsets = [0, 384], sizes = [8, 128], strides = [1, 1]} : vector<8x512xf32> to vector<8x128xf32>
    %124 = arith.negf %123 : vector<8x128xf32>
    %125 = math.exp %124 : vector<8x128xf32>
    %cst_49 = arith.constant 1.000000e+00 : f32
    %126 = vector.broadcast %cst_49 : f32 to vector<8x128xf32>
    %127 = arith.addf %126, %125 : vector<8x128xf32>
    %128 = arith.divf %126, %127 : vector<8x128xf32>
    %129 = arith.mulf %120, %92 : vector<8x128xf32>
    %130 = arith.mulf %114, %122 : vector<8x128xf32>
    %131 = arith.addf %129, %130 : vector<8x128xf32>
    %132 = math.tanh %131 : vector<8x128xf32>
    %133 = arith.mulf %128, %132 : vector<8x128xf32>
    %134 = arith.index_cast %c2_i32 : i32 to index
    %c0_50 = arith.constant 0 : index
    %c0_51 = arith.constant 0 : index
    %135 = vector.load %arg17[%134, %c0_50, %c0_51] : memref<8x8x128xf32, #tpu.memory_space<vmem>>, vector<1x8x128xf32>
    %136 = vector.shape_cast %135 : vector<1x8x128xf32> to vector<8x128xf32>
    %137 = vector.shape_cast %133 : vector<8x128xf32> to vector<1x8x128xf32>
    tpu.vector_store %arg17[%134, %c0_50, %c0_51], %137 {strides = array<i32>} : memref<8x8x128xf32, #tpu.memory_space<vmem>>, vector<1x8x128xf32>,
    %c3_i32 = arith.constant 3 : i32
    %c7_i32_52 = arith.constant 7 : i32
    %138 = arith.subi %c7_i32_52, %c3_i32 : i32
    %139 = arith.index_cast %c3_i32 : i32 to index
    %c0_53 = arith.constant 0 : index
    %c0_54 = arith.constant 0 : index
    %140 = vector.load %arg15[%139, %c0_53, %c0_54] : memref<8x8x512xf32, #tpu.memory_space<vmem>>, vector<1x8x512xf32>
    %141 = vector.shape_cast %140 : vector<1x8x512xf32> to vector<8x512xf32>
    %142 = arith.index_cast %138 : i32 to index
    %c0_55 = arith.constant 0 : index
    %c0_56 = arith.constant 0 : index
    %143 = vector.load %arg16[%142, %c0_55, %c0_56] : memref<8x8x512xf32, #tpu.memory_space<vmem>>, vector<1x8x512xf32>
    %144 = vector.shape_cast %143 : vector<1x8x512xf32> to vector<8x512xf32>
    %145 = arith.addf %141, %144 : vector<8x512xf32>
    %cst_57 = arith.constant dense<0.000000e+00> : vector<8x512xf32>
    %146 = tpu.matmul %133, %19, %cst_57 {dimension_numbers = #tpu.dot_dimension_numbers<[1], [0], [0], [1], [0, 0, 1, 1], [], []>} : vector<8x128xf32>, vector<128x512xf32>, vector<8x512xf32> -> vector<8x512xf32>
    %147 = arith.addf %145, %146 : vector<8x512xf32>
    %148 = vector.extract_strided_slice %147 {offsets = [0, 0], sizes = [8, 128], strides = [1, 1]} : vector<8x512xf32> to vector<8x128xf32>
    %149 = arith.negf %148 : vector<8x128xf32>
    %150 = math.exp %149 : vector<8x128xf32>
    %cst_58 = arith.constant 1.000000e+00 : f32
    %151 = vector.broadcast %cst_58 : f32 to vector<8x128xf32>
    %152 = arith.addf %151, %150 : vector<8x128xf32>
    %153 = arith.divf %151, %152 : vector<8x128xf32>
    %154 = vector.extract_strided_slice %147 {offsets = [0, 128], sizes = [8, 128], strides = [1, 1]} : vector<8x512xf32> to vector<8x128xf32>
    %155 = arith.negf %154 : vector<8x128xf32>
    %156 = math.exp %155 : vector<8x128xf32>
    %cst_59 = arith.constant 1.000000e+00 : f32
    %157 = vector.broadcast %cst_59 : f32 to vector<8x128xf32>
    %158 = arith.addf %157, %156 : vector<8x128xf32>
    %159 = arith.divf %157, %158 : vector<8x128xf32>
    %160 = vector.extract_strided_slice %147 {offsets = [0, 256], sizes = [8, 128], strides = [1, 1]} : vector<8x512xf32> to vector<8x128xf32>
    %161 = math.tanh %160 : vector<8x128xf32>
    %162 = vector.extract_strided_slice %147 {offsets = [0, 384], sizes = [8, 128], strides = [1, 1]} : vector<8x512xf32> to vector<8x128xf32>
    %163 = arith.negf %162 : vector<8x128xf32>
    %164 = math.exp %163 : vector<8x128xf32>
    %cst_60 = arith.constant 1.000000e+00 : f32
    %165 = vector.broadcast %cst_60 : f32 to vector<8x128xf32>
    %166 = arith.addf %165, %164 : vector<8x128xf32>
    %167 = arith.divf %165, %166 : vector<8x128xf32>
    %168 = arith.mulf %159, %131 : vector<8x128xf32>
    %169 = arith.mulf %153, %161 : vector<8x128xf32>
    %170 = arith.addf %168, %169 : vector<8x128xf32>
    %171 = math.tanh %170 : vector<8x128xf32>
    %172 = arith.mulf %167, %171 : vector<8x128xf32>
    %173 = arith.index_cast %c3_i32 : i32 to index
    %c0_61 = arith.constant 0 : index
    %c0_62 = arith.constant 0 : index
    %174 = vector.load %arg17[%173, %c0_61, %c0_62] : memref<8x8x128xf32, #tpu.memory_space<vmem>>, vector<1x8x128xf32>
    %175 = vector.shape_cast %174 : vector<1x8x128xf32> to vector<8x128xf32>
    %176 = vector.shape_cast %172 : vector<8x128xf32> to vector<1x8x128xf32>
    tpu.vector_store %arg17[%173, %c0_61, %c0_62], %176 {strides = array<i32>} : memref<8x8x128xf32, #tpu.memory_space<vmem>>, vector<1x8x128xf32>,
    %c4_i32 = arith.constant 4 : i32
    %c7_i32_63 = arith.constant 7 : i32
    %177 = arith.subi %c7_i32_63, %c4_i32 : i32
    %178 = arith.index_cast %c4_i32 : i32 to index
    %c0_64 = arith.constant 0 : index
    %c0_65 = arith.constant 0 : index
    %179 = vector.load %arg15[%178, %c0_64, %c0_65] : memref<8x8x512xf32, #tpu.memory_space<vmem>>, vector<1x8x512xf32>
    %180 = vector.shape_cast %179 : vector<1x8x512xf32> to vector<8x512xf32>
    %181 = arith.index_cast %177 : i32 to index
    %c0_66 = arith.constant 0 : index
    %c0_67 = arith.constant 0 : index
    %182 = vector.load %arg16[%181, %c0_66, %c0_67] : memref<8x8x512xf32, #tpu.memory_space<vmem>>, vector<1x8x512xf32>
    %183 = vector.shape_cast %182 : vector<1x8x512xf32> to vector<8x512xf32>
    %184 = arith.addf %180, %183 : vector<8x512xf32>
    %cst_68 = arith.constant dense<0.000000e+00> : vector<8x512xf32>
    %185 = tpu.matmul %172, %19, %cst_68 {dimension_numbers = #tpu.dot_dimension_numbers<[1], [0], [0], [1], [0, 0, 1, 1], [], []>} : vector<8x128xf32>, vector<128x512xf32>, vector<8x512xf32> -> vector<8x512xf32>
    %186 = arith.addf %184, %185 : vector<8x512xf32>
    %187 = vector.extract_strided_slice %186 {offsets = [0, 0], sizes = [8, 128], strides = [1, 1]} : vector<8x512xf32> to vector<8x128xf32>
    %188 = arith.negf %187 : vector<8x128xf32>
    %189 = math.exp %188 : vector<8x128xf32>
    %cst_69 = arith.constant 1.000000e+00 : f32
    %190 = vector.broadcast %cst_69 : f32 to vector<8x128xf32>
    %191 = arith.addf %190, %189 : vector<8x128xf32>
    %192 = arith.divf %190, %191 : vector<8x128xf32>
    %193 = vector.extract_strided_slice %186 {offsets = [0, 128], sizes = [8, 128], strides = [1, 1]} : vector<8x512xf32> to vector<8x128xf32>
    %194 = arith.negf %193 : vector<8x128xf32>
    %195 = math.exp %194 : vector<8x128xf32>
    %cst_70 = arith.constant 1.000000e+00 : f32
    %196 = vector.broadcast %cst_70 : f32 to vector<8x128xf32>
    %197 = arith.addf %196, %195 : vector<8x128xf32>
    %198 = arith.divf %196, %197 : vector<8x128xf32>
    %199 = vector.extract_strided_slice %186 {offsets = [0, 256], sizes = [8, 128], strides = [1, 1]} : vector<8x512xf32> to vector<8x128xf32>
    %200 = math.tanh %199 : vector<8x128xf32>
    %201 = vector.extract_strided_slice %186 {offsets = [0, 384], sizes = [8, 128], strides = [1, 1]} : vector<8x512xf32> to vector<8x128xf32>
    %202 = arith.negf %201 : vector<8x128xf32>
    %203 = math.exp %202 : vector<8x128xf32>
    %cst_71 = arith.constant 1.000000e+00 : f32
    %204 = vector.broadcast %cst_71 : f32 to vector<8x128xf32>
    %205 = arith.addf %204, %203 : vector<8x128xf32>
    %206 = arith.divf %204, %205 : vector<8x128xf32>
    %207 = arith.mulf %198, %170 : vector<8x128xf32>
    %208 = arith.mulf %192, %200 : vector<8x128xf32>
    %209 = arith.addf %207, %208 : vector<8x128xf32>
    %210 = math.tanh %209 : vector<8x128xf32>
    %211 = arith.mulf %206, %210 : vector<8x128xf32>
    %212 = arith.index_cast %c4_i32 : i32 to index
    %c0_72 = arith.constant 0 : index
    %c0_73 = arith.constant 0 : index
    %213 = vector.load %arg17[%212, %c0_72, %c0_73] : memref<8x8x128xf32, #tpu.memory_space<vmem>>, vector<1x8x128xf32>
    %214 = vector.shape_cast %213 : vector<1x8x128xf32> to vector<8x128xf32>
    %215 = vector.shape_cast %211 : vector<8x128xf32> to vector<1x8x128xf32>
    tpu.vector_store %arg17[%212, %c0_72, %c0_73], %215 {strides = array<i32>} : memref<8x8x128xf32, #tpu.memory_space<vmem>>, vector<1x8x128xf32>,
    %c5_i32 = arith.constant 5 : i32
    %c7_i32_74 = arith.constant 7 : i32
    %216 = arith.subi %c7_i32_74, %c5_i32 : i32
    %217 = arith.index_cast %c5_i32 : i32 to index
    %c0_75 = arith.constant 0 : index
    %c0_76 = arith.constant 0 : index
    %218 = vector.load %arg15[%217, %c0_75, %c0_76] : memref<8x8x512xf32, #tpu.memory_space<vmem>>, vector<1x8x512xf32>
    %219 = vector.shape_cast %218 : vector<1x8x512xf32> to vector<8x512xf32>
    %220 = arith.index_cast %216 : i32 to index
    %c0_77 = arith.constant 0 : index
    %c0_78 = arith.constant 0 : index
    %221 = vector.load %arg16[%220, %c0_77, %c0_78] : memref<8x8x512xf32, #tpu.memory_space<vmem>>, vector<1x8x512xf32>
    %222 = vector.shape_cast %221 : vector<1x8x512xf32> to vector<8x512xf32>
    %223 = arith.addf %219, %222 : vector<8x512xf32>
    %cst_79 = arith.constant dense<0.000000e+00> : vector<8x512xf32>
    %224 = tpu.matmul %211, %19, %cst_79 {dimension_numbers = #tpu.dot_dimension_numbers<[1], [0], [0], [1], [0, 0, 1, 1], [], []>} : vector<8x128xf32>, vector<128x512xf32>, vector<8x512xf32> -> vector<8x512xf32>
    %225 = arith.addf %223, %224 : vector<8x512xf32>
    %226 = vector.extract_strided_slice %225 {offsets = [0, 0], sizes = [8, 128], strides = [1, 1]} : vector<8x512xf32> to vector<8x128xf32>
    %227 = arith.negf %226 : vector<8x128xf32>
    %228 = math.exp %227 : vector<8x128xf32>
    %cst_80 = arith.constant 1.000000e+00 : f32
    %229 = vector.broadcast %cst_80 : f32 to vector<8x128xf32>
    %230 = arith.addf %229, %228 : vector<8x128xf32>
    %231 = arith.divf %229, %230 : vector<8x128xf32>
    %232 = vector.extract_strided_slice %225 {offsets = [0, 128], sizes = [8, 128], strides = [1, 1]} : vector<8x512xf32> to vector<8x128xf32>
    %233 = arith.negf %232 : vector<8x128xf32>
    %234 = math.exp %233 : vector<8x128xf32>
    %cst_81 = arith.constant 1.000000e+00 : f32
    %235 = vector.broadcast %cst_81 : f32 to vector<8x128xf32>
    %236 = arith.addf %235, %234 : vector<8x128xf32>
    %237 = arith.divf %235, %236 : vector<8x128xf32>
    %238 = vector.extract_strided_slice %225 {offsets = [0, 256], sizes = [8, 128], strides = [1, 1]} : vector<8x512xf32> to vector<8x128xf32>
    %239 = math.tanh %238 : vector<8x128xf32>
    %240 = vector.extract_strided_slice %225 {offsets = [0, 384], sizes = [8, 128], strides = [1, 1]} : vector<8x512xf32> to vector<8x128xf32>
    %241 = arith.negf %240 : vector<8x128xf32>
    %242 = math.exp %241 : vector<8x128xf32>
    %cst_82 = arith.constant 1.000000e+00 : f32
    %243 = vector.broadcast %cst_82 : f32 to vector<8x128xf32>
    %244 = arith.addf %243, %242 : vector<8x128xf32>
    %245 = arith.divf %243, %244 : vector<8x128xf32>
    %246 = arith.mulf %237, %209 : vector<8x128xf32>
    %247 = arith.mulf %231, %239 : vector<8x128xf32>
    %248 = arith.addf %246, %247 : vector<8x128xf32>
    %249 = math.tanh %248 : vector<8x128xf32>
    %250 = arith.mulf %245, %249 : vector<8x128xf32>
    %251 = arith.index_cast %c5_i32 : i32 to index
    %c0_83 = arith.constant 0 : index
    %c0_84 = arith.constant 0 : index
    %252 = vector.load %arg17[%251, %c0_83, %c0_84] : memref<8x8x128xf32, #tpu.memory_space<vmem>>, vector<1x8x128xf32>
    %253 = vector.shape_cast %252 : vector<1x8x128xf32> to vector<8x128xf32>
    %254 = vector.shape_cast %250 : vector<8x128xf32> to vector<1x8x128xf32>
    tpu.vector_store %arg17[%251, %c0_83, %c0_84], %254 {strides = array<i32>} : memref<8x8x128xf32, #tpu.memory_space<vmem>>, vector<1x8x128xf32>,
    %c6_i32 = arith.constant 6 : i32
    %c7_i32_85 = arith.constant 7 : i32
    %255 = arith.subi %c7_i32_85, %c6_i32 : i32
    %256 = arith.index_cast %c6_i32 : i32 to index
    %c0_86 = arith.constant 0 : index
    %c0_87 = arith.constant 0 : index
    %257 = vector.load %arg15[%256, %c0_86, %c0_87] : memref<8x8x512xf32, #tpu.memory_space<vmem>>, vector<1x8x512xf32>
    %258 = vector.shape_cast %257 : vector<1x8x512xf32> to vector<8x512xf32>
    %259 = arith.index_cast %255 : i32 to index
    %c0_88 = arith.constant 0 : index
    %c0_89 = arith.constant 0 : index
    %260 = vector.load %arg16[%259, %c0_88, %c0_89] : memref<8x8x512xf32, #tpu.memory_space<vmem>>, vector<1x8x512xf32>
    %261 = vector.shape_cast %260 : vector<1x8x512xf32> to vector<8x512xf32>
    %262 = arith.addf %258, %261 : vector<8x512xf32>
    %cst_90 = arith.constant dense<0.000000e+00> : vector<8x512xf32>
    %263 = tpu.matmul %250, %19, %cst_90 {dimension_numbers = #tpu.dot_dimension_numbers<[1], [0], [0], [1], [0, 0, 1, 1], [], []>} : vector<8x128xf32>, vector<128x512xf32>, vector<8x512xf32> -> vector<8x512xf32>
    %264 = arith.addf %262, %263 : vector<8x512xf32>
    %265 = vector.extract_strided_slice %264 {offsets = [0, 0], sizes = [8, 128], strides = [1, 1]} : vector<8x512xf32> to vector<8x128xf32>
    %266 = arith.negf %265 : vector<8x128xf32>
    %267 = math.exp %266 : vector<8x128xf32>
    %cst_91 = arith.constant 1.000000e+00 : f32
    %268 = vector.broadcast %cst_91 : f32 to vector<8x128xf32>
    %269 = arith.addf %268, %267 : vector<8x128xf32>
    %270 = arith.divf %268, %269 : vector<8x128xf32>
    %271 = vector.extract_strided_slice %264 {offsets = [0, 128], sizes = [8, 128], strides = [1, 1]} : vector<8x512xf32> to vector<8x128xf32>
    %272 = arith.negf %271 : vector<8x128xf32>
    %273 = math.exp %272 : vector<8x128xf32>
    %cst_92 = arith.constant 1.000000e+00 : f32
    %274 = vector.broadcast %cst_92 : f32 to vector<8x128xf32>
    %275 = arith.addf %274, %273 : vector<8x128xf32>
    %276 = arith.divf %274, %275 : vector<8x128xf32>
    %277 = vector.extract_strided_slice %264 {offsets = [0, 256], sizes = [8, 128], strides = [1, 1]} : vector<8x512xf32> to vector<8x128xf32>
    %278 = math.tanh %277 : vector<8x128xf32>
    %279 = vector.extract_strided_slice %264 {offsets = [0, 384], sizes = [8, 128], strides = [1, 1]} : vector<8x512xf32> to vector<8x128xf32>
    %280 = arith.negf %279 : vector<8x128xf32>
    %281 = math.exp %280 : vector<8x128xf32>
    %cst_93 = arith.constant 1.000000e+00 : f32
    %282 = vector.broadcast %cst_93 : f32 to vector<8x128xf32>
    %283 = arith.addf %282, %281 : vector<8x128xf32>
    %284 = arith.divf %282, %283 : vector<8x128xf32>
    %285 = arith.mulf %276, %248 : vector<8x128xf32>
    %286 = arith.mulf %270, %278 : vector<8x128xf32>
    %287 = arith.addf %285, %286 : vector<8x128xf32>
    %288 = math.tanh %287 : vector<8x128xf32>
    %289 = arith.mulf %284, %288 : vector<8x128xf32>
    %290 = arith.index_cast %c6_i32 : i32 to index
    %c0_94 = arith.constant 0 : index
    %c0_95 = arith.constant 0 : index
    %291 = vector.load %arg17[%290, %c0_94, %c0_95] : memref<8x8x128xf32, #tpu.memory_space<vmem>>, vector<1x8x128xf32>
    %292 = vector.shape_cast %291 : vector<1x8x128xf32> to vector<8x128xf32>
    %293 = vector.shape_cast %289 : vector<8x128xf32> to vector<1x8x128xf32>
    tpu.vector_store %arg17[%290, %c0_94, %c0_95], %293 {strides = array<i32>} : memref<8x8x128xf32, #tpu.memory_space<vmem>>, vector<1x8x128xf32>,
    %c7_i32_96 = arith.constant 7 : i32
    %c7_i32_97 = arith.constant 7 : i32
    %294 = arith.subi %c7_i32_97, %c7_i32_96 : i32
    %295 = arith.index_cast %c7_i32_96 : i32 to index
    %c0_98 = arith.constant 0 : index
    %c0_99 = arith.constant 0 : index
    %296 = vector.load %arg15[%295, %c0_98, %c0_99] : memref<8x8x512xf32, #tpu.memory_space<vmem>>, vector<1x8x512xf32>
    %297 = vector.shape_cast %296 : vector<1x8x512xf32> to vector<8x512xf32>
    %298 = arith.index_cast %294 : i32 to index
    %c0_100 = arith.constant 0 : index
    %c0_101 = arith.constant 0 : index
    %299 = vector.load %arg16[%298, %c0_100, %c0_101] : memref<8x8x512xf32, #tpu.memory_space<vmem>>, vector<1x8x512xf32>
    %300 = vector.shape_cast %299 : vector<1x8x512xf32> to vector<8x512xf32>
    %301 = arith.addf %297, %300 : vector<8x512xf32>
    %cst_102 = arith.constant dense<0.000000e+00> : vector<8x512xf32>
    %302 = tpu.matmul %289, %19, %cst_102 {dimension_numbers = #tpu.dot_dimension_numbers<[1], [0], [0], [1], [0, 0, 1, 1], [], []>} : vector<8x128xf32>, vector<128x512xf32>, vector<8x512xf32> -> vector<8x512xf32>
    %303 = arith.addf %301, %302 : vector<8x512xf32>
    %304 = vector.extract_strided_slice %303 {offsets = [0, 0], sizes = [8, 128], strides = [1, 1]} : vector<8x512xf32> to vector<8x128xf32>
    %305 = arith.negf %304 : vector<8x128xf32>
    %306 = math.exp %305 : vector<8x128xf32>
    %cst_103 = arith.constant 1.000000e+00 : f32
    %307 = vector.broadcast %cst_103 : f32 to vector<8x128xf32>
    %308 = arith.addf %307, %306 : vector<8x128xf32>
    %309 = arith.divf %307, %308 : vector<8x128xf32>
    %310 = vector.extract_strided_slice %303 {offsets = [0, 128], sizes = [8, 128], strides = [1, 1]} : vector<8x512xf32> to vector<8x128xf32>
    %311 = arith.negf %310 : vector<8x128xf32>
    %312 = math.exp %311 : vector<8x128xf32>
    %cst_104 = arith.constant 1.000000e+00 : f32
    %313 = vector.broadcast %cst_104 : f32 to vector<8x128xf32>
    %314 = arith.addf %313, %312 : vector<8x128xf32>
    %315 = arith.divf %313, %314 : vector<8x128xf32>
    %316 = vector.extract_strided_slice %303 {offsets = [0, 256], sizes = [8, 128], strides = [1, 1]} : vector<8x512xf32> to vector<8x128xf32>
    %317 = math.tanh %316 : vector<8x128xf32>
    %318 = vector.extract_strided_slice %303 {offsets = [0, 384], sizes = [8, 128], strides = [1, 1]} : vector<8x512xf32> to vector<8x128xf32>
    %319 = arith.negf %318 : vector<8x128xf32>
    %320 = math.exp %319 : vector<8x128xf32>
    %cst_105 = arith.constant 1.000000e+00 : f32
    %321 = vector.broadcast %cst_105 : f32 to vector<8x128xf32>
    %322 = arith.addf %321, %320 : vector<8x128xf32>
    %323 = arith.divf %321, %322 : vector<8x128xf32>
    %324 = arith.mulf %315, %287 : vector<8x128xf32>
    %325 = arith.mulf %309, %317 : vector<8x128xf32>
    %326 = arith.addf %324, %325 : vector<8x128xf32>
    %327 = math.tanh %326 : vector<8x128xf32>
    %328 = arith.mulf %323, %327 : vector<8x128xf32>
    %329 = arith.index_cast %c7_i32_96 : i32 to index
    %c0_106 = arith.constant 0 : index
    %c0_107 = arith.constant 0 : index
    %330 = vector.load %arg17[%329, %c0_106, %c0_107] : memref<8x8x128xf32, #tpu.memory_space<vmem>>, vector<1x8x128xf32>
    %331 = vector.shape_cast %330 : vector<1x8x128xf32> to vector<8x128xf32>
    %332 = vector.shape_cast %328 : vector<8x128xf32> to vector<1x8x128xf32>
    tpu.vector_store %arg17[%329, %c0_106, %c0_107], %332 {strides = array<i32>} : memref<8x8x128xf32, #tpu.memory_space<vmem>>, vector<1x8x128xf32>,
    %c8_i32 = arith.constant 8 : i32
    %c0_108 = arith.constant 0 : index
    %c0_109 = arith.constant 0 : index
    %c0_110 = arith.constant 0 : index
    %333 = vector.load %arg17[%c0_108, %c0_109, %c0_110] : memref<8x8x128xf32, #tpu.memory_space<vmem>>, vector<8x8x128xf32>
    %334 = vector.shape_cast %333 : vector<8x8x128xf32> to vector<64x128xf32>
    %c0_111 = arith.constant 0 : index
    %c0_112 = arith.constant 0 : index
    %335 = vector.load %arg6[%c0_111, %c0_112] : memref<128x512xf32, #tpu.memory_space<vmem>>, vector<128x512xf32>
    %cst_113 = arith.constant dense<0.000000e+00> : vector<64x512xf32>
    %336 = tpu.matmul %334, %335, %cst_113 {dimension_numbers = #tpu.dot_dimension_numbers<[1], [0], [0], [1], [0, 0, 1, 1], [], []>} : vector<64x128xf32>, vector<128x512xf32>, vector<64x512xf32> -> vector<64x512xf32>
    %c0_114 = arith.constant 0 : index
    %c0_115 = arith.constant 0 : index
    %337 = vector.load %arg8[%c0_114, %c0_115] : memref<1x512xf32, #tpu.memory_space<vmem>>, vector<1x512xf32>
    %338 = vector.broadcast %337 : vector<1x512xf32> to vector<64x512xf32>
    %339 = arith.addf %336, %338 : vector<64x512xf32>
    %340 = vector.shape_cast %339 : vector<64x512xf32> to vector<8x8x512xf32>
    %c0_116 = arith.constant 0 : index
    %c0_117 = arith.constant 0 : index
    %c0_118 = arith.constant 0 : index
    %341 = vector.load %arg15[%c0_116, %c0_117, %c0_118] : memref<8x8x512xf32, #tpu.memory_space<vmem>>, vector<8x8x512xf32>
    tpu.vector_store %arg15[%c0_116, %c0_117, %c0_118], %340 {strides = array<i32>} : memref<8x8x512xf32, #tpu.memory_space<vmem>>, vector<8x8x512xf32>,
    %c0_119 = arith.constant 0 : index
    %c0_120 = arith.constant 0 : index
    %342 = vector.load %arg7[%c0_119, %c0_120] : memref<128x512xf32, #tpu.memory_space<vmem>>, vector<128x512xf32>
    %cst_121 = arith.constant dense<0.000000e+00> : vector<64x512xf32>
    %343 = tpu.matmul %334, %342, %cst_121 {dimension_numbers = #tpu.dot_dimension_numbers<[1], [0], [0], [1], [0, 0, 1, 1], [], []>} : vector<64x128xf32>, vector<128x512xf32>, vector<64x512xf32> -> vector<64x512xf32>
    %344 = vector.shape_cast %343 : vector<64x512xf32> to vector<8x8x512xf32>
    %c0_122 = arith.constant 0 : index
    %c0_123 = arith.constant 0 : index
    %c0_124 = arith.constant 0 : index
    %345 = vector.load %arg16[%c0_122, %c0_123, %c0_124] : memref<8x8x512xf32, #tpu.memory_space<vmem>>, vector<8x8x512xf32>
    tpu.vector_store %arg16[%c0_122, %c0_123, %c0_124], %344 {strides = array<i32>} : memref<8x8x512xf32, #tpu.memory_space<vmem>>, vector<8x8x512xf32>,
    %c0_125 = arith.constant 0 : index
    %c0_126 = arith.constant 0 : index
    %346 = vector.load %arg9[%c0_125, %c0_126] : memref<128x512xf32, #tpu.memory_space<vmem>>, vector<128x512xf32>
    %cst_127 = arith.constant 0.000000e+00 : f32
    %347 = vector.broadcast %cst_127 : f32 to vector<8x128xf32>
    %c0_i32_128 = arith.constant 0 : i32
    %c7_i32_129 = arith.constant 7 : i32
    %348 = arith.subi %c7_i32_129, %c0_i32_128 : i32
    %349 = arith.index_cast %c0_i32_128 : i32 to index
    %c0_130 = arith.constant 0 : index
    %c0_131 = arith.constant 0 : index
    %350 = vector.load %arg15[%349, %c0_130, %c0_131] : memref<8x8x512xf32, #tpu.memory_space<vmem>>, vector<1x8x512xf32>
    %351 = vector.shape_cast %350 : vector<1x8x512xf32> to vector<8x512xf32>
    %352 = arith.index_cast %348 : i32 to index
    %c0_132 = arith.constant 0 : index
    %c0_133 = arith.constant 0 : index
    %353 = vector.load %arg16[%352, %c0_132, %c0_133] : memref<8x8x512xf32, #tpu.memory_space<vmem>>, vector<1x8x512xf32>
    %354 = vector.shape_cast %353 : vector<1x8x512xf32> to vector<8x512xf32>
    %355 = arith.addf %351, %354 : vector<8x512xf32>
    %cst_134 = arith.constant dense<0.000000e+00> : vector<8x512xf32>
    %356 = tpu.matmul %347, %346, %cst_134 {dimension_numbers = #tpu.dot_dimension_numbers<[1], [0], [0], [1], [0, 0, 1, 1], [], []>} : vector<8x128xf32>, vector<128x512xf32>, vector<8x512xf32> -> vector<8x512xf32>
    %357 = arith.addf %355, %356 : vector<8x512xf32>
    %358 = vector.extract_strided_slice %357 {offsets = [0, 0], sizes = [8, 128], strides = [1, 1]} : vector<8x512xf32> to vector<8x128xf32>
    %359 = arith.negf %358 : vector<8x128xf32>
    %360 = math.exp %359 : vector<8x128xf32>
    %cst_135 = arith.constant 1.000000e+00 : f32
    %361 = vector.broadcast %cst_135 : f32 to vector<8x128xf32>
    %362 = arith.addf %361, %360 : vector<8x128xf32>
    %363 = arith.divf %361, %362 : vector<8x128xf32>
    %364 = vector.extract_strided_slice %357 {offsets = [0, 128], sizes = [8, 128], strides = [1, 1]} : vector<8x512xf32> to vector<8x128xf32>
    %365 = arith.negf %364 : vector<8x128xf32>
    %366 = math.exp %365 : vector<8x128xf32>
    %cst_136 = arith.constant 1.000000e+00 : f32
    %367 = vector.broadcast %cst_136 : f32 to vector<8x128xf32>
    %368 = arith.addf %367, %366 : vector<8x128xf32>
    %369 = arith.divf %367, %368 : vector<8x128xf32>
    %370 = vector.extract_strided_slice %357 {offsets = [0, 256], sizes = [8, 128], strides = [1, 1]} : vector<8x512xf32> to vector<8x128xf32>
    %371 = math.tanh %370 : vector<8x128xf32>
    %372 = vector.extract_strided_slice %357 {offsets = [0, 384], sizes = [8, 128], strides = [1, 1]} : vector<8x512xf32> to vector<8x128xf32>
    %373 = arith.negf %372 : vector<8x128xf32>
    %374 = math.exp %373 : vector<8x128xf32>
    %cst_137 = arith.constant 1.000000e+00 : f32
    %375 = vector.broadcast %cst_137 : f32 to vector<8x128xf32>
    %376 = arith.addf %375, %374 : vector<8x128xf32>
    %377 = arith.divf %375, %376 : vector<8x128xf32>
    %378 = arith.mulf %369, %347 : vector<8x128xf32>
    %379 = arith.mulf %363, %371 : vector<8x128xf32>
    %380 = arith.addf %378, %379 : vector<8x128xf32>
    %381 = math.tanh %380 : vector<8x128xf32>
    %382 = arith.mulf %377, %381 : vector<8x128xf32>
    %c1_i32_138 = arith.constant 1 : i32
    %c7_i32_139 = arith.constant 7 : i32
    %383 = arith.subi %c7_i32_139, %c1_i32_138 : i32
    %384 = arith.index_cast %c1_i32_138 : i32 to index
    %c0_140 = arith.constant 0 : index
    %c0_141 = arith.constant 0 : index
    %385 = vector.load %arg15[%384, %c0_140, %c0_141] : memref<8x8x512xf32, #tpu.memory_space<vmem>>, vector<1x8x512xf32>
    %386 = vector.shape_cast %385 : vector<1x8x512xf32> to vector<8x512xf32>
    %387 = arith.index_cast %383 : i32 to index
    %c0_142 = arith.constant 0 : index
    %c0_143 = arith.constant 0 : index
    %388 = vector.load %arg16[%387, %c0_142, %c0_143] : memref<8x8x512xf32, #tpu.memory_space<vmem>>, vector<1x8x512xf32>
    %389 = vector.shape_cast %388 : vector<1x8x512xf32> to vector<8x512xf32>
    %390 = arith.addf %386, %389 : vector<8x512xf32>
    %cst_144 = arith.constant dense<0.000000e+00> : vector<8x512xf32>
    %391 = tpu.matmul %382, %346, %cst_144 {dimension_numbers = #tpu.dot_dimension_numbers<[1], [0], [0], [1], [0, 0, 1, 1], [], []>} : vector<8x128xf32>, vector<128x512xf32>, vector<8x512xf32> -> vector<8x512xf32>
    %392 = arith.addf %390, %391 : vector<8x512xf32>
    %393 = vector.extract_strided_slice %392 {offsets = [0, 0], sizes = [8, 128], strides = [1, 1]} : vector<8x512xf32> to vector<8x128xf32>
    %394 = arith.negf %393 : vector<8x128xf32>
    %395 = math.exp %394 : vector<8x128xf32>
    %cst_145 = arith.constant 1.000000e+00 : f32
    %396 = vector.broadcast %cst_145 : f32 to vector<8x128xf32>
    %397 = arith.addf %396, %395 : vector<8x128xf32>
    %398 = arith.divf %396, %397 : vector<8x128xf32>
    %399 = vector.extract_strided_slice %392 {offsets = [0, 128], sizes = [8, 128], strides = [1, 1]} : vector<8x512xf32> to vector<8x128xf32>
    %400 = arith.negf %399 : vector<8x128xf32>
    %401 = math.exp %400 : vector<8x128xf32>
    %cst_146 = arith.constant 1.000000e+00 : f32
    %402 = vector.broadcast %cst_146 : f32 to vector<8x128xf32>
    %403 = arith.addf %402, %401 : vector<8x128xf32>
    %404 = arith.divf %402, %403 : vector<8x128xf32>
    %405 = vector.extract_strided_slice %392 {offsets = [0, 256], sizes = [8, 128], strides = [1, 1]} : vector<8x512xf32> to vector<8x128xf32>
    %406 = math.tanh %405 : vector<8x128xf32>
    %407 = vector.extract_strided_slice %392 {offsets = [0, 384], sizes = [8, 128], strides = [1, 1]} : vector<8x512xf32> to vector<8x128xf32>
    %408 = arith.negf %407 : vector<8x128xf32>
    %409 = math.exp %408 : vector<8x128xf32>
    %cst_147 = arith.constant 1.000000e+00 : f32
    %410 = vector.broadcast %cst_147 : f32 to vector<8x128xf32>
    %411 = arith.addf %410, %409 : vector<8x128xf32>
    %412 = arith.divf %410, %411 : vector<8x128xf32>
    %413 = arith.mulf %404, %380 : vector<8x128xf32>
    %414 = arith.mulf %398, %406 : vector<8x128xf32>
    %415 = arith.addf %413, %414 : vector<8x128xf32>
    %416 = math.tanh %415 : vector<8x128xf32>
    %417 = arith.mulf %412, %416 : vector<8x128xf32>
    %c2_i32_148 = arith.constant 2 : i32
    %c7_i32_149 = arith.constant 7 : i32
    %418 = arith.subi %c7_i32_149, %c2_i32_148 : i32
    %419 = arith.index_cast %c2_i32_148 : i32 to index
    %c0_150 = arith.constant 0 : index
    %c0_151 = arith.constant 0 : index
    %420 = vector.load %arg15[%419, %c0_150, %c0_151] : memref<8x8x512xf32, #tpu.memory_space<vmem>>, vector<1x8x512xf32>
    %421 = vector.shape_cast %420 : vector<1x8x512xf32> to vector<8x512xf32>
    %422 = arith.index_cast %418 : i32 to index
    %c0_152 = arith.constant 0 : index
    %c0_153 = arith.constant 0 : index
    %423 = vector.load %arg16[%422, %c0_152, %c0_153] : memref<8x8x512xf32, #tpu.memory_space<vmem>>, vector<1x8x512xf32>
    %424 = vector.shape_cast %423 : vector<1x8x512xf32> to vector<8x512xf32>
    %425 = arith.addf %421, %424 : vector<8x512xf32>
    %cst_154 = arith.constant dense<0.000000e+00> : vector<8x512xf32>
    %426 = tpu.matmul %417, %346, %cst_154 {dimension_numbers = #tpu.dot_dimension_numbers<[1], [0], [0], [1], [0, 0, 1, 1], [], []>} : vector<8x128xf32>, vector<128x512xf32>, vector<8x512xf32> -> vector<8x512xf32>
    %427 = arith.addf %425, %426 : vector<8x512xf32>
    %428 = vector.extract_strided_slice %427 {offsets = [0, 0], sizes = [8, 128], strides = [1, 1]} : vector<8x512xf32> to vector<8x128xf32>
    %429 = arith.negf %428 : vector<8x128xf32>
    %430 = math.exp %429 : vector<8x128xf32>
    %cst_155 = arith.constant 1.000000e+00 : f32
    %431 = vector.broadcast %cst_155 : f32 to vector<8x128xf32>
    %432 = arith.addf %431, %430 : vector<8x128xf32>
    %433 = arith.divf %431, %432 : vector<8x128xf32>
    %434 = vector.extract_strided_slice %427 {offsets = [0, 128], sizes = [8, 128], strides = [1, 1]} : vector<8x512xf32> to vector<8x128xf32>
    %435 = arith.negf %434 : vector<8x128xf32>
    %436 = math.exp %435 : vector<8x128xf32>
    %cst_156 = arith.constant 1.000000e+00 : f32
    %437 = vector.broadcast %cst_156 : f32 to vector<8x128xf32>
    %438 = arith.addf %437, %436 : vector<8x128xf32>
    %439 = arith.divf %437, %438 : vector<8x128xf32>
    %440 = vector.extract_strided_slice %427 {offsets = [0, 256], sizes = [8, 128], strides = [1, 1]} : vector<8x512xf32> to vector<8x128xf32>
    %441 = math.tanh %440 : vector<8x128xf32>
    %442 = vector.extract_strided_slice %427 {offsets = [0, 384], sizes = [8, 128], strides = [1, 1]} : vector<8x512xf32> to vector<8x128xf32>
    %443 = arith.negf %442 : vector<8x128xf32>
    %444 = math.exp %443 : vector<8x128xf32>
    %cst_157 = arith.constant 1.000000e+00 : f32
    %445 = vector.broadcast %cst_157 : f32 to vector<8x128xf32>
    %446 = arith.addf %445, %444 : vector<8x128xf32>
    %447 = arith.divf %445, %446 : vector<8x128xf32>
    %448 = arith.mulf %439, %415 : vector<8x128xf32>
    %449 = arith.mulf %433, %441 : vector<8x128xf32>
    %450 = arith.addf %448, %449 : vector<8x128xf32>
    %451 = math.tanh %450 : vector<8x128xf32>
    %452 = arith.mulf %447, %451 : vector<8x128xf32>
    %c3_i32_158 = arith.constant 3 : i32
    %c7_i32_159 = arith.constant 7 : i32
    %453 = arith.subi %c7_i32_159, %c3_i32_158 : i32
    %454 = arith.index_cast %c3_i32_158 : i32 to index
    %c0_160 = arith.constant 0 : index
    %c0_161 = arith.constant 0 : index
    %455 = vector.load %arg15[%454, %c0_160, %c0_161] : memref<8x8x512xf32, #tpu.memory_space<vmem>>, vector<1x8x512xf32>
    %456 = vector.shape_cast %455 : vector<1x8x512xf32> to vector<8x512xf32>
    %457 = arith.index_cast %453 : i32 to index
    %c0_162 = arith.constant 0 : index
    %c0_163 = arith.constant 0 : index
    %458 = vector.load %arg16[%457, %c0_162, %c0_163] : memref<8x8x512xf32, #tpu.memory_space<vmem>>, vector<1x8x512xf32>
    %459 = vector.shape_cast %458 : vector<1x8x512xf32> to vector<8x512xf32>
    %460 = arith.addf %456, %459 : vector<8x512xf32>
    %cst_164 = arith.constant dense<0.000000e+00> : vector<8x512xf32>
    %461 = tpu.matmul %452, %346, %cst_164 {dimension_numbers = #tpu.dot_dimension_numbers<[1], [0], [0], [1], [0, 0, 1, 1], [], []>} : vector<8x128xf32>, vector<128x512xf32>, vector<8x512xf32> -> vector<8x512xf32>
    %462 = arith.addf %460, %461 : vector<8x512xf32>
    %463 = vector.extract_strided_slice %462 {offsets = [0, 0], sizes = [8, 128], strides = [1, 1]} : vector<8x512xf32> to vector<8x128xf32>
    %464 = arith.negf %463 : vector<8x128xf32>
    %465 = math.exp %464 : vector<8x128xf32>
    %cst_165 = arith.constant 1.000000e+00 : f32
    %466 = vector.broadcast %cst_165 : f32 to vector<8x128xf32>
    %467 = arith.addf %466, %465 : vector<8x128xf32>
    %468 = arith.divf %466, %467 : vector<8x128xf32>
    %469 = vector.extract_strided_slice %462 {offsets = [0, 128], sizes = [8, 128], strides = [1, 1]} : vector<8x512xf32> to vector<8x128xf32>
    %470 = arith.negf %469 : vector<8x128xf32>
    %471 = math.exp %470 : vector<8x128xf32>
    %cst_166 = arith.constant 1.000000e+00 : f32
    %472 = vector.broadcast %cst_166 : f32 to vector<8x128xf32>
    %473 = arith.addf %472, %471 : vector<8x128xf32>
    %474 = arith.divf %472, %473 : vector<8x128xf32>
    %475 = vector.extract_strided_slice %462 {offsets = [0, 256], sizes = [8, 128], strides = [1, 1]} : vector<8x512xf32> to vector<8x128xf32>
    %476 = math.tanh %475 : vector<8x128xf32>
    %477 = vector.extract_strided_slice %462 {offsets = [0, 384], sizes = [8, 128], strides = [1, 1]} : vector<8x512xf32> to vector<8x128xf32>
    %478 = arith.negf %477 : vector<8x128xf32>
    %479 = math.exp %478 : vector<8x128xf32>
    %cst_167 = arith.constant 1.000000e+00 : f32
    %480 = vector.broadcast %cst_167 : f32 to vector<8x128xf32>
    %481 = arith.addf %480, %479 : vector<8x128xf32>
    %482 = arith.divf %480, %481 : vector<8x128xf32>
    %483 = arith.mulf %474, %450 : vector<8x128xf32>
    %484 = arith.mulf %468, %476 : vector<8x128xf32>
    %485 = arith.addf %483, %484 : vector<8x128xf32>
    %486 = math.tanh %485 : vector<8x128xf32>
    %487 = arith.mulf %482, %486 : vector<8x128xf32>
    %c4_i32_168 = arith.constant 4 : i32
    %c7_i32_169 = arith.constant 7 : i32
    %488 = arith.subi %c7_i32_169, %c4_i32_168 : i32
    %489 = arith.index_cast %c4_i32_168 : i32 to index
    %c0_170 = arith.constant 0 : index
    %c0_171 = arith.constant 0 : index
    %490 = vector.load %arg15[%489, %c0_170, %c0_171] : memref<8x8x512xf32, #tpu.memory_space<vmem>>, vector<1x8x512xf32>
    %491 = vector.shape_cast %490 : vector<1x8x512xf32> to vector<8x512xf32>
    %492 = arith.index_cast %488 : i32 to index
    %c0_172 = arith.constant 0 : index
    %c0_173 = arith.constant 0 : index
    %493 = vector.load %arg16[%492, %c0_172, %c0_173] : memref<8x8x512xf32, #tpu.memory_space<vmem>>, vector<1x8x512xf32>
    %494 = vector.shape_cast %493 : vector<1x8x512xf32> to vector<8x512xf32>
    %495 = arith.addf %491, %494 : vector<8x512xf32>
    %cst_174 = arith.constant dense<0.000000e+00> : vector<8x512xf32>
    %496 = tpu.matmul %487, %346, %cst_174 {dimension_numbers = #tpu.dot_dimension_numbers<[1], [0], [0], [1], [0, 0, 1, 1], [], []>} : vector<8x128xf32>, vector<128x512xf32>, vector<8x512xf32> -> vector<8x512xf32>
    %497 = arith.addf %495, %496 : vector<8x512xf32>
    %498 = vector.extract_strided_slice %497 {offsets = [0, 0], sizes = [8, 128], strides = [1, 1]} : vector<8x512xf32> to vector<8x128xf32>
    %499 = arith.negf %498 : vector<8x128xf32>
    %500 = math.exp %499 : vector<8x128xf32>
    %cst_175 = arith.constant 1.000000e+00 : f32
    %501 = vector.broadcast %cst_175 : f32 to vector<8x128xf32>
    %502 = arith.addf %501, %500 : vector<8x128xf32>
    %503 = arith.divf %501, %502 : vector<8x128xf32>
    %504 = vector.extract_strided_slice %497 {offsets = [0, 128], sizes = [8, 128], strides = [1, 1]} : vector<8x512xf32> to vector<8x128xf32>
    %505 = arith.negf %504 : vector<8x128xf32>
    %506 = math.exp %505 : vector<8x128xf32>
    %cst_176 = arith.constant 1.000000e+00 : f32
    %507 = vector.broadcast %cst_176 : f32 to vector<8x128xf32>
    %508 = arith.addf %507, %506 : vector<8x128xf32>
    %509 = arith.divf %507, %508 : vector<8x128xf32>
    %510 = vector.extract_strided_slice %497 {offsets = [0, 256], sizes = [8, 128], strides = [1, 1]} : vector<8x512xf32> to vector<8x128xf32>
    %511 = math.tanh %510 : vector<8x128xf32>
    %512 = vector.extract_strided_slice %497 {offsets = [0, 384], sizes = [8, 128], strides = [1, 1]} : vector<8x512xf32> to vector<8x128xf32>
    %513 = arith.negf %512 : vector<8x128xf32>
    %514 = math.exp %513 : vector<8x128xf32>
    %cst_177 = arith.constant 1.000000e+00 : f32
    %515 = vector.broadcast %cst_177 : f32 to vector<8x128xf32>
    %516 = arith.addf %515, %514 : vector<8x128xf32>
    %517 = arith.divf %515, %516 : vector<8x128xf32>
    %518 = arith.mulf %509, %485 : vector<8x128xf32>
    %519 = arith.mulf %503, %511 : vector<8x128xf32>
    %520 = arith.addf %518, %519 : vector<8x128xf32>
    %521 = math.tanh %520 : vector<8x128xf32>
    %522 = arith.mulf %517, %521 : vector<8x128xf32>
    %c5_i32_178 = arith.constant 5 : i32
    %c7_i32_179 = arith.constant 7 : i32
    %523 = arith.subi %c7_i32_179, %c5_i32_178 : i32
    %524 = arith.index_cast %c5_i32_178 : i32 to index
    %c0_180 = arith.constant 0 : index
    %c0_181 = arith.constant 0 : index
    %525 = vector.load %arg15[%524, %c0_180, %c0_181] : memref<8x8x512xf32, #tpu.memory_space<vmem>>, vector<1x8x512xf32>
    %526 = vector.shape_cast %525 : vector<1x8x512xf32> to vector<8x512xf32>
    %527 = arith.index_cast %523 : i32 to index
    %c0_182 = arith.constant 0 : index
    %c0_183 = arith.constant 0 : index
    %528 = vector.load %arg16[%527, %c0_182, %c0_183] : memref<8x8x512xf32, #tpu.memory_space<vmem>>, vector<1x8x512xf32>
    %529 = vector.shape_cast %528 : vector<1x8x512xf32> to vector<8x512xf32>
    %530 = arith.addf %526, %529 : vector<8x512xf32>
    %cst_184 = arith.constant dense<0.000000e+00> : vector<8x512xf32>
    %531 = tpu.matmul %522, %346, %cst_184 {dimension_numbers = #tpu.dot_dimension_numbers<[1], [0], [0], [1], [0, 0, 1, 1], [], []>} : vector<8x128xf32>, vector<128x512xf32>, vector<8x512xf32> -> vector<8x512xf32>
    %532 = arith.addf %530, %531 : vector<8x512xf32>
    %533 = vector.extract_strided_slice %532 {offsets = [0, 0], sizes = [8, 128], strides = [1, 1]} : vector<8x512xf32> to vector<8x128xf32>
    %534 = arith.negf %533 : vector<8x128xf32>
    %535 = math.exp %534 : vector<8x128xf32>
    %cst_185 = arith.constant 1.000000e+00 : f32
    %536 = vector.broadcast %cst_185 : f32 to vector<8x128xf32>
    %537 = arith.addf %536, %535 : vector<8x128xf32>
    %538 = arith.divf %536, %537 : vector<8x128xf32>
    %539 = vector.extract_strided_slice %532 {offsets = [0, 128], sizes = [8, 128], strides = [1, 1]} : vector<8x512xf32> to vector<8x128xf32>
    %540 = arith.negf %539 : vector<8x128xf32>
    %541 = math.exp %540 : vector<8x128xf32>
    %cst_186 = arith.constant 1.000000e+00 : f32
    %542 = vector.broadcast %cst_186 : f32 to vector<8x128xf32>
    %543 = arith.addf %542, %541 : vector<8x128xf32>
    %544 = arith.divf %542, %543 : vector<8x128xf32>
    %545 = vector.extract_strided_slice %532 {offsets = [0, 256], sizes = [8, 128], strides = [1, 1]} : vector<8x512xf32> to vector<8x128xf32>
    %546 = math.tanh %545 : vector<8x128xf32>
    %547 = vector.extract_strided_slice %532 {offsets = [0, 384], sizes = [8, 128], strides = [1, 1]} : vector<8x512xf32> to vector<8x128xf32>
    %548 = arith.negf %547 : vector<8x128xf32>
    %549 = math.exp %548 : vector<8x128xf32>
    %cst_187 = arith.constant 1.000000e+00 : f32
    %550 = vector.broadcast %cst_187 : f32 to vector<8x128xf32>
    %551 = arith.addf %550, %549 : vector<8x128xf32>
    %552 = arith.divf %550, %551 : vector<8x128xf32>
    %553 = arith.mulf %544, %520 : vector<8x128xf32>
    %554 = arith.mulf %538, %546 : vector<8x128xf32>
    %555 = arith.addf %553, %554 : vector<8x128xf32>
    %556 = math.tanh %555 : vector<8x128xf32>
    %557 = arith.mulf %552, %556 : vector<8x128xf32>
    %c6_i32_188 = arith.constant 6 : i32
    %c7_i32_189 = arith.constant 7 : i32
    %558 = arith.subi %c7_i32_189, %c6_i32_188 : i32
    %559 = arith.index_cast %c6_i32_188 : i32 to index
    %c0_190 = arith.constant 0 : index
    %c0_191 = arith.constant 0 : index
    %560 = vector.load %arg15[%559, %c0_190, %c0_191] : memref<8x8x512xf32, #tpu.memory_space<vmem>>, vector<1x8x512xf32>
    %561 = vector.shape_cast %560 : vector<1x8x512xf32> to vector<8x512xf32>
    %562 = arith.index_cast %558 : i32 to index
    %c0_192 = arith.constant 0 : index
    %c0_193 = arith.constant 0 : index
    %563 = vector.load %arg16[%562, %c0_192, %c0_193] : memref<8x8x512xf32, #tpu.memory_space<vmem>>, vector<1x8x512xf32>
    %564 = vector.shape_cast %563 : vector<1x8x512xf32> to vector<8x512xf32>
    %565 = arith.addf %561, %564 : vector<8x512xf32>
    %cst_194 = arith.constant dense<0.000000e+00> : vector<8x512xf32>
    %566 = tpu.matmul %557, %346, %cst_194 {dimension_numbers = #tpu.dot_dimension_numbers<[1], [0], [0], [1], [0, 0, 1, 1], [], []>} : vector<8x128xf32>, vector<128x512xf32>, vector<8x512xf32> -> vector<8x512xf32>
    %567 = arith.addf %565, %566 : vector<8x512xf32>
    %568 = vector.extract_strided_slice %567 {offsets = [0, 0], sizes = [8, 128], strides = [1, 1]} : vector<8x512xf32> to vector<8x128xf32>
    %569 = arith.negf %568 : vector<8x128xf32>
    %570 = math.exp %569 : vector<8x128xf32>
    %cst_195 = arith.constant 1.000000e+00 : f32
    %571 = vector.broadcast %cst_195 : f32 to vector<8x128xf32>
    %572 = arith.addf %571, %570 : vector<8x128xf32>
    %573 = arith.divf %571, %572 : vector<8x128xf32>
    %574 = vector.extract_strided_slice %567 {offsets = [0, 128], sizes = [8, 128], strides = [1, 1]} : vector<8x512xf32> to vector<8x128xf32>
    %575 = arith.negf %574 : vector<8x128xf32>
    %576 = math.exp %575 : vector<8x128xf32>
    %cst_196 = arith.constant 1.000000e+00 : f32
    %577 = vector.broadcast %cst_196 : f32 to vector<8x128xf32>
    %578 = arith.addf %577, %576 : vector<8x128xf32>
    %579 = arith.divf %577, %578 : vector<8x128xf32>
    %580 = vector.extract_strided_slice %567 {offsets = [0, 256], sizes = [8, 128], strides = [1, 1]} : vector<8x512xf32> to vector<8x128xf32>
    %581 = math.tanh %580 : vector<8x128xf32>
    %582 = vector.extract_strided_slice %567 {offsets = [0, 384], sizes = [8, 128], strides = [1, 1]} : vector<8x512xf32> to vector<8x128xf32>
    %583 = arith.negf %582 : vector<8x128xf32>
    %584 = math.exp %583 : vector<8x128xf32>
    %cst_197 = arith.constant 1.000000e+00 : f32
    %585 = vector.broadcast %cst_197 : f32 to vector<8x128xf32>
    %586 = arith.addf %585, %584 : vector<8x128xf32>
    %587 = arith.divf %585, %586 : vector<8x128xf32>
    %588 = arith.mulf %579, %555 : vector<8x128xf32>
    %589 = arith.mulf %573, %581 : vector<8x128xf32>
    %590 = arith.addf %588, %589 : vector<8x128xf32>
    %591 = math.tanh %590 : vector<8x128xf32>
    %592 = arith.mulf %587, %591 : vector<8x128xf32>
    %c7_i32_198 = arith.constant 7 : i32
    %c7_i32_199 = arith.constant 7 : i32
    %593 = arith.subi %c7_i32_199, %c7_i32_198 : i32
    %594 = arith.index_cast %c7_i32_198 : i32 to index
    %c0_200 = arith.constant 0 : index
    %c0_201 = arith.constant 0 : index
    %595 = vector.load %arg15[%594, %c0_200, %c0_201] : memref<8x8x512xf32, #tpu.memory_space<vmem>>, vector<1x8x512xf32>
    %596 = vector.shape_cast %595 : vector<1x8x512xf32> to vector<8x512xf32>
    %597 = arith.index_cast %593 : i32 to index
    %c0_202 = arith.constant 0 : index
    %c0_203 = arith.constant 0 : index
    %598 = vector.load %arg16[%597, %c0_202, %c0_203] : memref<8x8x512xf32, #tpu.memory_space<vmem>>, vector<1x8x512xf32>
    %599 = vector.shape_cast %598 : vector<1x8x512xf32> to vector<8x512xf32>
    %600 = arith.addf %596, %599 : vector<8x512xf32>
    %cst_204 = arith.constant dense<0.000000e+00> : vector<8x512xf32>
    %601 = tpu.matmul %592, %346, %cst_204 {dimension_numbers = #tpu.dot_dimension_numbers<[1], [0], [0], [1], [0, 0, 1, 1], [], []>} : vector<8x128xf32>, vector<128x512xf32>, vector<8x512xf32> -> vector<8x512xf32>
    %602 = arith.addf %600, %601 : vector<8x512xf32>
    %603 = vector.extract_strided_slice %602 {offsets = [0, 0], sizes = [8, 128], strides = [1, 1]} : vector<8x512xf32> to vector<8x128xf32>
    %604 = arith.negf %603 : vector<8x128xf32>
    %605 = math.exp %604 : vector<8x128xf32>
    %cst_205 = arith.constant 1.000000e+00 : f32
    %606 = vector.broadcast %cst_205 : f32 to vector<8x128xf32>
    %607 = arith.addf %606, %605 : vector<8x128xf32>
    %608 = arith.divf %606, %607 : vector<8x128xf32>
    %609 = vector.extract_strided_slice %602 {offsets = [0, 128], sizes = [8, 128], strides = [1, 1]} : vector<8x512xf32> to vector<8x128xf32>
    %610 = arith.negf %609 : vector<8x128xf32>
    %611 = math.exp %610 : vector<8x128xf32>
    %cst_206 = arith.constant 1.000000e+00 : f32
    %612 = vector.broadcast %cst_206 : f32 to vector<8x128xf32>
    %613 = arith.addf %612, %611 : vector<8x128xf32>
    %614 = arith.divf %612, %613 : vector<8x128xf32>
    %615 = vector.extract_strided_slice %602 {offsets = [0, 256], sizes = [8, 128], strides = [1, 1]} : vector<8x512xf32> to vector<8x128xf32>
    %616 = math.tanh %615 : vector<8x128xf32>
    %617 = vector.extract_strided_slice %602 {offsets = [0, 384], sizes = [8, 128], strides = [1, 1]} : vector<8x512xf32> to vector<8x128xf32>
    %618 = arith.negf %617 : vector<8x128xf32>
    %619 = math.exp %618 : vector<8x128xf32>
    %cst_207 = arith.constant 1.000000e+00 : f32
    %620 = vector.broadcast %cst_207 : f32 to vector<8x128xf32>
    %621 = arith.addf %620, %619 : vector<8x128xf32>
    %622 = arith.divf %620, %621 : vector<8x128xf32>
    %623 = arith.mulf %614, %590 : vector<8x128xf32>
    %624 = arith.mulf %608, %616 : vector<8x128xf32>
    %625 = arith.addf %623, %624 : vector<8x128xf32>
    %626 = math.tanh %625 : vector<8x128xf32>
    %627 = arith.mulf %622, %626 : vector<8x128xf32>
    %c8_i32_208 = arith.constant 8 : i32
    %c0_209 = arith.constant 0 : index
    %c0_210 = arith.constant 0 : index
    %628 = vector.load %arg10[%c0_209, %c0_210] : memref<128x64xf32, #tpu.memory_space<vmem>>, vector<128x64xf32>
    %cst_211 = arith.constant dense<0.000000e+00> : vector<8x64xf32>
    %629 = tpu.matmul %627, %628, %cst_211 {dimension_numbers = #tpu.dot_dimension_numbers<[1], [0], [0], [1], [0, 0, 1, 1], [], []>} : vector<8x128xf32>, vector<128x64xf32>, vector<8x64xf32> -> vector<8x64xf32>
    %c0_212 = arith.constant 0 : index
    %c0_213 = arith.constant 0 : index
    %630 = vector.load %arg11[%c0_212, %c0_213] : memref<1x64xf32, #tpu.memory_space<vmem>>, vector<1x64xf32>
    %631 = vector.broadcast %630 : vector<1x64xf32> to vector<8x64xf32>
    %632 = arith.addf %629, %631 : vector<8x64xf32>
    %cst_214 = arith.constant 0.000000e+00 : f32
    %633 = vector.broadcast %cst_214 : f32 to vector<8x64xf32>
    %634 = arith.maximumf %632, %633 : vector<8x64xf32>
    %c0_215 = arith.constant 0 : index
    %c0_216 = arith.constant 0 : index
    %635 = vector.load %arg12[%c0_215, %c0_216] : memref<64x2xf32, #tpu.memory_space<vmem>>, vector<64x2xf32>
    %cst_217 = arith.constant dense<0.000000e+00> : vector<8x2xf32>
    %636 = tpu.matmul %634, %635, %cst_217 {dimension_numbers = #tpu.dot_dimension_numbers<[1], [0], [0], [1], [0, 0, 1, 1], [], []>} : vector<8x64xf32>, vector<64x2xf32>, vector<8x2xf32> -> vector<8x2xf32>
    %c0_218 = arith.constant 0 : index
    %c0_219 = arith.constant 0 : index
    %637 = vector.load %arg13[%c0_218, %c0_219] : memref<1x2xf32, #tpu.memory_space<vmem>>, vector<1x2xf32>
    %638 = vector.broadcast %637 : vector<1x2xf32> to vector<8x2xf32>
    %639 = arith.addf %636, %638 : vector<8x2xf32>
    %cst_220 = arith.constant dense<0xFF800000> : vector<8xf32>
    %640 = vector.multi_reduction <maximumf>, %639, %cst_220 [1] : vector<8x2xf32> to vector<8xf32>
    %641 = vector.shape_cast %640 : vector<8xf32> to vector<8x1xf32>
    %642 = vector.broadcast %641 : vector<8x1xf32> to vector<8x2xf32>
    %643 = arith.subf %639, %642 : vector<8x2xf32>
    %644 = math.exp %643 : vector<8x2xf32>
    %cst_221 = arith.constant dense<0.000000e+00> : vector<8xf32>
    %645 = vector.multi_reduction <add>, %644, %cst_221 [1] : vector<8x2xf32> to vector<8xf32>
    %646 = vector.shape_cast %645 : vector<8xf32> to vector<8x1xf32>
    %647 = math.log %646 : vector<8x1xf32>
    %648 = vector.broadcast %647 : vector<8x1xf32> to vector<8x2xf32>
    %649 = arith.subf %643, %648 : vector<8x2xf32>
    %c0_222 = arith.constant 0 : index
    %c0_223 = arith.constant 0 : index
    %650 = vector.load %arg14[%c0_222, %c0_223] : memref<8x2xf32, #tpu.memory_space<vmem>>, vector<8x2xf32>
    tpu.vector_store %arg14[%c0_222, %c0_223], %649 {strides = array<i32>} : memref<8x2xf32, #tpu.memory_space<vmem>>, vector<8x2xf32>,
    return
  }
}

</mosaic_0001>

<bundles_post_ra>
// kernel: imdb_forward.1
= control target key start
LH: loop header
LB: loop body
LE: loop exit
PB: predicated region body
PF: predicated region fallthrough
CT: control target
= control target key end

     0   :  { %19 = vsyncpa [#allocation6], 0  ;;  %s8520_s0 = inlined_call_operand.vmem [shape: s32[64,1], index: 0, kind: input, shape index: {}]   ;;  %s8521_s1 = inlined_call_operand.vmem [shape: f32[97,32], index: 1, kind: input, shape index: {}]   ;;  %s8522_s2 = inlined_call_operand.hbm [shape: f32[32,512], index: 2, kind: input, shape index: {}]   ;;  %s8523_s3 = inlined_call_operand.hbm [shape: f32[32,512], index: 3, kind: input, shape index: {}]   ;;  %s8524_s4 = inlined_call_operand.vmem [shape: f32[1,512], index: 4, kind: input, shape index: {}]   ;;  %s8525_s5 = inlined_call_operand.vmem [shape: f32[128,512], index: 5, kind: input, shape index: {}]   ;;  %s8526_s6 = inlined_call_operand.hbm [shape: f32[128,512], index: 6, kind: input, shape index: {}]   ;;  %s8527_s7 = inlined_call_operand.hbm [shape: f32[128,512], index: 7, kind: input, shape index: {}]   ;;  %s8528_s8 = inlined_call_operand.vmem [shape: f32[1,512], index: 8, kind: input, shape index: {}]   ;;  %s8529_s9 = inlined_call_operand.hbm [shape: f32[128,512], index: 9, kind: input, shape index: {}]   ;;  %s8530_s10 = inlined_call_operand.vmem [shape: f32[128,64], index: 10, kind: input, shape index: {}]   ;;  %s8531_s11 = inlined_call_operand.vmem [shape: f32[1,64], index: 11, kind: input, shape index: {}]   ;;  %s8532_s12 = inlined_call_operand.vmem [shape: f32[64,2], index: 12, kind: input, shape index: {}]   ;;  %s8533_s13 = inlined_call_operand.vmem [shape: f32[1,2], index: 13, kind: input, shape index: {}]   ;;  %s8534_s14 = inlined_call_operand.vmem [shape: f32[8,2], index: 14, kind: output, shape index: {}]  }
   0x1   :  { %20 = vsyncpa [#allocation8], 0 }
   0x2   :  { %21 = vsyncpa [#allocation11], 0  ;;  %s6926_s29 = smov [#allocation7]   ;;  %s6927_s15 = smov [#allocation10]  }
   0x3   :  { %s43_s30 = sshll.u32 %s6926_s29, 4  ;;  %s71_s16 = sshll.u32 %s6927_s15, 4  ;;  %s44_s30 = int_to_ptr.vmem [resolvable:$true] %s43_s30  ;;  %s7012_s16 = int_to_ptr.vmem [resolvable:$true] %s71_s16 }
   0x4   :  { %s6810_s19 = scalar_lea.hbm %s8523_s3, 2048 }
   0x5   :  { %p6811_p0 = scmp.ne.s32.totalorder %s8523_s3, %s6810_s19  ;;  %p6814_p1 = scmp.lt.u32.totalorder %s6810_s19, %s8523_s3 }
   0x7   :  { %p6816_p2 = pnand %p6814_p1, %p6811_p0 }
   0x9   :  { %6819 = shalt.err (!%p6816_p2)
}
   0xa   :  { %s6820_s24 = scalar_lea.vmem %s44_s30, 2048  ;;  %p6825_p4 = scmp.lt.s32.totalorder %s44_s30, %s44_s30 }
   0xb   :  { %p6821_p3 = scmp.ne.s32.totalorder %s44_s30, %s6820_s24  ;;  %p6826_p5 = scmp.lt.s32.totalorder %s6820_s24, %s6820_s24 }
   0xd   :  { %p6827_p6 = por %p6826_p5, %p6825_p4 }
   0xf   :  { %p6828_p7 = pnand %p6827_p6, %p6821_p3 }
  0x11   :  { %6831 = shalt.err (!%p6828_p7)
}
  0x12   :  { %s6928_s25 = smov 512   ;;  %s6929_s26 = smov 32  }
  0x13   :  { %49 = dma.hbm_to_vmem [thread:$0]  %s8523_s3, 2048, %s44_s30, [#allocation8], %s6928_s25, %s6928_s25, %s6929_s26  }
  0x14   :  { %s6832_s17 = scalar_lea.hbm %s8527_s7, 8192 }
  0x15   :  { %p6833_p8 = scmp.ne.s32.totalorder %s8527_s7, %s6832_s17  ;;  %p6836_p9 = scmp.lt.u32.totalorder %s6832_s17, %s8527_s7 }
  0x17   :  { %p6838_p10 = pnand %p6836_p9, %p6833_p8 }
  0x19   :  { %6841 = shalt.err (!%p6838_p10)
}
  0x1a   :  { %s6842_s22 = scalar_lea.vmem %s7012_s16, 8192  ;;  %p6847_p12 = scmp.lt.s32.totalorder %s7012_s16, %s7012_s16 }
  0x1b   :  { %p6843_p11 = scmp.ne.s32.totalorder %s7012_s16, %s6842_s22  ;;  %p6848_p13 = scmp.lt.s32.totalorder %s6842_s22, %s6842_s22 }
  0x1d   :  { %p6849_p0 = por %p6848_p13, %p6847_p12 }
  0x1f   :  { %p6850_p1 = pnand %p6849_p0, %p6843_p11 }
  0x21   :  { %6853 = shalt.err (!%p6850_p1)
}
  0x22   :  { %77 = dma.hbm_to_vmem [thread:$0]  %s8527_s7, 8192, %s7012_s16, [#allocation11], %s6928_s25, %s6928_s25, %s6929_s26  }
  0x23   :  { %s6930_s23 = smov [#allocation5]   ;;  %s6931_s27 = smov [#allocation9]  }
  0x24   :  { %s31_s24 = sshll.u32 %s6930_s23, 4  ;;  %s59_s28 = sshll.u32 %s6931_s27, 4  ;;  %s32_s24 = int_to_ptr.vmem [resolvable:$true] %s31_s24  ;;  %s7049_s28 = int_to_ptr.vmem [resolvable:$true] %s59_s28 }
  0x25   :  { %s6854_s17 = scalar_lea.hbm %s8522_s2, 2048 }
  0x26   :  { %p6855_p2 = scmp.ne.s32.totalorder %s8522_s2, %s6854_s17  ;;  %p6858_p3 = scmp.lt.u32.totalorder %s6854_s17, %s8522_s2 }
  0x28   :  { %p6860_p4 = pnand %p6858_p3, %p6855_p2 }
  0x2a   :  { %6863 = shalt.err (!%p6860_p4)
}
  0x2b   :  { %s6864_s7 = scalar_lea.vmem %s32_s24, 2048  ;;  %p6869_p6 = scmp.lt.s32.totalorder %s32_s24, %s32_s24 }
  0x2c   :  { %p6865_p5 = scmp.ne.s32.totalorder %s32_s24, %s6864_s7  ;;  %p6870_p7 = scmp.lt.s32.totalorder %s6864_s7, %s6864_s7 }
  0x2e   :  { %p6871_p8 = por %p6870_p7, %p6869_p6 }
  0x30   :  { %p6872_p9 = pnand %p6871_p8, %p6865_p5 }
  0x32   :  { %6875 = shalt.err (!%p6872_p9)
}
  0x33   :  { %37 = dma.hbm_to_vmem [thread:$0]  %s8522_s2, 2048, %s32_s24, [#allocation6], %s6928_s25, %s6928_s25, %s6929_s26  }
  0x34   :  { %s6876_s23 = scalar_lea.hbm %s8526_s6, 8192 }
  0x35   :  { %p6877_p10 = scmp.ne.s32.totalorder %s8526_s6, %s6876_s23  ;;  %p6880_p11 = scmp.lt.u32.totalorder %s6876_s23, %s8526_s6 }
  0x37   :  { %p6882_p12 = pnand %p6880_p11, %p6877_p10 }
  0x39   :  { %6885 = shalt.err (!%p6882_p12)
}
  0x3a   :  { %s6886_s18 = scalar_lea.vmem %s7049_s28, 8192  ;;  %p6891_p0 = scmp.lt.s32.totalorder %s7049_s28, %s7049_s28 }
  0x3b   :  { %p6887_p13 = scmp.ne.s32.totalorder %s7049_s28, %s6886_s18  ;;  %p6892_p1 = scmp.lt.s32.totalorder %s6886_s18, %s6886_s18 }
  0x3d   :  { %p6893_p2 = por %p6892_p1, %p6891_p0 }
  0x3f   :  { %p6894_p3 = pnand %p6893_p2, %p6887_p13 }
  0x41   :  { %6897 = shalt.err (!%p6894_p3)
}
  0x42   :  { %65 = dma.hbm_to_vmem [thread:$0]  %s8526_s6, 8192, %s7049_s28, [#allocation8], %s6928_s25, %s6928_s25, %s6929_s26  }
  0x43   :  { %s6932_s19 = smov [#allocation12]   ;;  %s6898_s16 = scalar_lea.hbm %s8529_s9, 8192 }
  0x44   :  { %s85_s20 = sshll.u32 %s6932_s19, 4  ;;  %p6899_p4 = scmp.ne.s32.totalorder %s8529_s9, %s6898_s16  ;;  %s86_s20 = int_to_ptr.vmem [resolvable:$true] %s85_s20 }
  0x45   :  { %p6902_p5 = scmp.lt.u32.totalorder %s6898_s16, %s8529_s9 }
  0x47   :  { %p6904_p6 = pnand %p6902_p5, %p6899_p4 }
  0x49   :  { %6907 = shalt.err (!%p6904_p6)
}
  0x4a   :  { %s6908_s27 = scalar_lea.vmem %s86_s20, 8192  ;;  %p6913_p8 = scmp.lt.s32.totalorder %s86_s20, %s86_s20 }
  0x4b   :  { %p6909_p7 = scmp.ne.s32.totalorder %s86_s20, %s6908_s27  ;;  %p6914_p9 = scmp.lt.s32.totalorder %s6908_s27, %s6908_s27 }
  0x4d   :  { %p6915_p10 = por %p6914_p9, %p6913_p8 }
  0x4f   :  { %p6916_p11 = pnand %p6915_p10, %p6909_p7 }
  0x51   :  { %6919 = shalt.err (!%p6916_p11)
}
  0x52   :  { %91 = dma.hbm_to_vmem [thread:$0]  %s8529_s9, 8192, %s86_s20, [#allocation11], %s6928_s25, %s6928_s25, %s6929_s26  }
  0x53   :  { %6920 = dma.done.wait [#allocation6], 2048  }
  0x54   :  { %6921 = vsyncadd [#allocation6], 4294965248 }
  0x55   :  { %6922 = dma.done.wait [#allocation8], 10240  }
  0x56   :  { %6923 = vsyncadd [#allocation8], 4294957056 }
  0x57   :  { %6924 = dma.done.wait [#allocation11], 16384  }
  0x58   :  { %6925 = vsyncadd [#allocation11], 4294950912  ;;  %v6933_v0 = vmov 0   ;;  %v6934_v1 = vmov 0.0   ;;  %v117_v2 = vld [vmem:[%s8520_s0 + $0x10] sm:$0xff]  ;;  %v115_v3 = vld [vmem:[%s8520_s0] sm:$0xff]  ;;  %v123_v41 = vlaneseq }
  0x59   :  { %6549 = vset.pattern.permute.xlu1 %v6933_v0  ;;  %6548 = vset.pattern.permute.xlu0 %v6933_v0  ;;  %v118_v4 = vld [vmem:[%s8520_s0 + $0x18] sm:$0xff]  ;;  %v116_v5 = vld [vmem:[%s8520_s0 + $0x8] sm:$0xff]  ;;  %v173_v6 = vld [vmem:[%s8521_s1] sm:$0xff]  ;;  %vm211_vm0 = vcmask 1040384   ;;  %vm186_vm1 = vcmask 793600   ;;  %vm358_vm10 = vcmask 261120  }
  0x5a   :  { %447 = vmatprep.mubr.f32.mxu1 %v6934_v1  ;;  %132 = vperm.xlu1 %6549, %v117_v2   ;;  %v174_v7 = vld [vmem:[%s8521_s1 + $0x8] sm:$0xff]  ;;  %v175_v8 = vld [vmem:[%s8521_s1 + $0x10] sm:$0xff]  ;;  %v176_v9 = vld [vmem:[%s8521_s1 + $0x18] sm:$0xff]  ;;  %v124_v42 = vand.u32 127, %v123_v41  ;;  %vm6936_vm11 = vmmov 0   ;;  %vm4767_vm12 = vcmask 523264  }
  0x5b   :  { %126 = vperm.xlu0 %6548, %v115_v3   ;;  %v5101_v10 = vpack.c.bf16 %v174_v7, %v173_v6  ;;  %v5105_v11 = vpack.c.bf16 %v176_v9, %v175_v8  ;;  %v177_v12 = vld [vmem:[%s8521_s1 + $0x20] sm:$0xff]  ;;  %v178_v13 = vld [vmem:[%s8521_s1 + $0x28] sm:$0xff]  ;;  %v179_v17 = vld [vmem:[%s8521_s1 + $0x30] sm:$0xff]  ;;  %vm4841_vm13 = vcmask 15360  }
  0x5c   :  { %v120_v14 = vld [vmem:[%s8520_s0 + $0x28] sm:$0xff]  ;;  %v119_v15 = vld [vmem:[%s8520_s0 + $0x20] sm:$0xff]  ;;  %v5109_v16 = vpack.c.bf16 %v178_v13, %v177_v12  ;;  %v180_v18 = vld [vmem:[%s8521_s1 + $0x38] sm:$0xff] }
  0x5d   :  { %5102 = vmatprep.subr.bf16.mxu0 %v5101_v10  ;;  %v122_v19 = vld [vmem:[%s8520_s0 + $0x38] sm:$0xff]  ;;  %v121_v20 = vld [vmem:[%s8520_s0 + $0x30] sm:$0xff]  ;;  %v5113_v21 = vpack.c.bf16 %v180_v18, %v179_v17  ;;  %v181_v22 = vld [vmem:[%s8521_s1 + $0x40] sm:$0xff] }
  0x5e   :  { %135 = vperm.xlu1 %6549, %v118_v4   ;;  %5104 = vmatpush3.bf16.msra.mxu0 %v5101_v10  ;;  %v182_v23 = vld [vmem:[%s8521_s1 + $0x48] sm:$0xff]  ;;  %v183_v25 = vld [vmem:[%s8521_s1 + $0x50] sm:$0xff]  ;;  %v184_v26 = vld [vmem:[%s8521_s1 + $0x58] sm:$0xff] }
  0x5f   :  { %129 = vperm.xlu0 %6548, %v116_v5   ;;  %5106 = vmatprep.subr.bf16.mxu0 %v5105_v11  ;;  %v5117_v24 = vpack.c.bf16 %v182_v23, %v181_v22  ;;  %v321_v27 = vld [vmem:[#allocation5 + $0x8] sm:$0xff]  ;;  %v320_v29 = vld [vmem:[#allocation5] sm:$0xff]  ;;  %v5121_v30 = vpack.c.bf16 %v184_v26, %v183_v25  ;;  %v323_v59 = vld [vmem:[#allocation5 + $0x18] sm:$0xff] }
  0x60   :  { %v325_v28 = vld [vmem:[#allocation5 + $0x28] sm:$0xff]  ;;  %v324_v32 = vld [vmem:[#allocation5 + $0x20] sm:$0xff]  ;;  %v327_v60 = vld [vmem:[#allocation5 + $0x38] sm:$0xff] }
  0x61   :  { %v5125_v31 = vpack.c.bf16 %v325_v28, %v321_v27  ;;  %v329_v33 = vld [vmem:[#allocation5 + $0x48] sm:$0xff]  ;;  %v5127_v35 = vpack.c.bf16 %v324_v32, %v320_v29  ;;  %v328_v37 = vld [vmem:[#allocation5 + $0x40] sm:$0xff]  ;;  %v5133_v61 = vpack.c.bf16 %v327_v60, %v323_v59  ;;  %v322_v62 = vld [vmem:[#allocation5 + $0x10] sm:$0xff] }
  0x62   :  { %141 = vperm.xlu1 %6549, %v120_v14   ;;  %5108 = vmatpush3.bf16.msra.mxu0 %v5105_v11  ;;  %v333_v34 = vld [vmem:[#allocation5 + $0x68] sm:$0xff]  ;;  %v332_v38 = vld [vmem:[#allocation5 + $0x60] sm:$0xff]  ;;  %v326_v63 = vld [vmem:[#allocation5 + $0x30] sm:$0xff] }
  0x63   :  { %138 = vperm.xlu0 %6548, %v119_v15   ;;  %5110 = vmatprep.subr.bf16.mxu0 %v5109_v16  ;;  %v5129_v36 = vpack.c.bf16 %v333_v34, %v329_v33  ;;  %v5131_v39 = vpack.c.bf16 %v332_v38, %v328_v37  ;;  %v185_v40 = vld [vmem:[%s8521_s1 + $0x60] sm:$0x1]  ;;  %v331_v0 = vld [vmem:[#allocation5 + $0x58] sm:$0xff]  ;;  %v5135_v3 = vpack.c.bf16 %v326_v63, %v322_v62  ;;  %v330_v6 = vld [vmem:[#allocation5 + $0x50] sm:$0xff] }
  0x64   :  { %5126 = vmatprep.subr.bf16.mxu1 %v5125_v31  ;;  %v335_v2 = vld [vmem:[#allocation5 + $0x78] sm:$0xff]  ;;  %v334_v7 = vld [vmem:[#allocation5 + $0x70] sm:$0xff]  ;;  %v642_v9 = vld [vmem:[#allocation7 + $0x8] sm:$0xff] }
  0x65   :  { %5128 = vmatpush1.bf16.msra.mxu1 %v5127_v35  ;;  %v5137_v5 = vpack.c.bf16 %v335_v2, %v331_v0  ;;  %v646_v10 = vld [vmem:[#allocation7 + $0x28] sm:$0xff]  ;;  %v5139_v11 = vpack.c.bf16 %v334_v7, %v330_v6  ;;  %v649_v25 = vld [vmem:[#allocation7 + $0x40] sm:$0xff]  ;;  %v644_v27 = vld [vmem:[#allocation7 + $0x18] sm:$0xff] }
  0x66   :  { %147 = vperm.xlu1 %6549, %v122_v19   ;;  %5112 = vmatpush3.bf16.msra.mxu0 %v5109_v16  ;;  %v5141_v13 = vpack.c.bf16 %v646_v10, %v642_v9  ;;  %v641_v19 = vld [vmem:[#allocation7] sm:$0xff]  ;;  %v654_v22 = vld [vmem:[#allocation7 + $0x68] sm:$0xff]  ;;  %v648_v28 = vld [vmem:[#allocation7 + $0x38] sm:$0xff] }
  0x67   :  { %144 = vperm.xlu0 %6548, %v121_v20   ;;  %5114 = vmatprep.subr.bf16.mxu0 %v5113_v21  ;;  %v645_v20 = vld [vmem:[#allocation7 + $0x20] sm:$0xff]  ;;  %v643_v31 = vld [vmem:[#allocation7 + $0x10] sm:$0xff]  ;;  %v652_v33 = vld [vmem:[#allocation7 + $0x58] sm:$0xff] }
  0x68   :  { %5130 = vmatprep.subr.bf16.mxu1 %v5129_v36  ;;  %v5143_v23 = vpack.c.bf16 %v645_v20, %v641_v19  ;;  %v653_v26 = vld [vmem:[#allocation7 + $0x60] sm:$0xff]  ;;  %v647_v32 = vld [vmem:[#allocation7 + $0x30] sm:$0xff]  ;;  %v656_v34 = vld [vmem:[#allocation7 + $0x78] sm:$0xff] }
  0x69   :  { %5132 = vmatpush1.bf16.msra.mxu1 %v5131_v39  ;;  %v5147_v29 = vpack.c.bf16 %v653_v26, %v649_v25  ;;  %v5151_v35 = vpack.c.bf16 %v647_v32, %v643_v31  ;;  %v5153_v36 = vpack.c.bf16 %v656_v34, %v652_v33  ;;  %v651_v37 = vld [vmem:[#allocation7 + $0x50] sm:$0xff]  ;;  %v916_v39 = vld [vmem:[%s8525_s5 + $0x8] sm:$0xff]  ;;  %v939_v62 = vld [vmem:[%s8525_s5 + $0xc0] sm:$0xff] }
  0x6a   :  { %5116 = vmatpush3.bf16.msra.mxu0 %v5113_v21  ;;  %5134 = vmatprep.subr.bf16.mxu1 %v5133_v61  ;;  %v650_v21 = vld [vmem:[#allocation7 + $0x48] sm:$0xff]  ;;  %v655_v38 = vld [vmem:[#allocation7 + $0x70] sm:$0xff]  ;;  %v943_v63 = vld [vmem:[%s8525_s5 + $0xe0] sm:$0xff] }
  0x6b   :  { %5118 = vmatprep.subr.bf16.mxu0 %v5117_v24  ;;  %v944_v59 = vld [vmem:[%s8525_s5 + $0xe8] sm:$0xff]  ;;  %v951_v6 = vld [vmem:[%s8525_s5 + $0x120] sm:$0xff]  ;;  %v917_v31 = vld [vmem:[%s8525_s5 + $0x10] sm:$0xff] }
  0x6c   :  { %v948_v0 = vld [vmem:[%s8525_s5 + $0x108] sm:$0xff]  ;;  %v971_v26 = vld [vmem:[%s8525_s5 + $0x1c0] sm:$0xff]  ;;  %v921_v32 = vld [vmem:[%s8525_s5 + $0x30] sm:$0xff] }
  0x6d   :  { %v952_v2 = vld [vmem:[%s8525_s5 + $0x128] sm:$0xff]  ;;  %v930_v33 = vld [vmem:[%s8525_s5 + $0x78] sm:$0xff]  ;;  %v7459_v34 = vpack.c.bf16 %v921_v32, %v917_v31 }
  0x6e   :  { %5120 = vmatpush3.bf16.msra.mxu0 %v5117_v24  ;;  %v5145_v24 = vpack.c.bf16 %v654_v22, %v650_v21  ;;  %v956_v7 = vld [vmem:[%s8525_s5 + $0x148] sm:$0xff]  ;;  %v963_v21 = vld [vmem:[%s8525_s5 + $0x180] sm:$0xff] }
  0x6f   :  { %5122 = vmatprep.subr.bf16.mxu0 %v5121_v30  ;;  %v967_v22 = vld [vmem:[%s8525_s5 + $0x1a0] sm:$0xff]  ;;  %v2473_v31 = vld [vmem:[#allocation9 + $0x8] sm:$0xff] }
  0x70   :  { %v2477_v32 = vld [vmem:[#allocation9 + $0x28] sm:$0xff] }
  0x72   :  { %5124 = vmatpush3.bf16.msra.mxu0 %v5121_v30  ;;  %v5149_v30 = vpack.c.bf16 %v648_v28, %v644_v27  ;;  %v975_v27 = vld [vmem:[%s8525_s5 + $0x1e0] sm:$0xff]  ;;  %v922_v28 = vld [vmem:[%s8525_s5 + $0x38] sm:$0xff] }
  0x73   :  { %5033 = vmatprep.subr.msk.mxu0 %vm211_vm0, %v185_v40 }
  0x76   :  { %5034 = vmatpush3.msk.msra.mxu0 %vm211_vm0, %v185_v40  ;;  %v920_v40 = vld [vmem:[%s8525_s5 + $0x28] sm:$0xff] }
  0xd9   :  { %v133_v43 = vpop.permute.xlu1 %132 }
  0xda   :  { %v127_v44 = vpop.permute.xlu0 %126  ;;  %vm151_vm3 = vcmp.eq.s32.totalorder %v124_v42, %v133_v43  ;;  %v7256_v43 = vpack.c.bf16 %v920_v40, %v916_v39 }
  0xdb   :  { %vm149_vm2 = vcmp.eq.s32.totalorder %v124_v42, %v127_v44  ;;  %v4864_v48 = vsel %vm151_vm3, 1.0, %v6934_v1  ;;  %v915_v44 = vld [vmem:[%s8525_s5] sm:$0xff] }
  0xdc   :  { %v4862_v45 = vsel %vm149_vm2, 1.0, %v6934_v1 }
  0xdd   :  { %5035 = vmatprep.mubr.msk.f32.mxu0 %vm186_vm1, %v4862_v45  ;;  %v136_v46 = vpop.permute.xlu1 %135  ;;  %v919_v45 = vld [vmem:[%s8525_s5 + $0x20] sm:$0xff] }
  0xde   :  { %v130_v47 = vpop.permute.xlu0 %129  ;;  %vm152_vm4 = vcmp.eq.s32.totalorder %v124_v42, %v136_v46  ;;  %v924_v46 = vld [vmem:[%s8525_s5 + $0x48] sm:$0xff] }
  0xdf   :  { %vm150_vm5 = vcmp.eq.s32.totalorder %v124_v42, %v130_v47  ;;  %v4865_v50 = vsel %vm152_vm4, 1.0, %v6934_v1  ;;  %v928_v47 = vld [vmem:[%s8525_s5 + $0x68] sm:$0xff] }
  0xe0   :  { %v4863_v49 = vsel %vm150_vm5, 1.0, %v6934_v1 }
  0xe1   :  { %5036 = vmatmul.mubr.msk.f32.vlgmr.msra.gmra.mrb[0].mxu0 %vm186_vm1, %v4863_v49  ;;  %v142_v51 = vpop.permute.xlu1 %141  ;;  %v7294_v49 = vpack.c.bf16 %v928_v47, %v924_v46  ;;  %v946_v46 = vld [vmem:[%s8525_s5 + $0xf8] sm:$0xff] }
  0xe2   :  { %v139_v52 = vpop.permute.xlu0 %138  ;;  %5038 = vmatprep.mubr.msk.f32.mxu0 %vm186_vm1, %v4864_v48  ;;  %vm154_vm7 = vcmp.eq.s32.totalorder %v124_v42, %v142_v51  ;;  %v7292_v48 = vpack.c.bf16 %v919_v45, %v915_v44  ;;  %v927_v51 = vld [vmem:[%s8525_s5 + $0x60] sm:$0xff]  ;;  %v937_v44 = vld [vmem:[%s8525_s5 + $0xb0] sm:$0xff]  ;;  %v942_v45 = vld [vmem:[%s8525_s5 + $0xd8] sm:$0xff] }
  0xe3   :  { %vm153_vm6 = vcmp.eq.s32.totalorder %v124_v42, %v139_v52  ;;  %v4867_v56 = vsel %vm154_vm7, 1.0, %v6934_v1  ;;  %v932_v52 = vld [vmem:[%s8525_s5 + $0x88] sm:$0xff] }
  0xe4   :  { %v4866_v53 = vsel %vm153_vm6, 1.0, %v6934_v1 }
  0xe5   :  { %5039 = vmatmul.mubr.msk.f32.gmra.mrb[2].mxu0 %vm186_vm1, %v4865_v50  ;;  %v148_v54 = vpop.permute.xlu1 %147  ;;  %v923_v50 = vld [vmem:[%s8525_s5 + $0x40] sm:$0xff] }
  0xe6   :  { %5041 = vmatprep.mubr.msk.f32.mxu0 %vm186_vm1, %v4866_v53  ;;  %v145_v55 = vpop.permute.xlu0 %144  ;;  %vm156_vm9 = vcmp.eq.s32.totalorder %v124_v42, %v148_v54  ;;  %v936_v53 = vld [vmem:[%s8525_s5 + $0xa8] sm:$0xff]  ;;  %v7312_v54 = vpack.c.bf16 %v927_v51, %v923_v50  ;;  %v7500_v50 = vpack.c.bf16 %v946_v46, %v942_v45  ;;  %v941_v51 = vld [vmem:[%s8525_s5 + $0xd0] sm:$0xff]  ;;  %v2484_v45 = vld [vmem:[#allocation9 + $0x60] sm:$0xff] }
  0xe7   :  { %vm155_vm8 = vcmp.eq.s32.totalorder %v124_v42, %v145_v55  ;;  %v4869_v58 = vsel %vm156_vm9, 1.0, %v6934_v1  ;;  %v5155_v42 = vpack.c.bf16 %v655_v38, %v651_v37  ;;  %v7315_v55 = vpack.c.bf16 %v936_v53, %v932_v52  ;;  %v929_v37 = vld [vmem:[%s8525_s5 + $0x70] sm:$0xff]  ;;  %v938_v38 = vld [vmem:[%s8525_s5 + $0xb8] sm:$0xff] }
  0xe8   :  { %v4868_v57 = vsel %vm155_vm8, 1.0, %v6934_v1  ;;  %v945_v52 = vld [vmem:[%s8525_s5 + $0xf0] sm:$0xff]  ;;  %v950_v53 = vld [vmem:[%s8525_s5 + $0x118] sm:$0xff] }
  0xe9   :  { %5042 = vmatmul.mubr.msk.f32.gmra.mrb[4].mxu0 %vm186_vm1, %v4867_v56  ;;  %v931_v56 = vld [vmem:[%s8525_s5 + $0x80] sm:$0xff] }
  0xea   :  { %5044 = vmatprep.mubr.msk.f32.mxu0 %vm186_vm1, %v4868_v57  ;;  %v935_v57 = vld [vmem:[%s8525_s5 + $0xa0] sm:$0xff] }
  0xeb   :  { %v7333_v60 = vpack.c.bf16 %v935_v57, %v931_v56  ;;  %v954_v56 = vld [vmem:[%s8525_s5 + $0x138] sm:$0xff]  ;;  %v7515_v57 = vpack.c.bf16 %v945_v52, %v941_v51  ;;  %v2489_v51 = vld [vmem:[#allocation9 + $0x88] sm:$0xff] }
  0xec   :  { %v2493_v52 = vld [vmem:[#allocation9 + $0xa8] sm:$0xff] }
  0xed   :  { %5045 = vmatmul.mubr.msk.f32.gmra.mrb[6].mxu0 %vm186_vm1, %v4869_v58  ;;  %v940_v58 = vld [vmem:[%s8525_s5 + $0xc8] sm:$0xff] }
  0xee   :  { %2622 = vmatprep.mubr.f32.mxu0 %v6934_v1  ;;  %v7336_v61 = vpack.c.bf16 %v944_v59, %v940_v58  ;;  %v7518_v58 = vpack.c.bf16 %v954_v56, %v950_v53  ;;  %v949_v59 = vld [vmem:[%s8525_s5 + $0x110] sm:$0xff]  ;;  %v5677_v53 = vpack.c.bf16 %v2493_v52, %v2489_v51  ;;  %v2488_v56 = vld [vmem:[#allocation9 + $0x80] sm:$0xff]  ;;  %v2529_v51 = vld [vmem:[#allocation9 + $0x1c8] sm:$0xff] }
  0xef   :  { %v2533_v52 = vld [vmem:[#allocation9 + $0x1e8] sm:$0xff] }
 0x1b4   :  { %v7183_v4 = vpop.f32.mrb[0].mxu0 }
 0x1b5   :  { %v7185_v8 = vpop.f32.mrb[1].mxu0 }
 0x1b6   :  { %4879 = vmatmul.mubr.msk.f32.vlgmr.msra.gmra.mrb[0].mxu1 %vm358_vm10, %v7185_v8 }
 0x1b7   :  { %5136 = vmatpush1.bf16.msra.mxu1 %v5135_v3  ;;  %453 = vmatprep.mubr.f32.mxu1 %v6934_v1  ;;  %v7354_v3 = vpack.c.bf16 %v943_v63, %v939_v62  ;;  %v953_v62 = vld [vmem:[%s8525_s5 + $0x130] sm:$0xff]  ;;  %v958_v63 = vld [vmem:[%s8525_s5 + $0x158] sm:$0xff] }
 0x1b8   :  { %v7190_v12 = vpop.f32.mrb[2].mxu0  ;;  %5138 = vmatprep.subr.bf16.mxu1 %v5137_v5  ;;  %v947_v5 = vld [vmem:[%s8525_s5 + $0x100] sm:$0xff] }
 0x1b9   :  { %v7192_v14 = vpop.f32.mrb[3].mxu0  ;;  %v7375_v9 = vpack.c.bf16 %v951_v6, %v947_v5  ;;  %v957_v6 = vld [vmem:[%s8525_s5 + $0x150] sm:$0xff] }
 0x1ba   :  { %4880 = vmatmul.mubr.msk.f32.gmra.mrb[2].mxu1 %vm358_vm10, %v7183_v4 }
 0x1bb   :  { %459 = vmatprep.mubr.f32.mxu1 %v6934_v1  ;;  %5140 = vmatpush1.bf16.msra.mxu1 %v5139_v11  ;;  %v955_v11 = vld [vmem:[%s8525_s5 + $0x140] sm:$0xff] }
 0x1bc   :  { %v7197_v15 = vpop.f32.mrb[4].mxu0  ;;  %5142 = vmatprep.subr.bf16.mxu1 %v5141_v13  ;;  %v959_v13 = vld [vmem:[%s8525_s5 + $0x160] sm:$0xff] }
 0x1bd   :  { %v7199_v16 = vpop.f32.mrb[5].mxu0  ;;  %v7396_v19 = vpack.c.bf16 %v959_v13, %v955_v11  ;;  %v970_v11 = vld [vmem:[%s8525_s5 + $0x1b8] sm:$0xff] }
 0x1be   :  { %4881 = vmatmul.mubr.msk.f32.gmra.mrb[4].mxu1 %vm358_vm10, %v7192_v14 }
 0x1bf   :  { %465 = vmatprep.mubr.f32.mxu1 %v6934_v1 }
 0x1c0   :  { %v7204_v17 = vpop.f32.mrb[6].mxu0 }
 0x1c1   :  { %v7206_v18 = vpop.f32.mrb[7].mxu0 }
 0x1c2   :  { %4882 = vmatmul.mubr.msk.f32.gmra.mrb[6].mxu1 %vm358_vm10, %v7190_v12 }
 0x1c3   :  { %471 = vmatprep.mubr.f32.mxu1 %v6934_v1 }
 0x1c6   :  { %4883 = vmatmul.mubr.msk.f32.gmra.mrb[8].mxu1 %vm358_vm10, %v7199_v16 }
 0x1c7   :  { %477 = vmatprep.mubr.f32.mxu1 %v6934_v1 }
 0x1ca   :  { %4884 = vmatmul.mubr.msk.f32.gmra.mrb[10].mxu1 %vm358_vm10, %v7197_v15 }
 0x1cb   :  { %483 = vmatprep.mubr.f32.mxu1 %v6934_v1 }
 0x1ce   :  { %4885 = vmatmul.mubr.msk.f32.gmra.mrb[12].mxu1 %vm358_vm10, %v7206_v18 }
 0x1cf   :  { %489 = vmatprep.mubr.f32.mxu1 %v6934_v1 }
 0x1d2   :  { %4886 = vmatmul.mubr.msk.f32.gmra.mrb[14].mxu1 %vm358_vm10, %v7204_v17 }
 0x1d3   :  { %560 = vmatprep.mubr.f32.mxu1 %v6934_v1 }
 0x1d6   :  { %4887 = vmatmul.mubr.msk.f32.vlgmr.msra.gmra.mrb[16].mxu1 %vm358_vm10, %v7185_v8 }
 0x1d7   :  { %5144 = vmatpush1.bf16.msra.mxu1 %v5143_v23  ;;  %566 = vmatprep.mubr.f32.mxu1 %v6934_v1  ;;  %v976_v23 = vld [vmem:[%s8525_s5 + $0x1e8] sm:$0xff] }
 0x1d8   :  { %5146 = vmatprep.subr.bf16.mxu1 %v5145_v24  ;;  %v7417_v24 = vpack.c.bf16 %v967_v22, %v963_v21  ;;  %v969_v21 = vld [vmem:[%s8525_s5 + $0x1b0] sm:$0xff]  ;;  %v974_v22 = vld [vmem:[%s8525_s5 + $0x1d8] sm:$0xff] }
 0x1da   :  { %4888 = vmatmul.mubr.msk.f32.gmra.mrb[18].mxu1 %vm358_vm10, %v7183_v4 }
 0x1db   :  { %572 = vmatprep.mubr.f32.mxu1 %v6934_v1  ;;  %5148 = vmatpush1.bf16.msra.mxu1 %v5147_v29  ;;  %v7438_v29 = vpack.c.bf16 %v975_v27, %v971_v26  ;;  %v973_v27 = vld [vmem:[%s8525_s5 + $0x1d0] sm:$0xff] }
 0x1dc   :  { %5150 = vmatprep.subr.bf16.mxu1 %v5149_v30 }
 0x1de   :  { %4889 = vmatmul.mubr.msk.f32.gmra.mrb[20].mxu1 %vm358_vm10, %v7192_v14 }
 0x1df   :  { %578 = vmatprep.mubr.f32.mxu1 %v6934_v1 }
 0x1e2   :  { %4890 = vmatmul.mubr.msk.f32.gmra.mrb[22].mxu1 %vm358_vm10, %v7190_v12 }
 0x1e3   :  { %584 = vmatprep.mubr.f32.mxu1 %v6934_v1 }
 0x1e6   :  { %4891 = vmatmul.mubr.msk.f32.gmra.mrb[24].mxu1 %vm358_vm10, %v7199_v16 }
 0x1e7   :  { %590 = vmatprep.mubr.f32.mxu1 %v6934_v1 }
 0x1ea   :  { %4892 = vmatmul.mubr.msk.f32.gmra.mrb[26].mxu1 %vm358_vm10, %v7197_v15 }
 0x1eb   :  { %596 = vmatprep.mubr.f32.mxu1 %v6934_v1 }
 0x1ee   :  { %4893 = vmatmul.mubr.msk.f32.gmra.mrb[28].mxu1 %vm358_vm10, %v7206_v18 }
 0x1ef   :  { %602 = vmatprep.mubr.f32.mxu1 %v6934_v1 }
 0x1f2   :  { %4894 = vmatmul.mubr.msk.f32.gmra.mrb[30].mxu1 %vm358_vm10, %v7204_v17 }
 0x1f3   :  { %721 = vmatprep.mubr.f32.mxu1 %v6934_v1 }
 0x1f6   :  { %4895 = vmatmul.mubr.msk.f32.vlgmr.msra.gmra.mrb[14].mxu1 %vm358_vm10, %v7185_v8 }
 0x1f7   :  { %5152 = vmatpush1.bf16.msra.mxu1 %v5151_v35  ;;  %727 = vmatprep.mubr.f32.mxu1 %v6934_v1 }
 0x1f8   :  { %5154 = vmatprep.subr.bf16.mxu1 %v5153_v36  ;;  %v925_v36 = vld [vmem:[%s8525_s5 + $0x50] sm:$0xff] }
 0x1f9   :  { %v7478_v39 = vpack.c.bf16 %v929_v37, %v925_v36  ;;  %v2476_v36 = vld [vmem:[#allocation9 + $0x20] sm:$0xff] }
 0x1fa   :  { %4896 = vmatmul.mubr.msk.f32.gmra.mrb[12].mxu1 %vm358_vm10, %v7183_v4 }
 0x1fb   :  { %733 = vmatprep.mubr.f32.mxu1 %v6934_v1  ;;  %5156 = vmatpush1.bf16.msra.mxu1 %v5155_v42  ;;  %v933_v42 = vld [vmem:[%s8525_s5 + $0x90] sm:$0xff] }
 0x1fc   :  { %5158 = vmatprep.subr.bf16.mxu1 %v7256_v43  ;;  %v7497_v47 = vpack.c.bf16 %v937_v44, %v933_v42  ;;  %v2480_v44 = vld [vmem:[#allocation9 + $0x40] sm:$0xff] }
 0x1fd   :  { %v5675_v46 = vpack.c.bf16 %v2484_v45, %v2480_v44  ;;  %v2520_v44 = vld [vmem:[#allocation9 + $0x180] sm:$0xff] }
 0x1fe   :  { %4897 = vmatmul.mubr.msk.f32.gmra.mrb[10].mxu1 %vm358_vm10, %v7192_v14  ;;  %v2524_v45 = vld [vmem:[#allocation9 + $0x1a0] sm:$0xff] }
 0x1ff   :  { %739 = vmatprep.mubr.f32.mxu1 %v6934_v1 }
 0x202   :  { %4898 = vmatmul.mubr.msk.f32.gmra.mrb[8].mxu1 %vm358_vm10, %v7190_v12 }
 0x203   :  { %745 = vmatprep.mubr.f32.mxu1 %v6934_v1 }
 0x206   :  { %4899 = vmatmul.mubr.msk.f32.gmra.mrb[6].mxu1 %vm358_vm10, %v7199_v16 }
 0x207   :  { %751 = vmatprep.mubr.f32.mxu1 %v6934_v1 }
 0x20a   :  { %4900 = vmatmul.mubr.msk.f32.gmra.mrb[4].mxu1 %vm358_vm10, %v7197_v15 }
 0x20b   :  { %757 = vmatprep.mubr.f32.mxu1 %v6934_v1 }
 0x20e   :  { %4901 = vmatmul.mubr.msk.f32.gmra.mrb[2].mxu1 %vm358_vm10, %v7206_v18 }
 0x20f   :  { %763 = vmatprep.mubr.f32.mxu1 %v6934_v1 }
 0x212   :  { %4902 = vmatmul.mubr.msk.f32.gmra.mrb[0].mxu1 %vm358_vm10, %v7204_v17 }
 0x213   :  { %834 = vmatprep.mubr.f32.mxu1 %v6934_v1 }
 0x216   :  { %4903 = vmatmul.mubr.msk.f32.vlgmr.msra.gmra.mrb[30].mxu1 %vm358_vm10, %v7185_v8  ;;  %v960_v8 = vld [vmem:[%s8525_s5 + $0x168] sm:$0xff] }
 0x217   :  { %5160 = vmatpush1.bf16.msra.mxu1 %v7292_v48  ;;  %840 = vmatprep.mubr.f32.mxu1 %v6934_v1  ;;  %v7378_v10 = vpack.c.bf16 %v960_v8, %v956_v7  ;;  %v961_v7 = vld [vmem:[%s8525_s5 + $0x170] sm:$0xff]  ;;  %v966_v8 = vld [vmem:[%s8525_s5 + $0x198] sm:$0xff] }
 0x218   :  { %5162 = vmatprep.subr.bf16.mxu1 %v7294_v49  ;;  %v7551_v13 = vpack.c.bf16 %v961_v7, %v957_v6  ;;  %v2496_v7 = vld [vmem:[#allocation9 + $0xc0] sm:$0xff] }
 0x21a   :  { %4904 = vmatmul.mubr.msk.f32.gmra.mrb[28].mxu1 %vm358_vm10, %v7183_v4  ;;  %v7357_v4 = vpack.c.bf16 %v952_v2, %v948_v0  ;;  %v962_v0 = vld [vmem:[%s8525_s5 + $0x178] sm:$0xff]  ;;  %v7533_v2 = vpack.c.bf16 %v953_v62, %v949_v59  ;;  %v2492_v59 = vld [vmem:[#allocation9 + $0xa0] sm:$0xff] }
 0x21b   :  { %5164 = vmatpush1.bf16.msra.mxu1 %v7312_v54  ;;  %846 = vmatprep.mubr.f32.mxu1 %v6934_v1  ;;  %v7536_v5 = vpack.c.bf16 %v962_v0, %v958_v63  ;;  %v5679_v62 = vpack.c.bf16 %v2492_v59, %v2488_v56  ;;  %v2497_v63 = vld [vmem:[#allocation9 + $0xc8] sm:$0xff]  ;;  %v2528_v56 = vld [vmem:[#allocation9 + $0x1c0] sm:$0xff] }
 0x21c   :  { %5166 = vmatprep.subr.bf16.mxu1 %v7315_v55  ;;  %v2501_v0 = vld [vmem:[#allocation9 + $0xe8] sm:$0xff]  ;;  %v2532_v59 = vld [vmem:[#allocation9 + $0x1e0] sm:$0xff] }
 0x21d   :  { %v5681_v6 = vpack.c.bf16 %v2501_v0, %v2497_v63  ;;  %v7605_v63 = vshrl.u32 %v123_v41, 7 }
 0x21e   :  { %4905 = vmatmul.mubr.msk.f32.gmra.mrb[26].mxu1 %vm358_vm10, %v7192_v14  ;;  %v968_v14 = vld [vmem:[%s8525_s5 + $0x1a8] sm:$0xff] }
 0x21f   :  { %5168 = vmatpush1.bf16.msra.mxu1 %v7333_v60  ;;  %852 = vmatprep.mubr.f32.mxu1 %v6934_v1 }
 0x220   :  { %5170 = vmatprep.subr.bf16.mxu1 %v7336_v61 }
 0x222   :  { %4906 = vmatmul.mubr.msk.f32.gmra.mrb[24].mxu1 %vm358_vm10, %v7190_v12  ;;  %v964_v12 = vld [vmem:[%s8525_s5 + $0x188] sm:$0xff] }
 0x223   :  { %5172 = vmatpush1.bf16.msra.mxu1 %v7354_v3  ;;  %858 = vmatprep.mubr.f32.mxu1 %v6934_v1  ;;  %v7399_v20 = vpack.c.bf16 %v968_v14, %v964_v12  ;;  %v7554_v12 = vpack.c.bf16 %v970_v11, %v966_v8  ;;  %v965_v14 = vld [vmem:[%s8525_s5 + $0x190] sm:$0xff]  ;;  %v2500_v8 = vld [vmem:[#allocation9 + $0xe0] sm:$0xff] }
 0x224   :  { %5174 = vmatprep.subr.bf16.mxu1 %v7357_v4  ;;  %v5683_v11 = vpack.c.bf16 %v2500_v8, %v2496_v7  ;;  %v336_v7 = vld [vmem:[%s8524_s4] sm:$0xf]  ;;  %v340_v8 = vsub.s32 0, %v7605_v63 }
 0x226   :  { %4907 = vmatmul.mubr.msk.f32.gmra.mrb[22].mxu1 %vm358_vm10, %v7199_v16  ;;  %v972_v16 = vld [vmem:[%s8525_s5 + $0x1c8] sm:$0xff] }
 0x227   :  { %5176 = vmatpush1.bf16.msra.mxu1 %v7375_v9  ;;  %864 = vmatprep.mubr.f32.mxu1 %v6934_v1  ;;  %v7420_v25 = vpack.c.bf16 %v976_v23, %v972_v16  ;;  %v978_v16 = vld [vmem:[%s8525_s5 + $0x1f8] sm:$0xff]  ;;  %v7569_v23 = vpack.c.bf16 %v969_v21, %v965_v14  ;;  %v2505_v14 = vld [vmem:[#allocation9 + $0x108] sm:$0xff] }
 0x228   :  { %5178 = vmatprep.subr.bf16.mxu1 %v7378_v10  ;;  %v7572_v26 = vpack.c.bf16 %v978_v16, %v974_v22  ;;  %v2509_v21 = vld [vmem:[#allocation9 + $0x128] sm:$0xff]  ;;  %v2504_v16 = vld [vmem:[#allocation9 + $0x100] sm:$0xff] }
 0x229   :  { %v5685_v22 = vpack.c.bf16 %v2509_v21, %v2505_v14  ;;  %v7618_v21 = vrot.slane %v336_v7, %v340_v8 }
 0x22a   :  { %4908 = vmatmul.mubr.msk.f32.gmra.mrb[20].mxu1 %vm358_vm10, %v7197_v15  ;;  %v918_v15 = vld [vmem:[%s8525_s5 + $0x18] sm:$0xff] }
 0x22b   :  { %5180 = vmatpush1.bf16.msra.mxu1 %v7396_v19  ;;  %870 = vmatprep.mubr.f32.mxu1 %v6934_v1  ;;  %v7441_v30 = vpack.c.bf16 %v922_v28, %v918_v15  ;;  %v977_v15 = vld [vmem:[%s8525_s5 + $0x1f0] sm:$0xff] }
 0x22c   :  { %5182 = vmatprep.subr.bf16.mxu1 %v7399_v20  ;;  %v7581_v28 = vpack.c.bf16 %v977_v15, %v973_v27  ;;  %v2508_v27 = vld [vmem:[#allocation9 + $0x120] sm:$0xff] }
 0x22d   :  { %v5687_v15 = vpack.c.bf16 %v2508_v27, %v2504_v16 }
 0x22e   :  { %4909 = vmatmul.mubr.msk.f32.gmra.mrb[18].mxu1 %vm358_vm10, %v7206_v18  ;;  %v926_v18 = vld [vmem:[%s8525_s5 + $0x58] sm:$0xff] }
 0x22f   :  { %5184 = vmatpush1.bf16.msra.mxu1 %v7417_v24  ;;  %876 = vmatprep.mubr.f32.mxu1 %v6934_v1  ;;  %v7462_v35 = vpack.c.bf16 %v930_v33, %v926_v18  ;;  %v5669_v18 = vpack.c.bf16 %v2477_v32, %v2473_v31  ;;  %v2472_v33 = vld [vmem:[#allocation9] sm:$0xff]  ;;  %v2513_v31 = vld [vmem:[#allocation9 + $0x148] sm:$0xff] }
 0x230   :  { %5186 = vmatprep.subr.bf16.mxu1 %v7420_v25  ;;  %v5671_v37 = vpack.c.bf16 %v2476_v36, %v2472_v33  ;;  %v2517_v32 = vld [vmem:[#allocation9 + $0x168] sm:$0xff]  ;;  %v2512_v33 = vld [vmem:[#allocation9 + $0x140] sm:$0xff] }
 0x231   :  { %5670 = vmatprep.subr.bf16.mxu0 %v5669_v18  ;;  %v5689_v18 = vpack.c.bf16 %v2517_v32, %v2513_v31  ;;  %v2516_v36 = vld [vmem:[#allocation9 + $0x160] sm:$0xff]  ;;  %v352_v32 = vsub.s32 3, %v7605_v63 }
 0x232   :  { %4910 = vmatmul.mubr.msk.f32.gmra.mrb[16].mxu1 %vm358_vm10, %v7204_v17  ;;  %v934_v17 = vld [vmem:[%s8525_s5 + $0x98] sm:$0xff]  ;;  %5672 = vmatpush1.bf16.msra.mxu0 %v5671_v37  ;;  %v5691_v37 = vpack.c.bf16 %v2516_v36, %v2512_v33 }
 0x233   :  { %5188 = vmatpush1.bf16.msra.mxu1 %v7438_v29  ;;  %1056 = vmatprep.mubr.f32.mxu1 %v6934_v1  ;;  %v7482_v40 = vpack.c.bf16 %v938_v38, %v934_v17  ;;  %v2481_v17 = vld [vmem:[#allocation9 + $0x48] sm:$0xff] }
 0x234   :  { %5190 = vmatprep.subr.bf16.mxu1 %v7441_v30  ;;  %v2485_v38 = vld [vmem:[#allocation9 + $0x68] sm:$0xff] }
 0x235   :  { %v5673_v42 = vpack.c.bf16 %v2485_v38, %v2481_v17  ;;  %v2521_v17 = vld [vmem:[#allocation9 + $0x188] sm:$0xff] }
 0x236   :  { %1057 = vmatmul.mubr.f32.vlgmr.msra.gmra.mrb[0].mxu1 %v6934_v1  ;;  %v2525_v38 = vld [vmem:[#allocation9 + $0x1a8] sm:$0xff] }
 0x237   :  { %5192 = vmatpush1.bf16.msra.mxu1 %v7459_v34  ;;  %1127 = vmatprep.mubr.f32.mxu1 %v6934_v1 }
 0x238   :  { %5194 = vmatprep.subr.bf16.mxu1 %v7462_v35  ;;  %5674 = vmatprep.subr.bf16.mxu0 %v5673_v42  ;;  %v5693_v42 = vpack.c.bf16 %v2525_v38, %v2521_v17  ;;  %v7630_v17 = vrot.slane %v336_v7, %v352_v32 }
 0x239   :  { %5676 = vmatpush1.bf16.msra.mxu0 %v5675_v46  ;;  %v5695_v46 = vpack.c.bf16 %v2524_v45, %v2520_v44 }
 0x23a   :  { %5678 = vmatprep.subr.bf16.mxu0 %v5677_v53  ;;  %v5697_v53 = vpack.c.bf16 %v2533_v52, %v2529_v51 }
 0x23b   :  { %5196 = vmatpush1.bf16.msra.mxu1 %v7478_v39 }
 0x23c   :  { %5198 = vmatprep.subr.bf16.mxu1 %v7482_v40 }
 0x23d   :  { %5680 = vmatpush1.bf16.msra.mxu0 %v5679_v62  ;;  %v5699_v62 = vpack.c.bf16 %v2532_v59, %v2528_v56 }
 0x23e   :  { %5682 = vmatprep.subr.bf16.mxu0 %v5681_v6  ;;  %v344_v6 = vsub.s32 1, %v7605_v63 }
 0x23f   :  { %5200 = vmatpush1.bf16.msra.mxu1 %v7497_v47 }
 0x240   :  { %5202 = vmatprep.subr.bf16.mxu1 %v7500_v50  ;;  %v7614_v14 = vrot.slane %v336_v7, %v344_v6 }
 0x241   :  { %5684 = vmatpush1.bf16.msra.mxu0 %v5683_v11 }
 0x242   :  { %5686 = vmatprep.subr.bf16.mxu0 %v5685_v22 }
 0x243   :  { %5204 = vmatpush1.bf16.msra.mxu1 %v7515_v57 }
 0x244   :  { %5206 = vmatprep.subr.bf16.mxu1 %v7518_v58 }
 0x245   :  { %5688 = vmatpush1.bf16.msra.mxu0 %v5687_v15  ;;  %v348_v15 = vsub.s32 2, %v7605_v63 }
 0x246   :  { %5690 = vmatprep.subr.bf16.mxu0 %v5689_v18 }
 0x247   :  { %5208 = vmatpush1.bf16.msra.mxu1 %v7533_v2  ;;  %v7626_v36 = vrot.slane %v336_v7, %v348_v15 }
 0x248   :  { %5210 = vmatprep.subr.bf16.mxu1 %v7536_v5 }
 0x249   :  { %5692 = vmatpush1.bf16.msra.mxu0 %v5691_v37 }
 0x24a   :  { %5694 = vmatprep.subr.bf16.mxu0 %v5693_v42 }
 0x24b   :  { %5212 = vmatpush1.bf16.msra.mxu1 %v7551_v13 }
 0x24c   :  { %5214 = vmatprep.subr.bf16.mxu1 %v7554_v12 }
 0x24d   :  { %5696 = vmatpush1.bf16.msra.mxu0 %v5695_v46 }
 0x24e   :  { %5698 = vmatprep.subr.bf16.mxu0 %v5697_v53 }
 0x24f   :  { %5216 = vmatpush1.bf16.msra.mxu1 %v7569_v23 }
 0x250   :  { %5218 = vmatprep.subr.bf16.mxu1 %v7572_v26 }
 0x251   :  { %5700 = vmatpush1.bf16.msra.mxu0 %v5699_v62 }
 0x253   :  { %5220 = vmatpush1.bf16.msra.mxu1 %v7581_v28 }
 0x254   :  { %5222 = vmatprep.subr.bf16.mxu1 %v7256_v43 }
 0x256   :  { %1128 = vmatmul.mubr.f32.vlgmr.msra.gmra.mrb[16].mxu1 %v6934_v1 }
 0x257   :  { %5224 = vmatpush1.bf16.msra.mxu1 %v7292_v48  ;;  %1241 = vmatprep.mubr.f32.mxu1 %v6934_v1 }
 0x258   :  { %5226 = vmatprep.subr.bf16.mxu1 %v7294_v49 }
 0x25b   :  { %5228 = vmatpush1.bf16.msra.mxu1 %v7312_v54 }
 0x25c   :  { %5230 = vmatprep.subr.bf16.mxu1 %v7315_v55 }
 0x25f   :  { %5232 = vmatpush1.bf16.msra.mxu1 %v7333_v60 }
 0x260   :  { %5234 = vmatprep.subr.bf16.mxu1 %v7336_v61 }
 0x263   :  { %5236 = vmatpush1.bf16.msra.mxu1 %v7354_v3 }
 0x264   :  { %5238 = vmatprep.subr.bf16.mxu1 %v7357_v4 }
 0x267   :  { %5240 = vmatpush1.bf16.msra.mxu1 %v7375_v9 }
 0x268   :  { %5242 = vmatprep.subr.bf16.mxu1 %v7378_v10 }
 0x26b   :  { %5244 = vmatpush1.bf16.msra.mxu1 %v7396_v19 }
 0x26c   :  { %5246 = vmatprep.subr.bf16.mxu1 %v7399_v20 }
 0x26f   :  { %5248 = vmatpush1.bf16.msra.mxu1 %v7417_v24 }
 0x270   :  { %5250 = vmatprep.subr.bf16.mxu1 %v7420_v25 }
 0x273   :  { %5252 = vmatpush1.bf16.msra.mxu1 %v7438_v29 }
 0x274   :  { %5254 = vmatprep.subr.bf16.mxu1 %v7441_v30 }
 0x309   :  { %v1058_v0 = vpop.f32.mrb[0].mxu1 }
 0x30a   :  { %v1060_v11 = vpop.f32.mrb[1].mxu1  ;;  %v6345_v22 = vadd.f32 %v1058_v0, %v7618_v21 }
 0x30b   :  { %v6346_v41 = vadd.f32 %v1060_v11, %v7614_v14 }
 0x30c   :  { %v4911_v27 = vmul.f32 -1.442695, %v6345_v22 }
 0x30d   :  { %v4912_v16 = vmul.f32 -1.442695, %v6346_v41 }
 0x30f   :  { %6550 = vpow2.f32 %v4912_v16 }
 0x310   :  { %6552 = vpow2.f32 %v4911_v27 }
 0x319   :  { %v6551_v31 = vpop.eup %6550 }
 0x31a   :  { %v6553_v18 = vpop.eup %6552  ;;  %v1147_v33 = vadd.f32 1.0, %v6551_v31 }
 0x31b   :  { %v1141_v37 = vadd.f32 1.0, %v6553_v18 }
 0x31c   :  { %6554 = vrcp.f32 %v1147_v33 }
 0x31d   :  { %6556 = vrcp.f32 %v1141_v37 }
 0x326   :  { %v6555_v51 = vpop.eup %6554 }
 0x327   :  { %v6557_v52 = vpop.eup %6556  ;;  %v1157_v56 = vmul.f32 0.0, %v6555_v51 }
 0x329   :  { %v1129_v38 = vpop.f32.mrb[16].mxu1 }
 0x32a   :  { %v6361_v42 = vadd.f32 %v1129_v38, %v7626_v36  ;;  %v1131_v44 = vpop.f32.mrb[17].mxu1 }
 0x32b   :  { %v6362_v45 = vadd.f32 %v1131_v44, %v7630_v17 }
 0x32c   :  { %6558 = vtanh.f32 %v6361_v42 }
 0x32d   :  { %v4913_v46 = vmul.f32 -1.442695, %v6362_v45 }
 0x32f   :  { %6560 = vpow2.f32 %v4913_v46 }
 0x336   :  { %v6559_v53 = vpop.eup %6558 }
 0x337   :  { %v1158_v59 = vmul.f32 %v6559_v53, %v6557_v52 }
 0x339   :  { %v6561_v62 = vpop.eup %6560  ;;  %v7634_v0 = vadd.f32 %v1158_v59, %v1157_v56 }
 0x33a   :  { %v1154_v7 = vadd.f32 1.0, %v6561_v62 }
 0x33b   :  { %6562 = vtanh.f32 %v7634_v0 }
 0x33c   :  { %6564 = vrcp.f32 %v1154_v7 }
 0x345   :  { %v6563_v11 = vpop.eup %6562 }
 0x346   :  { %v6565_v41 = vpop.eup %6564 }
 0x347   :  { %v7637_v22 = vmul.f32 %v6565_v41, %v6563_v11 }
 0x349   :  { %1242 = vmatmul.mubr.f32.vlgmr.msra.gmra.mrb[2].mxu1 %v7637_v22  ;;  %2623 = vmatmul.mubr.f32.vlgmr.msra.gmra.mrb[8].mxu0 %v7637_v22 }
 0x34a   :  { %5256 = vmatpush1.bf16.msra.mxu1 %v7459_v34  ;;  %1312 = vmatprep.mubr.f32.mxu1 %v6934_v1 }
 0x34b   :  { %5258 = vmatprep.subr.bf16.mxu1 %v7462_v35  ;;  %2628 = vmatprep.mubr.f32.mxu0 %v6934_v1 }
 0x34e   :  { %5260 = vmatpush1.bf16.msra.mxu1 %v7478_v39 }
 0x34f   :  { %5262 = vmatprep.subr.bf16.mxu1 %v7482_v40 }
 0x352   :  { %5264 = vmatpush1.bf16.msra.mxu1 %v7497_v47 }
 0x353   :  { %5266 = vmatprep.subr.bf16.mxu1 %v7500_v50 }
 0x356   :  { %5268 = vmatpush1.bf16.msra.mxu1 %v7515_v57 }
 0x357   :  { %5270 = vmatprep.subr.bf16.mxu1 %v7518_v58 }
 0x35a   :  { %5272 = vmatpush1.bf16.msra.mxu1 %v7533_v2 }
 0x35b   :  { %5274 = vmatprep.subr.bf16.mxu1 %v7536_v5 }
 0x35e   :  { %5276 = vmatpush1.bf16.msra.mxu1 %v7551_v13 }
 0x35f   :  { %5278 = vmatprep.subr.bf16.mxu1 %v7554_v12 }
 0x362   :  { %5280 = vmatpush1.bf16.msra.mxu1 %v7569_v23 }
 0x363   :  { %5282 = vmatprep.subr.bf16.mxu1 %v7572_v26 }
 0x366   :  { %5284 = vmatpush1.bf16.msra.mxu1 %v7581_v28 }
 0x367   :  { %5286 = vmatprep.subr.bf16.mxu1 %v7256_v43 }
 0x369   :  { %1313 = vmatmul.mubr.f32.vlgmr.msra.gmra.mrb[18].mxu1 %v7637_v22 }
 0x36a   :  { %5288 = vmatpush1.bf16.msra.mxu1 %v7292_v48  ;;  %1427 = vmatprep.mubr.f32.mxu1 %v6934_v1 }
 0x36b   :  { %5290 = vmatprep.subr.bf16.mxu1 %v7294_v49 }
 0x36e   :  { %5292 = vmatpush1.bf16.msra.mxu1 %v7312_v54 }
 0x36f   :  { %5294 = vmatprep.subr.bf16.mxu1 %v7315_v55 }
 0x372   :  { %5296 = vmatpush1.bf16.msra.mxu1 %v7333_v60 }
 0x373   :  { %5298 = vmatprep.subr.bf16.mxu1 %v7336_v61 }
 0x376   :  { %5300 = vmatpush1.bf16.msra.mxu1 %v7354_v3 }
 0x377   :  { %5302 = vmatprep.subr.bf16.mxu1 %v7357_v4 }
 0x37a   :  { %5304 = vmatpush1.bf16.msra.mxu1 %v7375_v9 }
 0x37b   :  { %5306 = vmatprep.subr.bf16.mxu1 %v7378_v10 }
 0x37e   :  { %5308 = vmatpush1.bf16.msra.mxu1 %v7396_v19 }
 0x37f   :  { %5310 = vmatprep.subr.bf16.mxu1 %v7399_v20 }
 0x382   :  { %5312 = vmatpush1.bf16.msra.mxu1 %v7417_v24 }
 0x383   :  { %5314 = vmatprep.subr.bf16.mxu1 %v7420_v25 }
 0x386   :  { %5316 = vmatpush1.bf16.msra.mxu1 %v7438_v29 }
 0x387   :  { %5318 = vmatprep.subr.bf16.mxu1 %v7441_v30 }
 0x41c   :  { %v1243_v16 = vpop.f32.mrb[2].mxu1 }
 0x41d   :  { %v1245_v27 = vpop.f32.mrb[3].mxu1  ;;  %v6347_v18 = vadd.f32 %v1243_v16, %v7618_v21 }
 0x41e   :  { %v6348_v31 = vadd.f32 %v1245_v27, %v7614_v14 }
 0x41f   :  { %v4914_v37 = vmul.f32 -1.442695, %v6347_v18 }
 0x420   :  { %v4915_v33 = vmul.f32 -1.442695, %v6348_v31 }
 0x422   :  { %6566 = vpow2.f32 %v4915_v33 }
 0x423   :  { %6568 = vpow2.f32 %v4914_v37 }
 0x42c   :  { %v6567_v38 = vpop.eup %6566 }
 0x42d   :  { %v6569_v42 = vpop.eup %6568  ;;  %v1332_v44 = vadd.f32 1.0, %v6567_v38 }
 0x42e   :  { %v1326_v45 = vadd.f32 1.0, %v6569_v42 }
 0x42f   :  { %6570 = vrcp.f32 %v1332_v44 }
 0x430   :  { %6572 = vrcp.f32 %v1326_v45 }
 0x439   :  { %v6571_v59 = vpop.eup %6570 }
 0x43a   :  { %v6573_v62 = vpop.eup %6572  ;;  %v1342_v11 = vmul.f32 %v6571_v59, %v7634_v0 }
 0x43c   :  { %v1314_v46 = vpop.f32.mrb[18].mxu1 }
 0x43d   :  { %v6363_v51 = vadd.f32 %v1314_v46, %v7626_v36  ;;  %v1316_v52 = vpop.f32.mrb[19].mxu1 }
 0x43e   :  { %v6364_v53 = vadd.f32 %v1316_v52, %v7630_v17 }
 0x43f   :  { %6574 = vtanh.f32 %v6363_v51 }
 0x440   :  { %v4916_v56 = vmul.f32 -1.442695, %v6364_v53 }
 0x442   :  { %6576 = vpow2.f32 %v4916_v56 }
 0x449   :  { %v6575_v7 = vpop.eup %6574 }
 0x44a   :  { %v1343_v41 = vmul.f32 %v6575_v7, %v6573_v62 }
 0x44c   :  { %v6577_v16 = vpop.eup %6576  ;;  %v7682_v27 = vadd.f32 %v1343_v41, %v1342_v11 }
 0x44d   :  { %v1339_v31 = vadd.f32 1.0, %v6577_v16 }
 0x44e   :  { %6578 = vtanh.f32 %v7682_v27 }
 0x44f   :  { %6580 = vrcp.f32 %v1339_v31 }
 0x458   :  { %v6579_v18 = vpop.eup %6578 }
 0x459   :  { %v6581_v33 = vpop.eup %6580 }
 0x45a   :  { %v7685_v37 = vmul.f32 %v6581_v33, %v6579_v18 }
 0x45c   :  { %1428 = vmatmul.mubr.f32.vlgmr.msra.gmra.mrb[4].mxu1 %v7685_v37  ;;  %2629 = vmatmul.mubr.f32.gmra.mrb[10].mxu0 %v7685_v37 }
 0x45d   :  { %5320 = vmatpush1.bf16.msra.mxu1 %v7459_v34  ;;  %1498 = vmatprep.mubr.f32.mxu1 %v6934_v1 }
 0x45e   :  { %5322 = vmatprep.subr.bf16.mxu1 %v7462_v35  ;;  %2634 = vmatprep.mubr.f32.mxu0 %v6934_v1 }
 0x461   :  { %5324 = vmatpush1.bf16.msra.mxu1 %v7478_v39 }
 0x462   :  { %5326 = vmatprep.subr.bf16.mxu1 %v7482_v40 }
 0x465   :  { %5328 = vmatpush1.bf16.msra.mxu1 %v7497_v47 }
 0x466   :  { %5330 = vmatprep.subr.bf16.mxu1 %v7500_v50 }
 0x469   :  { %5332 = vmatpush1.bf16.msra.mxu1 %v7515_v57 }
 0x46a   :  { %5334 = vmatprep.subr.bf16.mxu1 %v7518_v58 }
 0x46d   :  { %5336 = vmatpush1.bf16.msra.mxu1 %v7533_v2 }
 0x46e   :  { %5338 = vmatprep.subr.bf16.mxu1 %v7536_v5 }
 0x471   :  { %5340 = vmatpush1.bf16.msra.mxu1 %v7551_v13 }
 0x472   :  { %5342 = vmatprep.subr.bf16.mxu1 %v7554_v12 }
 0x475   :  { %5344 = vmatpush1.bf16.msra.mxu1 %v7569_v23 }
 0x476   :  { %5346 = vmatprep.subr.bf16.mxu1 %v7572_v26 }
 0x479   :  { %5348 = vmatpush1.bf16.msra.mxu1 %v7581_v28 }
 0x47a   :  { %5350 = vmatprep.subr.bf16.mxu1 %v7256_v43 }
 0x47c   :  { %1499 = vmatmul.mubr.f32.vlgmr.msra.gmra.mrb[20].mxu1 %v7685_v37 }
 0x47d   :  { %5352 = vmatpush1.bf16.msra.mxu1 %v7292_v48  ;;  %1613 = vmatprep.mubr.f32.mxu1 %v6934_v1 }
 0x47e   :  { %5354 = vmatprep.subr.bf16.mxu1 %v7294_v49 }
 0x481   :  { %5356 = vmatpush1.bf16.msra.mxu1 %v7312_v54 }
 0x482   :  { %5358 = vmatprep.subr.bf16.mxu1 %v7315_v55 }
 0x485   :  { %5360 = vmatpush1.bf16.msra.mxu1 %v7333_v60 }
 0x486   :  { %5362 = vmatprep.subr.bf16.mxu1 %v7336_v61 }
 0x489   :  { %5364 = vmatpush1.bf16.msra.mxu1 %v7354_v3 }
 0x48a   :  { %5366 = vmatprep.subr.bf16.mxu1 %v7357_v4 }
 0x48d   :  { %5368 = vmatpush1.bf16.msra.mxu1 %v7375_v9 }
 0x48e   :  { %5370 = vmatprep.subr.bf16.mxu1 %v7378_v10 }
 0x491   :  { %5372 = vmatpush1.bf16.msra.mxu1 %v7396_v19 }
 0x492   :  { %5374 = vmatprep.subr.bf16.mxu1 %v7399_v20 }
 0x495   :  { %5376 = vmatpush1.bf16.msra.mxu1 %v7417_v24 }
 0x496   :  { %5378 = vmatprep.subr.bf16.mxu1 %v7420_v25 }
 0x499   :  { %5380 = vmatpush1.bf16.msra.mxu1 %v7438_v29 }
 0x49a   :  { %5382 = vmatprep.subr.bf16.mxu1 %v7441_v30 }
 0x52f   :  { %v1429_v0 = vpop.f32.mrb[4].mxu1 }
 0x530   :  { %v1431_v38 = vpop.f32.mrb[5].mxu1  ;;  %v6349_v44 = vadd.f32 %v1429_v0, %v7618_v21 }
 0x531   :  { %v6350_v42 = vadd.f32 %v1431_v38, %v7614_v14 }
 0x532   :  { %v4917_v46 = vmul.f32 -1.442695, %v6349_v44 }
 0x533   :  { %v4918_v45 = vmul.f32 -1.442695, %v6350_v42 }
 0x535   :  { %6582 = vpow2.f32 %v4918_v45 }
 0x536   :  { %6584 = vpow2.f32 %v4917_v46 }
 0x53f   :  { %v6583_v51 = vpop.eup %6582 }
 0x540   :  { %v6585_v52 = vpop.eup %6584  ;;  %v1518_v53 = vadd.f32 1.0, %v6583_v51 }
 0x541   :  { %v1512_v56 = vadd.f32 1.0, %v6585_v52 }
 0x542   :  { %6586 = vrcp.f32 %v1518_v53 }
 0x543   :  { %6588 = vrcp.f32 %v1512_v56 }
 0x54c   :  { %v6587_v16 = vpop.eup %6586 }
 0x54d   :  { %v6589_v31 = vpop.eup %6588  ;;  %v1528_v33 = vmul.f32 %v6587_v16, %v7682_v27 }
 0x54f   :  { %v1500_v59 = vpop.f32.mrb[20].mxu1 }
 0x550   :  { %v6365_v62 = vadd.f32 %v1500_v59, %v7626_v36  ;;  %v1502_v7 = vpop.f32.mrb[21].mxu1 }
 0x551   :  { %v6366_v11 = vadd.f32 %v1502_v7, %v7630_v17 }
 0x552   :  { %6590 = vtanh.f32 %v6365_v62 }
 0x553   :  { %v4919_v41 = vmul.f32 -1.442695, %v6366_v11 }
 0x555   :  { %6592 = vpow2.f32 %v4919_v41 }
 0x55c   :  { %v6591_v18 = vpop.eup %6590 }
 0x55d   :  { %v1529_v0 = vmul.f32 %v6591_v18, %v6589_v31 }
 0x55f   :  { %v6593_v38 = vpop.eup %6592  ;;  %v7730_v42 = vadd.f32 %v1529_v0, %v1528_v33 }
 0x560   :  { %v1525_v44 = vadd.f32 1.0, %v6593_v38 }
 0x561   :  { %6594 = vtanh.f32 %v7730_v42 }
 0x562   :  { %6596 = vrcp.f32 %v1525_v44 }
 0x56b   :  { %v6595_v45 = vpop.eup %6594 }
 0x56c   :  { %v6597_v46 = vpop.eup %6596 }
 0x56d   :  { %v7733_v51 = vmul.f32 %v6597_v46, %v6595_v45 }
 0x56f   :  { %1614 = vmatmul.mubr.f32.vlgmr.msra.gmra.mrb[6].mxu1 %v7733_v51  ;;  %2635 = vmatmul.mubr.f32.gmra.mrb[12].mxu0 %v7733_v51 }
 0x570   :  { %5384 = vmatpush1.bf16.msra.mxu1 %v7459_v34  ;;  %1684 = vmatprep.mubr.f32.mxu1 %v6934_v1 }
 0x571   :  { %5386 = vmatprep.subr.bf16.mxu1 %v7462_v35  ;;  %2640 = vmatprep.mubr.f32.mxu0 %v6934_v1 }
 0x574   :  { %5388 = vmatpush1.bf16.msra.mxu1 %v7478_v39 }
 0x575   :  { %5390 = vmatprep.subr.bf16.mxu1 %v7482_v40 }
 0x578   :  { %5392 = vmatpush1.bf16.msra.mxu1 %v7497_v47 }
 0x579   :  { %5394 = vmatprep.subr.bf16.mxu1 %v7500_v50 }
 0x57c   :  { %5396 = vmatpush1.bf16.msra.mxu1 %v7515_v57 }
 0x57d   :  { %5398 = vmatprep.subr.bf16.mxu1 %v7518_v58 }
 0x580   :  { %5400 = vmatpush1.bf16.msra.mxu1 %v7533_v2 }
 0x581   :  { %5402 = vmatprep.subr.bf16.mxu1 %v7536_v5 }
 0x584   :  { %5404 = vmatpush1.bf16.msra.mxu1 %v7551_v13 }
 0x585   :  { %5406 = vmatprep.subr.bf16.mxu1 %v7554_v12 }
 0x588   :  { %5408 = vmatpush1.bf16.msra.mxu1 %v7569_v23 }
 0x589   :  { %5410 = vmatprep.subr.bf16.mxu1 %v7572_v26 }
 0x58c   :  { %5412 = vmatpush1.bf16.msra.mxu1 %v7581_v28 }
 0x58d   :  { %5414 = vmatprep.subr.bf16.mxu1 %v7256_v43 }
 0x58f   :  { %1685 = vmatmul.mubr.f32.vlgmr.msra.gmra.mrb[22].mxu1 %v7733_v51 }
 0x590   :  { %5416 = vmatpush1.bf16.msra.mxu1 %v7292_v48  ;;  %1799 = vmatprep.mubr.f32.mxu1 %v6934_v1 }
 0x591   :  { %5418 = vmatprep.subr.bf16.mxu1 %v7294_v49 }
 0x594   :  { %5420 = vmatpush1.bf16.msra.mxu1 %v7312_v54 }
 0x595   :  { %5422 = vmatprep.subr.bf16.mxu1 %v7315_v55 }
 0x598   :  { %5424 = vmatpush1.bf16.msra.mxu1 %v7333_v60 }
 0x599   :  { %5426 = vmatprep.subr.bf16.mxu1 %v7336_v61 }
 0x59c   :  { %5428 = vmatpush1.bf16.msra.mxu1 %v7354_v3 }
 0x59d   :  { %5430 = vmatprep.subr.bf16.mxu1 %v7357_v4 }
 0x5a0   :  { %5432 = vmatpush1.bf16.msra.mxu1 %v7375_v9 }
 0x5a1   :  { %5434 = vmatprep.subr.bf16.mxu1 %v7378_v10 }
 0x5a4   :  { %5436 = vmatpush1.bf16.msra.mxu1 %v7396_v19 }
 0x5a5   :  { %5438 = vmatprep.subr.bf16.mxu1 %v7399_v20 }
 0x5a8   :  { %5440 = vmatpush1.bf16.msra.mxu1 %v7417_v24 }
 0x5a9   :  { %5442 = vmatprep.subr.bf16.mxu1 %v7420_v25 }
 0x5ac   :  { %5444 = vmatpush1.bf16.msra.mxu1 %v7438_v29 }
 0x5ad   :  { %5446 = vmatprep.subr.bf16.mxu1 %v7441_v30 }
 0x642   :  { %v1615_v27 = vpop.f32.mrb[6].mxu1 }
 0x643   :  { %v1617_v52 = vpop.f32.mrb[7].mxu1  ;;  %v6351_v56 = vadd.f32 %v1615_v27, %v7618_v21 }
 0x644   :  { %v6352_v53 = vadd.f32 %v1617_v52, %v7614_v14 }
 0x645   :  { %v4920_v62 = vmul.f32 -1.442695, %v6351_v56 }
 0x646   :  { %v4921_v59 = vmul.f32 -1.442695, %v6352_v53 }
 0x648   :  { %6598 = vpow2.f32 %v4921_v59 }
 0x649   :  { %6600 = vpow2.f32 %v4920_v62 }
 0x652   :  { %v6599_v7 = vpop.eup %6598 }
 0x653   :  { %v6601_v11 = vpop.eup %6600  ;;  %v1704_v41 = vadd.f32 1.0, %v6599_v7 }
 0x654   :  { %v1698_v16 = vadd.f32 1.0, %v6601_v11 }
 0x655   :  { %6602 = vrcp.f32 %v1704_v41 }
 0x656   :  { %6604 = vrcp.f32 %v1698_v16 }
 0x65f   :  { %v6603_v44 = vpop.eup %6602 }
 0x660   :  { %v6605_v45 = vpop.eup %6604  ;;  %v1714_v27 = vmul.f32 %v6603_v44, %v7730_v42 }
 0x662   :  { %v1686_v31 = vpop.f32.mrb[22].mxu1 }
 0x663   :  { %v6367_v18 = vadd.f32 %v1686_v31, %v7626_v36  ;;  %v1688_v33 = vpop.f32.mrb[23].mxu1 }
 0x664   :  { %v6368_v0 = vadd.f32 %v1688_v33, %v7630_v17 }
 0x665   :  { %6606 = vtanh.f32 %v6367_v18 }
 0x666   :  { %v4922_v38 = vmul.f32 -1.442695, %v6368_v0 }
 0x668   :  { %6608 = vpow2.f32 %v4922_v38 }
 0x66f   :  { %v6607_v46 = vpop.eup %6606 }
 0x670   :  { %v1715_v52 = vmul.f32 %v6607_v46, %v6605_v45 }
 0x672   :  { %v6609_v53 = vpop.eup %6608  ;;  %v7778_v56 = vadd.f32 %v1715_v52, %v1714_v27 }
 0x673   :  { %v1711_v59 = vadd.f32 1.0, %v6609_v53 }
 0x674   :  { %6610 = vtanh.f32 %v7778_v56 }
 0x675   :  { %6612 = vrcp.f32 %v1711_v59 }
 0x67e   :  { %v6611_v62 = vpop.eup %6610 }
 0x67f   :  { %v6613_v7 = vpop.eup %6612 }
 0x680   :  { %v7781_v11 = vmul.f32 %v6613_v7, %v6611_v62 }
 0x682   :  { %1800 = vmatmul.mubr.f32.vlgmr.msra.gmra.mrb[8].mxu1 %v7781_v11  ;;  %2641 = vmatmul.mubr.f32.gmra.mrb[14].mxu0 %v7781_v11 }
 0x683   :  { %5448 = vmatpush1.bf16.msra.mxu1 %v7459_v34  ;;  %1870 = vmatprep.mubr.f32.mxu1 %v6934_v1 }
 0x684   :  { %5450 = vmatprep.subr.bf16.mxu1 %v7462_v35  ;;  %2646 = vmatprep.mubr.f32.mxu0 %v6934_v1 }
 0x687   :  { %5452 = vmatpush1.bf16.msra.mxu1 %v7478_v39 }
 0x688   :  { %5454 = vmatprep.subr.bf16.mxu1 %v7482_v40 }
 0x68b   :  { %5456 = vmatpush1.bf16.msra.mxu1 %v7497_v47 }
 0x68c   :  { %5458 = vmatprep.subr.bf16.mxu1 %v7500_v50 }
 0x68f   :  { %5460 = vmatpush1.bf16.msra.mxu1 %v7515_v57 }
 0x690   :  { %5462 = vmatprep.subr.bf16.mxu1 %v7518_v58 }
 0x693   :  { %5464 = vmatpush1.bf16.msra.mxu1 %v7533_v2 }
 0x694   :  { %5466 = vmatprep.subr.bf16.mxu1 %v7536_v5 }
 0x697   :  { %5468 = vmatpush1.bf16.msra.mxu1 %v7551_v13 }
 0x698   :  { %5470 = vmatprep.subr.bf16.mxu1 %v7554_v12 }
 0x69b   :  { %5472 = vmatpush1.bf16.msra.mxu1 %v7569_v23 }
 0x69c   :  { %5474 = vmatprep.subr.bf16.mxu1 %v7572_v26 }
 0x69f   :  { %5476 = vmatpush1.bf16.msra.mxu1 %v7581_v28 }
 0x6a0   :  { %5478 = vmatprep.subr.bf16.mxu1 %v7256_v43 }
 0x6a2   :  { %1871 = vmatmul.mubr.f32.vlgmr.msra.gmra.mrb[24].mxu1 %v7781_v11 }
 0x6a3   :  { %5480 = vmatpush1.bf16.msra.mxu1 %v7292_v48  ;;  %1985 = vmatprep.mubr.f32.mxu1 %v6934_v1 }
 0x6a4   :  { %5482 = vmatprep.subr.bf16.mxu1 %v7294_v49 }
 0x6a7   :  { %5484 = vmatpush1.bf16.msra.mxu1 %v7312_v54 }
 0x6a8   :  { %5486 = vmatprep.subr.bf16.mxu1 %v7315_v55 }
 0x6ab   :  { %5488 = vmatpush1.bf16.msra.mxu1 %v7333_v60 }
 0x6ac   :  { %5490 = vmatprep.subr.bf16.mxu1 %v7336_v61 }
 0x6af   :  { %5492 = vmatpush1.bf16.msra.mxu1 %v7354_v3 }
 0x6b0   :  { %5494 = vmatprep.subr.bf16.mxu1 %v7357_v4 }
 0x6b3   :  { %5496 = vmatpush1.bf16.msra.mxu1 %v7375_v9 }
 0x6b4   :  { %5498 = vmatprep.subr.bf16.mxu1 %v7378_v10 }
 0x6b7   :  { %5500 = vmatpush1.bf16.msra.mxu1 %v7396_v19 }
 0x6b8   :  { %5502 = vmatprep.subr.bf16.mxu1 %v7399_v20 }
 0x6bb   :  { %5504 = vmatpush1.bf16.msra.mxu1 %v7417_v24 }
 0x6bc   :  { %5506 = vmatprep.subr.bf16.mxu1 %v7420_v25 }
 0x6bf   :  { %5508 = vmatpush1.bf16.msra.mxu1 %v7438_v29 }
 0x6c0   :  { %5510 = vmatprep.subr.bf16.mxu1 %v7441_v30 }
 0x755   :  { %v1801_v42 = vpop.f32.mrb[8].mxu1 }
 0x756   :  { %v1803_v41 = vpop.f32.mrb[9].mxu1  ;;  %v6353_v31 = vadd.f32 %v1801_v42, %v7618_v21 }
 0x757   :  { %v6354_v16 = vadd.f32 %v1803_v41, %v7614_v14 }
 0x758   :  { %v4923_v33 = vmul.f32 -1.442695, %v6353_v31 }
 0x759   :  { %v4924_v18 = vmul.f32 -1.442695, %v6354_v16 }
 0x75b   :  { %6614 = vpow2.f32 %v4924_v18 }
 0x75c   :  { %6616 = vpow2.f32 %v4923_v33 }
 0x765   :  { %v6615_v0 = vpop.eup %6614 }
 0x766   :  { %v6617_v38 = vpop.eup %6616  ;;  %v1890_v44 = vadd.f32 1.0, %v6615_v0 }
 0x767   :  { %v1884_v45 = vadd.f32 1.0, %v6617_v38 }
 0x768   :  { %6618 = vrcp.f32 %v1890_v44 }
 0x769   :  { %6620 = vrcp.f32 %v1884_v45 }
 0x772   :  { %v6619_v62 = vpop.eup %6618 }
 0x773   :  { %v6621_v7 = vpop.eup %6620  ;;  %v1900_v41 = vmul.f32 %v6619_v62, %v7778_v56 }
 0x775   :  { %v1872_v46 = vpop.f32.mrb[24].mxu1 }
 0x776   :  { %v6369_v27 = vadd.f32 %v1872_v46, %v7626_v36  ;;  %v1874_v52 = vpop.f32.mrb[25].mxu1 }
 0x777   :  { %v6370_v53 = vadd.f32 %v1874_v52, %v7630_v17 }
 0x778   :  { %6622 = vtanh.f32 %v6369_v27 }
 0x779   :  { %v4925_v59 = vmul.f32 -1.442695, %v6370_v53 }
 0x77b   :  { %6624 = vpow2.f32 %v4925_v59 }
 0x782   :  { %v6623_v42 = vpop.eup %6622 }
 0x783   :  { %v1901_v16 = vmul.f32 %v6623_v42, %v6621_v7 }
 0x785   :  { %v6625_v31 = vpop.eup %6624  ;;  %v7826_v18 = vadd.f32 %v1901_v16, %v1900_v41 }
 0x786   :  { %v1897_v33 = vadd.f32 1.0, %v6625_v31 }
 0x787   :  { %6626 = vtanh.f32 %v7826_v18 }
 0x788   :  { %6628 = vrcp.f32 %v1897_v33 }
 0x791   :  { %v6627_v0 = vpop.eup %6626 }
 0x792   :  { %v6629_v38 = vpop.eup %6628 }
 0x793   :  { %v7829_v44 = vmul.f32 %v6629_v38, %v6627_v0 }
 0x795   :  { %1986 = vmatmul.mubr.f32.vlgmr.msra.gmra.mrb[10].mxu1 %v7829_v44  ;;  %2647 = vmatmul.mubr.f32.gmra.mrb[16].mxu0 %v7829_v44 }
 0x796   :  { %5512 = vmatpush1.bf16.msra.mxu1 %v7459_v34  ;;  %2056 = vmatprep.mubr.f32.mxu1 %v6934_v1 }
 0x797   :  { %5514 = vmatprep.subr.bf16.mxu1 %v7462_v35  ;;  %2652 = vmatprep.mubr.f32.mxu0 %v6934_v1 }
 0x79a   :  { %5516 = vmatpush1.bf16.msra.mxu1 %v7478_v39 }
 0x79b   :  { %5518 = vmatprep.subr.bf16.mxu1 %v7482_v40 }
 0x79e   :  { %5520 = vmatpush1.bf16.msra.mxu1 %v7497_v47 }
 0x79f   :  { %5522 = vmatprep.subr.bf16.mxu1 %v7500_v50 }
 0x7a2   :  { %5524 = vmatpush1.bf16.msra.mxu1 %v7515_v57 }
 0x7a3   :  { %5526 = vmatprep.subr.bf16.mxu1 %v7518_v58 }
 0x7a6   :  { %5528 = vmatpush1.bf16.msra.mxu1 %v7533_v2 }
 0x7a7   :  { %5530 = vmatprep.subr.bf16.mxu1 %v7536_v5 }
 0x7aa   :  { %5532 = vmatpush1.bf16.msra.mxu1 %v7551_v13 }
 0x7ab   :  { %5534 = vmatprep.subr.bf16.mxu1 %v7554_v12 }
 0x7ae   :  { %5536 = vmatpush1.bf16.msra.mxu1 %v7569_v23 }
 0x7af   :  { %5538 = vmatprep.subr.bf16.mxu1 %v7572_v26 }
 0x7b2   :  { %5540 = vmatpush1.bf16.msra.mxu1 %v7581_v28 }
 0x7b3   :  { %5542 = vmatprep.subr.bf16.mxu1 %v7256_v43 }
 0x7b5   :  { %2057 = vmatmul.mubr.f32.vlgmr.msra.gmra.mrb[26].mxu1 %v7829_v44 }
 0x7b6   :  { %5544 = vmatpush1.bf16.msra.mxu1 %v7292_v48  ;;  %2171 = vmatprep.mubr.f32.mxu1 %v6934_v1 }
 0x7b7   :  { %5546 = vmatprep.subr.bf16.mxu1 %v7294_v49 }
 0x7ba   :  { %5548 = vmatpush1.bf16.msra.mxu1 %v7312_v54 }
 0x7bb   :  { %5550 = vmatprep.subr.bf16.mxu1 %v7315_v55 }
 0x7be   :  { %5552 = vmatpush1.bf16.msra.mxu1 %v7333_v60 }
 0x7bf   :  { %5554 = vmatprep.subr.bf16.mxu1 %v7336_v61 }
 0x7c2   :  { %5556 = vmatpush1.bf16.msra.mxu1 %v7354_v3 }
 0x7c3   :  { %5558 = vmatprep.subr.bf16.mxu1 %v7357_v4 }
 0x7c6   :  { %5560 = vmatpush1.bf16.msra.mxu1 %v7375_v9 }
 0x7c7   :  { %5562 = vmatprep.subr.bf16.mxu1 %v7378_v10 }
 0x7ca   :  { %5564 = vmatpush1.bf16.msra.mxu1 %v7396_v19 }
 0x7cb   :  { %5566 = vmatprep.subr.bf16.mxu1 %v7399_v20 }
 0x7ce   :  { %5568 = vmatpush1.bf16.msra.mxu1 %v7417_v24 }
 0x7cf   :  { %5570 = vmatprep.subr.bf16.mxu1 %v7420_v25 }
 0x7d2   :  { %5572 = vmatpush1.bf16.msra.mxu1 %v7438_v29 }
 0x7d3   :  { %5574 = vmatprep.subr.bf16.mxu1 %v7441_v30 }
 0x868   :  { %v1987_v56 = vpop.f32.mrb[10].mxu1 }
 0x869   :  { %v1989_v45 = vpop.f32.mrb[11].mxu1  ;;  %v6355_v27 = vadd.f32 %v1987_v56, %v7618_v21 }
 0x86a   :  { %v6356_v46 = vadd.f32 %v1989_v45, %v7614_v14 }
 0x86b   :  { %v4926_v53 = vmul.f32 -1.442695, %v6355_v27 }
 0x86c   :  { %v4927_v52 = vmul.f32 -1.442695, %v6356_v46 }
 0x86e   :  { %6630 = vpow2.f32 %v4927_v52 }
 0x86f   :  { %6632 = vpow2.f32 %v4926_v53 }
 0x878   :  { %v6631_v59 = vpop.eup %6630 }
 0x879   :  { %v6633_v62 = vpop.eup %6632  ;;  %v2076_v7 = vadd.f32 1.0, %v6631_v59 }
 0x87a   :  { %v2070_v42 = vadd.f32 1.0, %v6633_v62 }
 0x87b   :  { %6634 = vrcp.f32 %v2076_v7 }
 0x87c   :  { %6636 = vrcp.f32 %v2070_v42 }
 0x885   :  { %v6635_v38 = vpop.eup %6634 }
 0x886   :  { %v6637_v56 = vpop.eup %6636  ;;  %v2086_v46 = vmul.f32 %v6635_v38, %v7826_v18 }
 0x888   :  { %v2058_v41 = vpop.f32.mrb[26].mxu1 }
 0x889   :  { %v6371_v16 = vadd.f32 %v2058_v41, %v7626_v36  ;;  %v2060_v31 = vpop.f32.mrb[27].mxu1 }
 0x88a   :  { %v6372_v33 = vadd.f32 %v2060_v31, %v7630_v17 }
 0x88b   :  { %6638 = vtanh.f32 %v6371_v16 }
 0x88c   :  { %v4928_v0 = vmul.f32 -1.442695, %v6372_v33 }
 0x88e   :  { %6640 = vpow2.f32 %v4928_v0 }
 0x895   :  { %v6639_v45 = vpop.eup %6638 }
 0x896   :  { %v2087_v27 = vmul.f32 %v6639_v45, %v6637_v56 }
 0x898   :  { %v6641_v52 = vpop.eup %6640  ;;  %v7874_v53 = vadd.f32 %v2087_v27, %v2086_v46  ;;  %v2490_v46 = vld [vmem:[#allocation9 + $0x90] sm:$0xff] }
 0x899   :  { %v2083_v59 = vadd.f32 1.0, %v6641_v52  ;;  %v2494_v27 = vld [vmem:[#allocation9 + $0xb0] sm:$0xff] }
 0x89a   :  { %6642 = vtanh.f32 %v7874_v53  ;;  %v5711_v52 = vpack.c.bf16 %v2494_v27, %v2490_v46 }
 0x89b   :  { %6644 = vrcp.f32 %v2083_v59  ;;  %v2503_v59 = vld [vmem:[#allocation9 + $0xf8] sm:$0xff] }
 0x8a4   :  { %v6643_v62 = vpop.eup %6642 }
 0x8a5   :  { %v6645_v7 = vpop.eup %6644 }
 0x8a6   :  { %v7877_v42 = vmul.f32 %v6645_v7, %v6643_v62  ;;  %v2498_v7 = vld [vmem:[#allocation9 + $0xd0] sm:$0xff] }
 0x8a8   :  { %2172 = vmatmul.mubr.f32.vlgmr.msra.gmra.mrb[12].mxu1 %v7877_v42  ;;  %2653 = vmatmul.mubr.f32.gmra.mrb[18].mxu0 %v7877_v42 }
 0x8a9   :  { %5576 = vmatpush1.bf16.msra.mxu1 %v7459_v34  ;;  %2242 = vmatprep.mubr.f32.mxu1 %v6934_v1 }
 0x8aa   :  { %5578 = vmatprep.subr.bf16.mxu1 %v7462_v35  ;;  %2658 = vmatprep.mubr.f32.mxu0 %v6934_v1 }
 0x8ad   :  { %5580 = vmatpush1.bf16.msra.mxu1 %v7478_v39 }
 0x8ae   :  { %5582 = vmatprep.subr.bf16.mxu1 %v7482_v40 }
 0x8b1   :  { %5584 = vmatpush1.bf16.msra.mxu1 %v7497_v47 }
 0x8b2   :  { %5586 = vmatprep.subr.bf16.mxu1 %v7500_v50 }
 0x8b5   :  { %5588 = vmatpush1.bf16.msra.mxu1 %v7515_v57 }
 0x8b6   :  { %5590 = vmatprep.subr.bf16.mxu1 %v7518_v58 }
 0x8b9   :  { %5592 = vmatpush1.bf16.msra.mxu1 %v7533_v2 }
 0x8ba   :  { %5594 = vmatprep.subr.bf16.mxu1 %v7536_v5 }
 0x8bd   :  { %5596 = vmatpush1.bf16.msra.mxu1 %v7551_v13 }
 0x8be   :  { %5598 = vmatprep.subr.bf16.mxu1 %v7554_v12 }
 0x8c1   :  { %5600 = vmatpush1.bf16.msra.mxu1 %v7569_v23 }
 0x8c2   :  { %5602 = vmatprep.subr.bf16.mxu1 %v7572_v26 }
 0x8c5   :  { %5604 = vmatpush1.bf16.msra.mxu1 %v7581_v28 }
 0x8c6   :  { %5606 = vmatprep.subr.bf16.mxu1 %v7256_v43 }
 0x8c8   :  { %2243 = vmatmul.mubr.f32.vlgmr.msra.gmra.mrb[28].mxu1 %v7877_v42 }
 0x8c9   :  { %5608 = vmatpush1.bf16.msra.mxu1 %v7292_v48  ;;  %2356 = vmatprep.mubr.f32.mxu1 %v6934_v1 }
 0x8ca   :  { %5610 = vmatprep.subr.bf16.mxu1 %v7294_v49 }
 0x8cd   :  { %5612 = vmatpush1.bf16.msra.mxu1 %v7312_v54 }
 0x8ce   :  { %5614 = vmatprep.subr.bf16.mxu1 %v7315_v55 }
 0x8d1   :  { %5616 = vmatpush1.bf16.msra.mxu1 %v7333_v60 }
 0x8d2   :  { %5618 = vmatprep.subr.bf16.mxu1 %v7336_v61 }
 0x8d5   :  { %5620 = vmatpush1.bf16.msra.mxu1 %v7354_v3 }
 0x8d6   :  { %5622 = vmatprep.subr.bf16.mxu1 %v7357_v4 }
 0x8d9   :  { %5624 = vmatpush1.bf16.msra.mxu1 %v7375_v9 }
 0x8da   :  { %5626 = vmatprep.subr.bf16.mxu1 %v7378_v10 }
 0x8dd   :  { %5628 = vmatpush1.bf16.msra.mxu1 %v7396_v19 }
 0x8de   :  { %5630 = vmatprep.subr.bf16.mxu1 %v7399_v20 }
 0x8e1   :  { %5632 = vmatpush1.bf16.msra.mxu1 %v7417_v24 }
 0x8e2   :  { %5634 = vmatprep.subr.bf16.mxu1 %v7420_v25 }
 0x8e5   :  { %5636 = vmatpush1.bf16.msra.mxu1 %v7438_v29 }
 0x8e6   :  { %5638 = vmatprep.subr.bf16.mxu1 %v7441_v30 }
 0x97b   :  { %v2173_v43 = vpop.f32.mrb[12].mxu1 }
 0x97c   :  { %v2175_v48 = vpop.f32.mrb[13].mxu1  ;;  %v6357_v54 = vadd.f32 %v2173_v43, %v7618_v21  ;;  %v2502_v43 = vld [vmem:[#allocation9 + $0xf0] sm:$0xff] }
 0x97d   :  { %v6358_v49 = vadd.f32 %v2175_v48, %v7614_v14  ;;  %v5715_v48 = vpack.c.bf16 %v2502_v43, %v2498_v7 }
 0x97e   :  { %v4929_v60 = vmul.f32 -1.442695, %v6357_v54  ;;  %v2511_v54 = vld [vmem:[#allocation9 + $0x138] sm:$0xff] }
 0x97f   :  { %v4930_v55 = vmul.f32 -1.442695, %v6358_v49  ;;  %v2507_v49 = vld [vmem:[#allocation9 + $0x118] sm:$0xff] }
 0x981   :  { %6646 = vpow2.f32 %v4930_v55  ;;  %v5717_v55 = vpack.c.bf16 %v2511_v54, %v2507_v49 }
 0x982   :  { %6648 = vpow2.f32 %v4929_v60  ;;  %v2506_v60 = vld [vmem:[#allocation9 + $0x110] sm:$0xff] }
 0x98b   :  { %v6647_v61 = vpop.eup %6646 }
 0x98c   :  { %v6649_v3 = vpop.eup %6648  ;;  %v2262_v4 = vadd.f32 1.0, %v6647_v61  ;;  %v2510_v61 = vld [vmem:[#allocation9 + $0x130] sm:$0xff] }
 0x98d   :  { %v2256_v9 = vadd.f32 1.0, %v6649_v3  ;;  %v5719_v3 = vpack.c.bf16 %v2510_v61, %v2506_v60  ;;  %v2816_v61 = vld [vmem:[#allocation10] sm:$0xff] }
 0x98e   :  { %6650 = vrcp.f32 %v2262_v4  ;;  %v2515_v4 = vld [vmem:[#allocation9 + $0x158] sm:$0xff] }
 0x98f   :  { %6652 = vrcp.f32 %v2256_v9  ;;  %v2519_v9 = vld [vmem:[#allocation9 + $0x178] sm:$0xff] }
 0x998   :  { %v6651_v29 = vpop.eup %6650 }
 0x999   :  { %v6653_v30 = vpop.eup %6652  ;;  %v2272_v41 = vmul.f32 %v6651_v29, %v7874_v53  ;;  %v2499_v53 = vld [vmem:[#allocation9 + $0xd8] sm:$0xff] }
 0x99a   :  { %v5713_v62 = vpack.c.bf16 %v2503_v59, %v2499_v53 }
 0x99b   :  { %v2244_v10 = vpop.f32.mrb[28].mxu1 }
 0x99c   :  { %v6373_v19 = vadd.f32 %v2244_v10, %v7626_v36  ;;  %v2246_v20 = vpop.f32.mrb[29].mxu1  ;;  %v2514_v10 = vld [vmem:[#allocation9 + $0x150] sm:$0xff] }
 0x99d   :  { %v6374_v24 = vadd.f32 %v2246_v20, %v7630_v17  ;;  %v2518_v20 = vld [vmem:[#allocation9 + $0x170] sm:$0xff] }
 0x99e   :  { %6654 = vtanh.f32 %v6373_v19  ;;  %v5721_v19 = vpack.c.bf16 %v2519_v9, %v2515_v4  ;;  %v5723_v29 = vpack.c.bf16 %v2518_v20, %v2514_v10  ;;  %v2829_v4 = vld [vmem:[#allocation10 + $0x68] sm:$0xff]  ;;  %v2824_v10 = vld [vmem:[#allocation10 + $0x40] sm:$0xff] }
 0x99f   :  { %v4931_v25 = vmul.f32 -1.442695, %v6374_v24  ;;  %v2523_v24 = vld [vmem:[#allocation9 + $0x198] sm:$0xff]  ;;  %v2833_v20 = vld [vmem:[#allocation10 + $0x88] sm:$0xff] }
 0x9a1   :  { %6656 = vpow2.f32 %v4931_v25  ;;  %v2527_v25 = vld [vmem:[#allocation9 + $0x1b8] sm:$0xff] }
 0x9a8   :  { %v6655_v18 = vpop.eup %6654 }
 0x9a9   :  { %v2273_v16 = vmul.f32 %v6655_v18, %v6653_v30  ;;  %v5725_v30 = vpack.c.bf16 %v2527_v25, %v2523_v24  ;;  %v2522_v18 = vld [vmem:[#allocation9 + $0x190] sm:$0xff]  ;;  %v2837_v24 = vld [vmem:[#allocation10 + $0xa8] sm:$0xff] }
 0x9ab   :  { %v6657_v31 = vpop.eup %6656  ;;  %v7922_v33 = vadd.f32 %v2273_v16, %v2272_v41  ;;  %v2526_v41 = vld [vmem:[#allocation9 + $0x1b0] sm:$0xff]  ;;  %v2531_v16 = vld [vmem:[#allocation9 + $0x1d8] sm:$0xff] }
 0x9ac   :  { %v2269_v0 = vadd.f32 1.0, %v6657_v31  ;;  %v2535_v31 = vld [vmem:[#allocation9 + $0x1f8] sm:$0xff] }
 0x9ad   :  { %6658 = vtanh.f32 %v7922_v33 }
 0x9ae   :  { %6660 = vrcp.f32 %v2269_v0  ;;  %v5727_v0 = vpack.c.bf16 %v2526_v41, %v2522_v18  ;;  %v2836_v18 = vld [vmem:[#allocation10 + $0xa0] sm:$0xff]  ;;  %v2841_v41 = vld [vmem:[#allocation10 + $0xc8] sm:$0xff] }
 0x9b7   :  { %v6659_v38 = vpop.eup %6658 }
 0x9b8   :  { %v6661_v56 = vpop.eup %6660 }
 0x9b9   :  { %v7925_v45 = vmul.f32 %v6661_v56, %v6659_v38  ;;  %v5729_v38 = vpack.c.bf16 %v2535_v31, %v2531_v16  ;;  %v2530_v56 = vld [vmem:[#allocation9 + $0x1d0] sm:$0xff]  ;;  %v2845_v16 = vld [vmem:[#allocation10 + $0xe8] sm:$0xff] }
 0x9bb   :  { %2357 = vmatmul.mubr.f32.vlgmr.msra.gmra.mrb[14].mxu1 %v7925_v45  ;;  %2659 = vmatmul.mubr.f32.gmra.mrb[20].mxu0 %v7925_v45 }
 0x9bc   :  { %5640 = vmatpush1.bf16.msra.mxu1 %v7459_v34  ;;  %2427 = vmatprep.mubr.f32.mxu1 %v6934_v1  ;;  %v2475_v34 = vld [vmem:[#allocation9 + $0x18] sm:$0xff] }
 0x9bd   :  { %5642 = vmatprep.subr.bf16.mxu1 %v7462_v35  ;;  %2664 = vmatprep.mubr.f32.mxu0 %v6934_v1  ;;  %v2479_v35 = vld [vmem:[#allocation9 + $0x38] sm:$0xff] }
 0x9c0   :  { %5644 = vmatpush1.bf16.msra.mxu1 %v7478_v39  ;;  %v5701_v39 = vpack.c.bf16 %v2479_v35, %v2475_v34  ;;  %v2534_v34 = vld [vmem:[#allocation9 + $0x1f0] sm:$0xff] }
 0x9c1   :  { %5646 = vmatprep.subr.bf16.mxu1 %v7482_v40  ;;  %v2474_v40 = vld [vmem:[#allocation9 + $0x10] sm:$0xff]  ;;  %v5731_v35 = vpack.c.bf16 %v2534_v34, %v2530_v56  ;;  %v2844_v56 = vld [vmem:[#allocation10 + $0xe0] sm:$0xff]  ;;  %v2849_v34 = vld [vmem:[#allocation10 + $0x108] sm:$0xff] }
 0x9c2   :  { %5702 = vmatprep.subr.bf16.mxu0 %v5701_v39  ;;  %v2817_v39 = vld [vmem:[#allocation10 + $0x8] sm:$0xff] }
 0x9c4   :  { %5648 = vmatpush1.bf16.msra.mxu1 %v7497_v47  ;;  %v2478_v47 = vld [vmem:[#allocation9 + $0x30] sm:$0xff] }
 0x9c5   :  { %5650 = vmatprep.subr.bf16.mxu1 %v7500_v50  ;;  %v5703_v50 = vpack.c.bf16 %v2478_v47, %v2474_v40  ;;  %v2821_v40 = vld [vmem:[#allocation10 + $0x28] sm:$0xff] }
 0x9c6   :  { %v5733_v47 = vpack.c.bf16 %v2821_v40, %v2817_v39 }
 0x9c7   :  { %5704 = vmatpush1.bf16.msra.mxu0 %v5703_v50 }
 0x9c8   :  { %5652 = vmatpush1.bf16.msra.mxu1 %v7515_v57  ;;  %v2483_v57 = vld [vmem:[#allocation9 + $0x58] sm:$0xff] }
 0x9c9   :  { %5654 = vmatprep.subr.bf16.mxu1 %v7518_v58  ;;  %v2487_v58 = vld [vmem:[#allocation9 + $0x78] sm:$0xff] }
 0x9cc   :  { %5656 = vmatpush1.bf16.msra.mxu1 %v7533_v2  ;;  %v5705_v2 = vpack.c.bf16 %v2487_v58, %v2483_v57 }
 0x9cd   :  { %5658 = vmatprep.subr.bf16.mxu1 %v7536_v5  ;;  %v2482_v5 = vld [vmem:[#allocation9 + $0x50] sm:$0xff] }
 0x9ce   :  { %5706 = vmatprep.subr.bf16.mxu0 %v5705_v2 }
 0x9d0   :  { %5660 = vmatpush1.bf16.msra.mxu1 %v7551_v13  ;;  %v2486_v13 = vld [vmem:[#allocation9 + $0x70] sm:$0xff] }
 0x9d1   :  { %5662 = vmatprep.subr.bf16.mxu1 %v7554_v12  ;;  %v5707_v12 = vpack.c.bf16 %v2486_v13, %v2482_v5 }
 0x9d3   :  { %5708 = vmatpush1.bf16.msra.mxu0 %v5707_v12 }
 0x9d4   :  { %5664 = vmatpush1.bf16.msra.mxu1 %v7569_v23  ;;  %v2491_v23 = vld [vmem:[#allocation9 + $0x98] sm:$0xff] }
 0x9d5   :  { %5666 = vmatprep.subr.bf16.mxu1 %v7572_v26  ;;  %v2495_v26 = vld [vmem:[#allocation9 + $0xb8] sm:$0xff] }
 0x9d8   :  { %5668 = vmatpush1.bf16.msra.mxu1 %v7581_v28  ;;  %v5709_v28 = vpack.c.bf16 %v2495_v26, %v2491_v23 }
 0x9da   :  { %5710 = vmatprep.subr.bf16.mxu0 %v5709_v28 }
 0x9db   :  { %2428 = vmatmul.mubr.f32.vlgmr.msra.gmra.mrb[30].mxu1 %v7925_v45  ;;  %5712 = vmatpush1.bf16.msra.mxu0 %v5711_v52 }
 0x9dc   :  { %5714 = vmatprep.subr.bf16.mxu0 %v5713_v62  ;;  %5079 = vmatprep.mubr.msk.f32.mxu1 %vm6936_vm11, %v6934_v1 }
 0x9df   :  { %5716 = vmatpush1.bf16.msra.mxu0 %v5715_v48 }
 0x9e0   :  { %5718 = vmatprep.subr.bf16.mxu0 %v5717_v55 }
 0x9e3   :  { %5720 = vmatpush1.bf16.msra.mxu0 %v5719_v3  ;;  %v2825_v3 = vld [vmem:[#allocation10 + $0x48] sm:$0xff] }
 0x9e4   :  { %5722 = vmatprep.subr.bf16.mxu0 %v5721_v19  ;;  %v2828_v19 = vld [vmem:[#allocation10 + $0x60] sm:$0xff] }
 0x9e5   :  { %v5739_v25 = vpack.c.bf16 %v2828_v19, %v2824_v10  ;;  %v2835_v10 = vld [vmem:[#allocation10 + $0x98] sm:$0xff] }
 0x9e6   :  { %v2839_v19 = vld [vmem:[#allocation10 + $0xb8] sm:$0xff] }
 0x9e7   :  { %5724 = vmatpush1.bf16.msra.mxu0 %v5723_v29  ;;  %v5741_v29 = vpack.c.bf16 %v2837_v24, %v2833_v20  ;;  %v5773_v24 = vpack.c.bf16 %v2839_v19, %v2835_v10 }
 0x9e8   :  { %5726 = vmatprep.subr.bf16.mxu0 %v5725_v30  ;;  %v2832_v30 = vld [vmem:[#allocation10 + $0x80] sm:$0xff] }
 0x9e9   :  { %v5743_v31 = vpack.c.bf16 %v2836_v18, %v2832_v30  ;;  %v2843_v30 = vld [vmem:[#allocation10 + $0xd8] sm:$0xff] }
 0x9ea   :  { %v2847_v18 = vld [vmem:[#allocation10 + $0xf8] sm:$0xff] }
 0x9eb   :  { %5728 = vmatpush1.bf16.msra.mxu0 %v5727_v0  ;;  %v5745_v0 = vpack.c.bf16 %v2845_v16, %v2841_v41  ;;  %v5777_v16 = vpack.c.bf16 %v2847_v18, %v2843_v30  ;;  %v3162_v18 = vld [vmem:[#allocation12 + $0xc0] sm:$0xff] }
 0x9ec   :  { %5730 = vmatprep.subr.bf16.mxu0 %v5729_v38  ;;  %v2840_v38 = vld [vmem:[#allocation10 + $0xc0] sm:$0xff] }
 0x9ed   :  { %v5747_v39 = vpack.c.bf16 %v2844_v56, %v2840_v38  ;;  %v2851_v38 = vld [vmem:[#allocation10 + $0x118] sm:$0xff] }
 0x9ee   :  { %v2855_v56 = vld [vmem:[#allocation10 + $0x138] sm:$0xff] }
 0x9ef   :  { %5732 = vmatpush1.bf16.msra.mxu0 %v5731_v35  ;;  %v2853_v35 = vld [vmem:[#allocation10 + $0x128] sm:$0xff] }
 0x9f0   :  { %5734 = vmatprep.subr.bf16.mxu0 %v5733_v47  ;;  %v5749_v40 = vpack.c.bf16 %v2853_v35, %v2849_v34  ;;  %v2848_v47 = vld [vmem:[#allocation10 + $0x100] sm:$0xff]  ;;  %v5781_v35 = vpack.c.bf16 %v2855_v56, %v2851_v38 }
 0x9f1   :  { %v3170_v38 = vld [vmem:[#allocation12 + $0x100] sm:$0xff] }
 0x9f2   :  { %v3174_v56 = vld [vmem:[#allocation12 + $0x120] sm:$0xff] }
 0xa8e   :  { %v2358_v50 = vpop.f32.mrb[14].mxu1 }
 0xa8f   :  { %v2360_v57 = vpop.f32.mrb[15].mxu1  ;;  %v6359_v2 = vadd.f32 %v2358_v50, %v7618_v21  ;;  %v2852_v50 = vld [vmem:[#allocation10 + $0x120] sm:$0xff] }
 0xa90   :  { %v6360_v58 = vadd.f32 %v2360_v57, %v7614_v14  ;;  %v2857_v57 = vld [vmem:[#allocation10 + $0x148] sm:$0xff] }
 0xa91   :  { %v4932_v13 = vmul.f32 -1.442695, %v6359_v2  ;;  %v5751_v2 = vpack.c.bf16 %v2852_v50, %v2848_v47  ;;  %v2859_v47 = vld [vmem:[#allocation10 + $0x158] sm:$0xff] }
 0xa92   :  { %v4933_v5 = vmul.f32 -1.442695, %v6360_v58  ;;  %v2861_v58 = vld [vmem:[#allocation10 + $0x168] sm:$0xff]  ;;  %v2863_v50 = vld [vmem:[#allocation10 + $0x178] sm:$0xff] }
 0xa94   :  { %6662 = vpow2.f32 %v4933_v5  ;;  %v5753_v5 = vpack.c.bf16 %v2861_v58, %v2857_v57  ;;  %v5785_v58 = vpack.c.bf16 %v2863_v50, %v2859_v47  ;;  %v3182_v47 = vld [vmem:[#allocation12 + $0x160] sm:$0xff]  ;;  %v3187_v50 = vld [vmem:[#allocation12 + $0x188] sm:$0xff] }
 0xa95   :  { %6664 = vpow2.f32 %v4932_v13  ;;  %v2856_v13 = vld [vmem:[#allocation10 + $0x140] sm:$0xff] }
 0xa9e   :  { %v6663_v12 = vpop.eup %6662 }
 0xa9f   :  { %v6665_v23 = vpop.eup %6664  ;;  %v2447_v26 = vadd.f32 1.0, %v6663_v12  ;;  %v2860_v12 = vld [vmem:[#allocation10 + $0x160] sm:$0xff] }
 0xaa0   :  { %v2441_v28 = vadd.f32 1.0, %v6665_v23  ;;  %v2865_v23 = vld [vmem:[#allocation10 + $0x188] sm:$0xff] }
 0xaa1   :  { %6666 = vrcp.f32 %v2447_v26  ;;  %v2869_v26 = vld [vmem:[#allocation10 + $0x1a8] sm:$0xff] }
 0xaa2   :  { %6668 = vrcp.f32 %v2441_v28  ;;  %v5755_v28 = vpack.c.bf16 %v2860_v12, %v2856_v13  ;;  %v2867_v13 = vld [vmem:[#allocation10 + $0x198] sm:$0xff] }
 0xaa3   :  { %v2871_v12 = vld [vmem:[#allocation10 + $0x1b8] sm:$0xff] }
 0xaab   :  { %v6667_v21 = vpop.eup %6666 }
 0xaac   :  { %v6669_v59 = vpop.eup %6668  ;;  %v2457_v7 = vmul.f32 %v6667_v21, %v7922_v33  ;;  %v5737_v33 = vpack.c.bf16 %v2829_v4, %v2825_v3 }
 0xaae   :  { %v2429_v46 = vpop.f32.mrb[30].mxu1 }
 0xaaf   :  { %v6375_v27 = vadd.f32 %v2429_v46, %v7626_v36  ;;  %v2431_v52 = vpop.f32.mrb[31].mxu1  ;;  %v5757_v46 = vpack.c.bf16 %v2869_v26, %v2865_v23  ;;  %v5789_v26 = vpack.c.bf16 %v2871_v12, %v2867_v13  ;;  %v3195_v13 = vld [vmem:[#allocation12 + $0x1c8] sm:$0xff] }
 0xab0   :  { %v6376_v53 = vadd.f32 %v2431_v52, %v7630_v17  ;;  %v2820_v17 = vld [vmem:[#allocation10 + $0x20] sm:$0xff]  ;;  %v3199_v12 = vld [vmem:[#allocation12 + $0x1e8] sm:$0xff] }
 0xab1   :  { %6670 = vtanh.f32 %v6375_v27  ;;  %v5735_v9 = vpack.c.bf16 %v2820_v17, %v2816_v61  ;;  %v2864_v27 = vld [vmem:[#allocation10 + $0x180] sm:$0xff]  ;;  %v2827_v61 = vld [vmem:[#allocation10 + $0x58] sm:$0xff] }
 0xab2   :  { %v4934_v14 = vmul.f32 -1.442695, %v6376_v53  ;;  %v2868_v52 = vld [vmem:[#allocation10 + $0x1a0] sm:$0xff]  ;;  %v2873_v53 = vld [vmem:[#allocation10 + $0x1c8] sm:$0xff]  ;;  %v2831_v17 = vld [vmem:[#allocation10 + $0x78] sm:$0xff] }
 0xab3   :  { %v5759_v21 = vpack.c.bf16 %v2868_v52, %v2864_v27  ;;  %v5769_v4 = vpack.c.bf16 %v2831_v17, %v2827_v61  ;;  %v2875_v27 = vld [vmem:[#allocation10 + $0x1d8] sm:$0xff] }
 0xab4   :  { %6672 = vpow2.f32 %v4934_v14  ;;  %v2877_v14 = vld [vmem:[#allocation10 + $0x1e8] sm:$0xff]  ;;  %v2879_v52 = vld [vmem:[#allocation10 + $0x1f8] sm:$0xff] }
 0xabb   :  { %v6671_v62 = vpop.eup %6670 }
 0xabc   :  { %v2458_v43 = vmul.f32 %v6671_v62, %v6669_v59  ;;  %v5761_v59 = vpack.c.bf16 %v2877_v14, %v2873_v53  ;;  %v2872_v62 = vld [vmem:[#allocation10 + $0x1c0] sm:$0xff]  ;;  %v5793_v14 = vpack.c.bf16 %v2879_v52, %v2875_v27  ;;  %v3145_v27 = vld [vmem:[#allocation12 + $0x38] sm:$0xff] }
 0xabe   :  { %v6673_v48 = vpop.eup %6672  ;;  %v2459_v49 = vadd.f32 %v2458_v43, %v2457_v7  ;;  %v2876_v7 = vld [vmem:[#allocation10 + $0x1e0] sm:$0xff]  ;;  %v2819_v43 = vld [vmem:[#allocation10 + $0x18] sm:$0xff] }
 0xabf   :  { %v2454_v54 = vadd.f32 1.0, %v6673_v48  ;;  %v2823_v48 = vld [vmem:[#allocation10 + $0x38] sm:$0xff] }
 0xac0   :  { %6674 = vtanh.f32 %v2459_v49  ;;  %v5763_v49 = vpack.c.bf16 %v2876_v7, %v2872_v62  ;;  %v3139_v62 = vld [vmem:[#allocation12 + $0x8] sm:$0xff] }
 0xac1   :  { %6676 = vrcp.f32 %v2454_v54  ;;  %v5765_v54 = vpack.c.bf16 %v2823_v48, %v2819_v43  ;;  %v3143_v7 = vld [vmem:[#allocation12 + $0x28] sm:$0xff] }
 0xac2   :  { %v7986_v48 = vpack.c.bf16 %v3143_v7, %v3139_v62  ;;  %v3148_v7 = vld [vmem:[#allocation12 + $0x50] sm:$0xff] }
 0xaca   :  { %v6675_v55 = vpop.eup %6674 }
 0xacb   :  { %v6677_v36 = vpop.eup %6676 }
 0xacc   :  { %v7952_v60 = vmul.f32 %v6677_v36, %v6675_v55  ;;  %v2818_v55 = vld [vmem:[#allocation10 + $0x10] sm:$0xff] }
 0xacd   :  { %v2822_v36 = vld [vmem:[#allocation10 + $0x30] sm:$0xff] }
 0xace   :  { %2665 = vmatmul.mubr.f32.gmra.mrb[22].mxu0 %v7952_v60  ;;  %v5767_v3 = vpack.c.bf16 %v2822_v36, %v2818_v55  ;;  %v3147_v55 = vld [vmem:[#allocation12 + $0x48] sm:$0xff] }
 0xacf   :  { %2735 = vmatprep.mubr.f32.mxu0 %v6934_v1  ;;  %v3151_v36 = vld [vmem:[#allocation12 + $0x68] sm:$0xff] }
 0xad0   :  { %v7993_v17 = vpack.c.bf16 %v3151_v36, %v3147_v55  ;;  %v3156_v36 = vld [vmem:[#allocation12 + $0x90] sm:$0xff] }
 0xad2   :  { %2736 = vmatmul.mubr.f32.vlgmr.msra.gmra.mrb[24].mxu0 %v7637_v22 }
 0xad3   :  { %5736 = vmatpush1.bf16.msra.mxu0 %v5735_v9  ;;  %2741 = vmatprep.mubr.f32.mxu0 %v6934_v1  ;;  %v2826_v9 = vld [vmem:[#allocation10 + $0x50] sm:$0xff] }
 0xad4   :  { %5738 = vmatprep.subr.bf16.mxu0 %v5737_v33  ;;  %v2830_v33 = vld [vmem:[#allocation10 + $0x70] sm:$0xff] }
 0xad5   :  { %v5771_v20 = vpack.c.bf16 %v2830_v33, %v2826_v9  ;;  %v3155_v9 = vld [vmem:[#allocation12 + $0x88] sm:$0xff] }
 0xad6   :  { %2742 = vmatmul.mubr.f32.gmra.mrb[26].mxu0 %v7685_v37  ;;  %v3159_v33 = vld [vmem:[#allocation12 + $0xa8] sm:$0xff] }
 0xad7   :  { %5740 = vmatpush1.bf16.msra.mxu0 %v5739_v25  ;;  %2747 = vmatprep.mubr.f32.mxu0 %v6934_v1  ;;  %v2834_v25 = vld [vmem:[#allocation10 + $0x90] sm:$0xff]  ;;  %v8001_v19 = vpack.c.bf16 %v3159_v33, %v3155_v9  ;;  %v3169_v9 = vld [vmem:[#allocation12 + $0xf8] sm:$0xff] }
 0xad8   :  { %5742 = vmatprep.subr.bf16.mxu0 %v5741_v29  ;;  %v2838_v29 = vld [vmem:[#allocation10 + $0xb0] sm:$0xff] }
 0xad9   :  { %v5775_v41 = vpack.c.bf16 %v2838_v29, %v2834_v25  ;;  %v3163_v25 = vld [vmem:[#allocation12 + $0xc8] sm:$0xff] }
 0xada   :  { %2748 = vmatmul.mubr.f32.gmra.mrb[28].mxu0 %v7733_v51  ;;  %v3167_v29 = vld [vmem:[#allocation12 + $0xe8] sm:$0xff] }
 0xadb   :  { %5744 = vmatpush1.bf16.msra.mxu0 %v5743_v31  ;;  %2753 = vmatprep.mubr.f32.mxu0 %v6934_v1  ;;  %v2842_v31 = vld [vmem:[#allocation10 + $0xd0] sm:$0xff]  ;;  %v8009_v30 = vpack.c.bf16 %v3167_v29, %v3163_v25  ;;  %v3173_v29 = vld [vmem:[#allocation12 + $0x118] sm:$0xff] }
 0xadc   :  { %5746 = vmatprep.subr.bf16.mxu0 %v5745_v0  ;;  %v2846_v0 = vld [vmem:[#allocation10 + $0xf0] sm:$0xff] }
 0xadd   :  { %v5779_v34 = vpack.c.bf16 %v2846_v0, %v2842_v31  ;;  %v3175_v31 = vld [vmem:[#allocation12 + $0x128] sm:$0xff]  ;;  %v3168_v25 = vld [vmem:[#allocation12 + $0xf0] sm:$0xff] }
 0xade   :  { %2754 = vmatmul.mubr.f32.gmra.mrb[30].mxu0 %v7781_v11 }
 0xadf   :  { %5748 = vmatpush1.bf16.msra.mxu0 %v5747_v39  ;;  %2759 = vmatprep.mubr.f32.mxu0 %v6934_v1  ;;  %v2850_v39 = vld [vmem:[#allocation10 + $0x110] sm:$0xff] }
 0xae0   :  { %5750 = vmatprep.subr.bf16.mxu0 %v5749_v40  ;;  %v2854_v40 = vld [vmem:[#allocation10 + $0x130] sm:$0xff] }
 0xae1   :  { %v5783_v57 = vpack.c.bf16 %v2854_v40, %v2850_v39  ;;  %v3178_v40 = vld [vmem:[#allocation12 + $0x140] sm:$0xff] }
 0xae2   :  { %2760 = vmatmul.mubr.f32.gmra.mrb[32].mxu0 %v7829_v44 }
 0xae3   :  { %5752 = vmatpush1.bf16.msra.mxu0 %v5751_v2  ;;  %2765 = vmatprep.mubr.f32.mxu0 %v6934_v1  ;;  %v2858_v2 = vld [vmem:[#allocation10 + $0x150] sm:$0xff] }
 0xae4   :  { %5754 = vmatprep.subr.bf16.mxu0 %v5753_v5  ;;  %v2862_v5 = vld [vmem:[#allocation10 + $0x170] sm:$0xff] }
 0xae5   :  { %v5787_v23 = vpack.c.bf16 %v2862_v5, %v2858_v2  ;;  %v3186_v2 = vld [vmem:[#allocation12 + $0x180] sm:$0xff] }
 0xae6   :  { %2766 = vmatmul.mubr.f32.gmra.mrb[34].mxu0 %v7877_v42  ;;  %v3190_v5 = vld [vmem:[#allocation12 + $0x1a0] sm:$0xff] }
 0xae7   :  { %5756 = vmatpush1.bf16.msra.mxu0 %v5755_v28  ;;  %2771 = vmatprep.mubr.f32.mxu0 %v6934_v1  ;;  %v2866_v28 = vld [vmem:[#allocation10 + $0x190] sm:$0xff] }
 0xae8   :  { %5758 = vmatprep.subr.bf16.mxu0 %v5757_v46  ;;  %v2870_v46 = vld [vmem:[#allocation10 + $0x1b0] sm:$0xff] }
 0xae9   :  { %v5791_v53 = vpack.c.bf16 %v2870_v46, %v2866_v28  ;;  %v3198_v28 = vld [vmem:[#allocation12 + $0x1e0] sm:$0xff]  ;;  %v3141_v46 = vld [vmem:[#allocation12 + $0x18] sm:$0xff] }
 0xaea   :  { %2772 = vmatmul.mubr.f32.gmra.mrb[36].mxu0 %v7925_v45  ;;  %v8049_v52 = vpack.c.bf16 %v3145_v27, %v3141_v46  ;;  %v3201_v46 = vld [vmem:[#allocation12 + $0x1f8] sm:$0xff] }
 0xaeb   :  { %5760 = vmatpush1.bf16.msra.mxu0 %v5759_v21  ;;  %2777 = vmatprep.mubr.f32.mxu0 %v6934_v1  ;;  %v2874_v21 = vld [vmem:[#allocation10 + $0x1d0] sm:$0xff] }
 0xaec   :  { %5762 = vmatprep.subr.bf16.mxu0 %v5761_v59  ;;  %v2878_v59 = vld [vmem:[#allocation10 + $0x1f0] sm:$0xff] }
 0xaed   :  { %v5795_v43 = vpack.c.bf16 %v2878_v59, %v2874_v21  ;;  %v3149_v21 = vld [vmem:[#allocation12 + $0x58] sm:$0xff] }
 0xaee   :  { %2778 = vmatmul.mubr.f32.gmra.mrb[38].mxu0 %v7952_v60  ;;  %v3153_v59 = vld [vmem:[#allocation12 + $0x78] sm:$0xff] }
 0xaef   :  { %5764 = vmatpush1.bf16.msra.mxu0 %v5763_v49  ;;  %2944 = vmatprep.mubr.f32.mxu0 %v6934_v1  ;;  %v3138_v49 = vld [vmem:[#allocation12] sm:$0xff]  ;;  %v8057_v62 = vpack.c.bf16 %v3153_v59, %v3149_v21  ;;  %v3200_v21 = vld [vmem:[#allocation12 + $0x1f0] sm:$0xff] }
 0xaf0   :  { %5766 = vmatprep.subr.bf16.mxu0 %v5765_v54  ;;  %v3142_v54 = vld [vmem:[#allocation12 + $0x20] sm:$0xff] }
 0xaf1   :  { %v7990_v61 = vpack.c.bf16 %v3142_v54, %v3138_v49  ;;  %v3157_v49 = vld [vmem:[#allocation12 + $0x98] sm:$0xff] }
 0xaf2   :  { %2945 = vmatmul.mubr.f32.vlgmr.msra.gmra.mrb[22].mxu0 %v7637_v22  ;;  %v3161_v54 = vld [vmem:[#allocation12 + $0xb8] sm:$0xff] }
 0xaf3   :  { %5768 = vmatpush1.bf16.msra.mxu0 %v5767_v3  ;;  %2950 = vmatprep.mubr.f32.mxu0 %v6934_v1  ;;  %v3146_v3 = vld [vmem:[#allocation12 + $0x40] sm:$0xff] }
 0xaf4   :  { %5770 = vmatprep.subr.bf16.mxu0 %v5769_v4  ;;  %v3150_v4 = vld [vmem:[#allocation12 + $0x60] sm:$0xff] }
 0xaf5   :  { %v7998_v10 = vpack.c.bf16 %v3150_v4, %v3146_v3  ;;  %v3160_v3 = vld [vmem:[#allocation12 + $0xb0] sm:$0xff]  ;;  %v3165_v4 = vld [vmem:[#allocation12 + $0xd8] sm:$0xff] }
 0xaf6   :  { %2951 = vmatmul.mubr.f32.gmra.mrb[20].mxu0 %v7685_v37  ;;  %v8068_v33 = vpack.c.bf16 %v3160_v3, %v3156_v36 }
 0xaf7   :  { %5772 = vmatpush1.bf16.msra.mxu0 %v5771_v20  ;;  %2956 = vmatprep.mubr.f32.mxu0 %v6934_v1  ;;  %v3154_v20 = vld [vmem:[#allocation12 + $0x80] sm:$0xff] }
 0xaf8   :  { %5774 = vmatprep.subr.bf16.mxu0 %v5773_v24  ;;  %v3158_v24 = vld [vmem:[#allocation12 + $0xa0] sm:$0xff] }
 0xafa   :  { %2957 = vmatmul.mubr.f32.gmra.mrb[18].mxu0 %v7733_v51 }
 0xafb   :  { %5776 = vmatpush1.bf16.msra.mxu0 %v5775_v41  ;;  %2962 = vmatprep.mubr.f32.mxu0 %v6934_v1  ;;  %v3166_v41 = vld [vmem:[#allocation12 + $0xe0] sm:$0xff] }
 0xafc   :  { %5778 = vmatprep.subr.bf16.mxu0 %v5777_v16  ;;  %v3171_v16 = vld [vmem:[#allocation12 + $0x108] sm:$0xff] }
 0xafd   :  { %v8017_v0 = vpack.c.bf16 %v3175_v31, %v3171_v16  ;;  %v3172_v31 = vld [vmem:[#allocation12 + $0x110] sm:$0xff] }
 0xafe   :  { %2963 = vmatmul.mubr.f32.gmra.mrb[16].mxu0 %v7781_v11 }
 0xaff   :  { %5780 = vmatpush1.bf16.msra.mxu0 %v5779_v34  ;;  %2968 = vmatprep.mubr.f32.mxu0 %v6934_v1  ;;  %v3179_v34 = vld [vmem:[#allocation12 + $0x148] sm:$0xff] }
 0xb00   :  { %5782 = vmatprep.subr.bf16.mxu0 %v5781_v35  ;;  %v3183_v35 = vld [vmem:[#allocation12 + $0x168] sm:$0xff] }
 0xb01   :  { %v8025_v39 = vpack.c.bf16 %v3183_v35, %v3179_v34  ;;  %v3185_v34 = vld [vmem:[#allocation12 + $0x178] sm:$0xff] }
 0xb02   :  { %2969 = vmatmul.mubr.f32.gmra.mrb[14].mxu0 %v7829_v44 }
 0xb03   :  { %5784 = vmatpush1.bf16.msra.mxu0 %v5783_v57  ;;  %2974 = vmatprep.mubr.f32.mxu0 %v6934_v1  ;;  %v3191_v57 = vld [vmem:[#allocation12 + $0x1a8] sm:$0xff] }
 0xb04   :  { %5786 = vmatprep.subr.bf16.mxu0 %v5785_v58  ;;  %v8033_v58 = vpack.c.bf16 %v3191_v57, %v3187_v50  ;;  %v3184_v50 = vld [vmem:[#allocation12 + $0x170] sm:$0xff]  ;;  %v3189_v57 = vld [vmem:[#allocation12 + $0x198] sm:$0xff] }
 0xb06   :  { %2975 = vmatmul.mubr.f32.gmra.mrb[12].mxu0 %v7877_v42 }
 0xb07   :  { %5788 = vmatpush1.bf16.msra.mxu0 %v5787_v23  ;;  %2980 = vmatprep.mubr.f32.mxu0 %v6934_v1  ;;  %v8041_v23 = vpack.c.bf16 %v3199_v12, %v3195_v13  ;;  %v3188_v12 = vld [vmem:[#allocation12 + $0x190] sm:$0xff] }
 0xb08   :  { %5790 = vmatprep.subr.bf16.mxu0 %v5789_v26  ;;  %v3194_v26 = vld [vmem:[#allocation12 + $0x1c0] sm:$0xff] }
 0xb0a   :  { %2981 = vmatmul.mubr.f32.gmra.mrb[10].mxu0 %v7925_v45 }
 0xb0b   :  { %5792 = vmatpush1.bf16.msra.mxu0 %v5791_v53  ;;  %2986 = vmatprep.mubr.f32.mxu0 %v6934_v1  ;;  %v3140_v53 = vld [vmem:[#allocation12 + $0x10] sm:$0xff] }
 0xb0c   :  { %5794 = vmatprep.subr.bf16.mxu0 %v5793_v14  ;;  %v3144_v14 = vld [vmem:[#allocation12 + $0x30] sm:$0xff] }
 0xb0e   :  { %2987 = vmatmul.mubr.f32.gmra.mrb[8].mxu0 %v7952_v60 }
 0xb0f   :  { %5796 = vmatpush1.bf16.msra.mxu0 %v5795_v43  ;;  %3057 = vmatprep.mubr.f32.mxu0 %v6934_v1  ;;  %v3152_v43 = vld [vmem:[#allocation12 + $0x70] sm:$0xff] }
 0xb10   :  { %5798 = vmatprep.subr.bf16.mxu0 %v7986_v48  ;;  %v8061_v55 = vpack.c.bf16 %v3152_v43, %v3148_v7  ;;  %v2536_v43 = vld [vmem:[%s8528_s8] sm:$0xf] }
 0xb11   :  { %v8130_v36 = vrot.slane %v2536_v43, %v340_v8  ;;  %v8140_v8 = vrot.slane %v2536_v43, %v352_v32 }
 0xb12   :  { %3058 = vmatmul.mubr.f32.vlgmr.msra.gmra.mrb[38].mxu0 %v7637_v22  ;;  %v8006_v22 = vpack.c.bf16 %v3158_v24, %v3154_v20  ;;  %v8071_v20 = vpack.c.bf16 %v3169_v9, %v3165_v4  ;;  %v3164_v24 = vld [vmem:[#allocation12 + $0xd0] sm:$0xff] }
 0xb13   :  { %5800 = vmatpush1.bf16.msra.mxu0 %v7990_v61  ;;  %3063 = vmatprep.mubr.f32.mxu0 %v6934_v1 }
 0xb14   :  { %5802 = vmatprep.subr.bf16.mxu0 %v7993_v17 }
 0xb16   :  { %3064 = vmatmul.mubr.f32.gmra.mrb[36].mxu0 %v7685_v37  ;;  %v8014_v37 = vpack.c.bf16 %v3166_v41, %v3162_v18  ;;  %v3177_v18 = vld [vmem:[#allocation12 + $0x138] sm:$0xff]  ;;  %v8074_v41 = vpack.c.bf16 %v3168_v25, %v3164_v24 }
 0xb17   :  { %5804 = vmatpush1.bf16.msra.mxu0 %v7998_v10  ;;  %3069 = vmatprep.mubr.f32.mxu0 %v6934_v1  ;;  %v8077_v16 = vpack.c.bf16 %v3177_v18, %v3173_v29 }
 0xb18   :  { %5806 = vmatprep.subr.bf16.mxu0 %v8001_v19 }
 0xb1a   :  { %3070 = vmatmul.mubr.f32.gmra.mrb[34].mxu0 %v7733_v51  ;;  %v8022_v51 = vpack.c.bf16 %v3174_v56, %v3170_v38  ;;  %v3176_v38 = vld [vmem:[#allocation12 + $0x130] sm:$0xff]  ;;  %v3181_v56 = vld [vmem:[#allocation12 + $0x158] sm:$0xff] }
 0xb1b   :  { %5808 = vmatpush1.bf16.msra.mxu0 %v8006_v22  ;;  %3075 = vmatprep.mubr.f32.mxu0 %v6934_v1  ;;  %v8080_v35 = vpack.c.bf16 %v3176_v38, %v3172_v31  ;;  %v8136_v31 = vrot.slane %v2536_v43, %v348_v15 }
 0xb1c   :  { %5810 = vmatprep.subr.bf16.mxu0 %v8009_v30 }
 0xb1e   :  { %3076 = vmatmul.mubr.f32.gmra.mrb[32].mxu0 %v7781_v11  ;;  %v8030_v11 = vpack.c.bf16 %v3182_v47, %v3178_v40  ;;  %v8083_v40 = vpack.c.bf16 %v3185_v34, %v3181_v56  ;;  %v3180_v47 = vld [vmem:[#allocation12 + $0x150] sm:$0xff] }
 0xb1f   :  { %5812 = vmatpush1.bf16.msra.mxu0 %v8014_v37  ;;  %3081 = vmatprep.mubr.f32.mxu0 %v6934_v1 }
 0xb20   :  { %5814 = vmatprep.subr.bf16.mxu0 %v8017_v0 }
 0xb22   :  { %3082 = vmatmul.mubr.f32.gmra.mrb[30].mxu0 %v7829_v44  ;;  %v8038_v44 = vpack.c.bf16 %v3190_v5, %v3186_v2  ;;  %v3193_v2 = vld [vmem:[#allocation12 + $0x1b8] sm:$0xff]  ;;  %v8086_v5 = vpack.c.bf16 %v3184_v50, %v3180_v47 }
 0xb23   :  { %5816 = vmatpush1.bf16.msra.mxu0 %v8022_v51  ;;  %3087 = vmatprep.mubr.f32.mxu0 %v6934_v1  ;;  %v8089_v13 = vpack.c.bf16 %v3193_v2, %v3189_v57 }
 0xb24   :  { %5818 = vmatprep.subr.bf16.mxu0 %v8025_v39 }
 0xb26   :  { %3088 = vmatmul.mubr.f32.gmra.mrb[28].mxu0 %v7877_v42  ;;  %v8046_v42 = vpack.c.bf16 %v3198_v28, %v3194_v26  ;;  %v3192_v26 = vld [vmem:[#allocation12 + $0x1b0] sm:$0xff]  ;;  %v3197_v28 = vld [vmem:[#allocation12 + $0x1d8] sm:$0xff] }
 0xb27   :  { %5820 = vmatpush1.bf16.msra.mxu0 %v8030_v11  ;;  %3093 = vmatprep.mubr.f32.mxu0 %v6934_v1  ;;  %v8092_v27 = vpack.c.bf16 %v3192_v26, %v3188_v12 }
 0xb28   :  { %5822 = vmatprep.subr.bf16.mxu0 %v8033_v58 }
 0xb2a   :  { %3094 = vmatmul.mubr.f32.gmra.mrb[26].mxu0 %v7925_v45  ;;  %v8054_v45 = vpack.c.bf16 %v3144_v14, %v3140_v53  ;;  %v8095_v53 = vpack.c.bf16 %v3201_v46, %v3197_v28  ;;  %v3196_v14 = vld [vmem:[#allocation12 + $0x1d0] sm:$0xff] }
 0xb2b   :  { %5824 = vmatpush1.bf16.msra.mxu0 %v8038_v44  ;;  %3099 = vmatprep.mubr.f32.mxu0 %v6934_v1  ;;  %v8098_v59 = vpack.c.bf16 %v3200_v21, %v3196_v14 }
 0xb2c   :  { %5826 = vmatprep.subr.bf16.mxu0 %v8041_v23 }
 0xb2e   :  { %3100 = vmatmul.mubr.f32.gmra.mrb[24].mxu0 %v7952_v60  ;;  %v8065_v60 = vpack.c.bf16 %v3161_v54, %v3157_v49  ;;  %v8126_v54 = vrot.slane %v2536_v43, %v344_v6 }
 0xb2f   :  { %5828 = vmatpush1.bf16.msra.mxu0 %v8046_v42  ;;  %3278 = vmatprep.mubr.f32.mxu0 %v6934_v1 }
 0xb30   :  { %5830 = vmatprep.subr.bf16.mxu0 %v8049_v52 }
 0xb32   :  { %3279 = vmatmul.mubr.f32.vlgmr.msra.gmra.mrb[8].mxu0 %v6934_v1 }
 0xb33   :  { %5832 = vmatpush1.bf16.msra.mxu0 %v8054_v45  ;;  %3349 = vmatprep.mubr.f32.mxu0 %v6934_v1 }
 0xb34   :  { %5834 = vmatprep.subr.bf16.mxu0 %v8057_v62 }
 0xb37   :  { %5836 = vmatpush1.bf16.msra.mxu0 %v8061_v55 }
 0xb38   :  { %5838 = vmatprep.subr.bf16.mxu0 %v8065_v60 }
 0xb3b   :  { %5840 = vmatpush1.bf16.msra.mxu0 %v8068_v33 }
 0xb3c   :  { %5842 = vmatprep.subr.bf16.mxu0 %v8071_v20 }
 0xb3f   :  { %5844 = vmatpush1.bf16.msra.mxu0 %v8074_v41 }
 0xb40   :  { %5846 = vmatprep.subr.bf16.mxu0 %v8077_v16 }
 0xb43   :  { %5848 = vmatpush1.bf16.msra.mxu0 %v8080_v35 }
 0xb44   :  { %5850 = vmatprep.subr.bf16.mxu0 %v8083_v40 }
 0xb47   :  { %5852 = vmatpush1.bf16.msra.mxu0 %v8086_v5 }
 0xb48   :  { %5854 = vmatprep.subr.bf16.mxu0 %v8089_v13 }
 0xb4b   :  { %5856 = vmatpush1.bf16.msra.mxu0 %v8092_v27 }
 0xb4c   :  { %5858 = vmatprep.subr.bf16.mxu0 %v8095_v53 }
 0xb4f   :  { %5860 = vmatpush1.bf16.msra.mxu0 %v8098_v59 }
 0xb50   :  { %5862 = vmatprep.subr.bf16.mxu0 %v7986_v48 }
 0xb52   :  { %3350 = vmatmul.mubr.f32.vlgmr.msra.gmra.mrb[24].mxu0 %v6934_v1 }
 0xb53   :  { %5864 = vmatpush1.bf16.msra.mxu0 %v7990_v61  ;;  %3460 = vmatprep.mubr.f32.mxu0 %v6934_v1 }
 0xb54   :  { %5866 = vmatprep.subr.bf16.mxu0 %v7993_v17 }
 0xb57   :  { %5868 = vmatpush1.bf16.msra.mxu0 %v7998_v10 }
 0xb58   :  { %5870 = vmatprep.subr.bf16.mxu0 %v8001_v19 }
 0xb5b   :  { %5872 = vmatpush1.bf16.msra.mxu0 %v8006_v22 }
 0xb5c   :  { %5874 = vmatprep.subr.bf16.mxu0 %v8009_v30 }
 0xb5f   :  { %5876 = vmatpush1.bf16.msra.mxu0 %v8014_v37 }
 0xb60   :  { %5878 = vmatprep.subr.bf16.mxu0 %v8017_v0 }
 0xb63   :  { %5880 = vmatpush1.bf16.msra.mxu0 %v8022_v51 }
 0xb64   :  { %5882 = vmatprep.subr.bf16.mxu0 %v8025_v39 }
 0xb67   :  { %5884 = vmatpush1.bf16.msra.mxu0 %v8030_v11 }
 0xb68   :  { %5886 = vmatprep.subr.bf16.mxu0 %v8033_v58 }
 0xb6b   :  { %5888 = vmatpush1.bf16.msra.mxu0 %v8038_v44 }
 0xb6c   :  { %5890 = vmatprep.subr.bf16.mxu0 %v8041_v23 }
 0xb6f   :  { %5892 = vmatpush1.bf16.msra.mxu0 %v8046_v42 }
 0xb70   :  { %5894 = vmatprep.subr.bf16.mxu0 %v8049_v52 }
 0xc05   :  { %v3280_v7 = vpop.f32.mrb[8].mxu0 }
 0xc06   :  { %v3282_v49 = vpop.f32.mrb[9].mxu0  ;;  %v6377_v4 = vadd.f32 %v3280_v7, %v8130_v36 }
 0xc07   :  { %v6378_v3 = vadd.f32 %v3282_v49, %v8126_v54 }
 0xc08   :  { %v4935_v24 = vmul.f32 -1.442695, %v6377_v4 }
 0xc09   :  { %v4936_v9 = vmul.f32 -1.442695, %v6378_v3 }
 0xc0b   :  { %6678 = vpow2.f32 %v4936_v9 }
 0xc0c   :  { %6680 = vpow2.f32 %v4935_v24 }
 0xc15   :  { %v6679_v25 = vpop.eup %6678 }
 0xc16   :  { %v6681_v29 = vpop.eup %6680  ;;  %v3369_v18 = vadd.f32 1.0, %v6679_v25 }
 0xc17   :  { %v3363_v6 = vadd.f32 1.0, %v6681_v29 }
 0xc18   :  { %6682 = vrcp.f32 %v3369_v18 }
 0xc19   :  { %6684 = vrcp.f32 %v3363_v6 }
 0xc22   :  { %v6683_v57 = vpop.eup %6682 }
 0xc23   :  { %v6685_v2 = vpop.eup %6684  ;;  %v3379_v12 = vmul.f32 0.0, %v6683_v57 }
 0xc25   :  { %v3351_v38 = vpop.f32.mrb[24].mxu0 }
 0xc26   :  { %v6393_v56 = vadd.f32 %v3351_v38, %v8136_v31  ;;  %v3353_v34 = vpop.f32.mrb[25].mxu0 }
 0xc27   :  { %v6394_v47 = vadd.f32 %v3353_v34, %v8140_v8 }
 0xc28   :  { %6686 = vtanh.f32 %v6393_v56 }
 0xc29   :  { %v4937_v50 = vmul.f32 -1.442695, %v6394_v47 }
 0xc2b   :  { %6688 = vpow2.f32 %v4937_v50 }
 0xc32   :  { %v6687_v15 = vpop.eup %6686 }
 0xc33   :  { %v3380_v26 = vmul.f32 %v6687_v15, %v6685_v2 }
 0xc35   :  { %v6689_v28 = vpop.eup %6688  ;;  %v8144_v63 = vadd.f32 %v3380_v26, %v3379_v12 }
 0xc36   :  { %v3376_v32 = vadd.f32 1.0, %v6689_v28 }
 0xc37   :  { %6690 = vtanh.f32 %v8144_v63 }
 0xc38   :  { %6692 = vrcp.f32 %v3376_v32 }
 0xc41   :  { %v6691_v46 = vpop.eup %6690 }
 0xc42   :  { %v6693_v14 = vpop.eup %6692 }
 0xc43   :  { %v3383_v21 = vmul.f32 %v6693_v14, %v6691_v46 }
 0xc45   :  { %3461 = vmatmul.mubr.f32.vlgmr.msra.gmra.mrb[10].mxu0 %v3383_v21 }
 0xc46   :  { %5896 = vmatpush1.bf16.msra.mxu0 %v8054_v45  ;;  %3531 = vmatprep.mubr.f32.mxu0 %v6934_v1 }
 0xc47   :  { %5898 = vmatprep.subr.bf16.mxu0 %v8057_v62 }
 0xc4a   :  { %5900 = vmatpush1.bf16.msra.mxu0 %v8061_v55 }
 0xc4b   :  { %5902 = vmatprep.subr.bf16.mxu0 %v8065_v60 }
 0xc4e   :  { %5904 = vmatpush1.bf16.msra.mxu0 %v8068_v33 }
 0xc4f   :  { %5906 = vmatprep.subr.bf16.mxu0 %v8071_v20 }
 0xc52   :  { %5908 = vmatpush1.bf16.msra.mxu0 %v8074_v41 }
 0xc53   :  { %5910 = vmatprep.subr.bf16.mxu0 %v8077_v16 }
 0xc56   :  { %5912 = vmatpush1.bf16.msra.mxu0 %v8080_v35 }
 0xc57   :  { %5914 = vmatprep.subr.bf16.mxu0 %v8083_v40 }
 0xc5a   :  { %5916 = vmatpush1.bf16.msra.mxu0 %v8086_v5 }
 0xc5b   :  { %5918 = vmatprep.subr.bf16.mxu0 %v8089_v13 }
 0xc5e   :  { %5920 = vmatpush1.bf16.msra.mxu0 %v8092_v27 }
 0xc5f   :  { %5922 = vmatprep.subr.bf16.mxu0 %v8095_v53 }
 0xc62   :  { %5924 = vmatpush1.bf16.msra.mxu0 %v8098_v59 }
 0xc63   :  { %5926 = vmatprep.subr.bf16.mxu0 %v7986_v48 }
 0xc65   :  { %3532 = vmatmul.mubr.f32.vlgmr.msra.gmra.mrb[26].mxu0 %v3383_v21 }
 0xc66   :  { %5928 = vmatpush1.bf16.msra.mxu0 %v7990_v61  ;;  %3642 = vmatprep.mubr.f32.mxu0 %v6934_v1 }
 0xc67   :  { %5930 = vmatprep.subr.bf16.mxu0 %v7993_v17 }
 0xc6a   :  { %5932 = vmatpush1.bf16.msra.mxu0 %v7998_v10 }
 0xc6b   :  { %5934 = vmatprep.subr.bf16.mxu0 %v8001_v19 }
 0xc6e   :  { %5936 = vmatpush1.bf16.msra.mxu0 %v8006_v22 }
 0xc6f   :  { %5938 = vmatprep.subr.bf16.mxu0 %v8009_v30 }
 0xc72   :  { %5940 = vmatpush1.bf16.msra.mxu0 %v8014_v37 }
 0xc73   :  { %5942 = vmatprep.subr.bf16.mxu0 %v8017_v0 }
 0xc76   :  { %5944 = vmatpush1.bf16.msra.mxu0 %v8022_v51 }
 0xc77   :  { %5946 = vmatprep.subr.bf16.mxu0 %v8025_v39 }
 0xc7a   :  { %5948 = vmatpush1.bf16.msra.mxu0 %v8030_v11 }
 0xc7b   :  { %5950 = vmatprep.subr.bf16.mxu0 %v8033_v58 }
 0xc7e   :  { %5952 = vmatpush1.bf16.msra.mxu0 %v8038_v44 }
 0xc7f   :  { %5954 = vmatprep.subr.bf16.mxu0 %v8041_v23 }
 0xc82   :  { %5956 = vmatpush1.bf16.msra.mxu0 %v8046_v42 }
 0xc83   :  { %5958 = vmatprep.subr.bf16.mxu0 %v8049_v52 }
 0xd18   :  { %v3462_v7 = vpop.f32.mrb[10].mxu0 }
 0xd19   :  { %v3464_v43 = vpop.f32.mrb[11].mxu0  ;;  %v6379_v3 = vadd.f32 %v3462_v7, %v8130_v36 }
 0xd1a   :  { %v6380_v49 = vadd.f32 %v3464_v43, %v8126_v54 }
 0xd1b   :  { %v4938_v9 = vmul.f32 -1.442695, %v6379_v3 }
 0xd1c   :  { %v4939_v4 = vmul.f32 -1.442695, %v6380_v49 }
 0xd1e   :  { %6694 = vpow2.f32 %v4939_v4 }
 0xd1f   :  { %6696 = vpow2.f32 %v4938_v9 }
 0xd28   :  { %v6695_v24 = vpop.eup %6694 }
 0xd29   :  { %v6697_v25 = vpop.eup %6696  ;;  %v3551_v29 = vadd.f32 1.0, %v6695_v24 }
 0xd2a   :  { %v3545_v18 = vadd.f32 1.0, %v6697_v25 }
 0xd2b   :  { %6698 = vrcp.f32 %v3551_v29 }
 0xd2c   :  { %6700 = vrcp.f32 %v3545_v18 }
 0xd35   :  { %v6699_v50 = vpop.eup %6698 }
 0xd36   :  { %v6701_v57 = vpop.eup %6700  ;;  %v3561_v15 = vmul.f32 %v6699_v50, %v8144_v63 }
 0xd38   :  { %v3533_v6 = vpop.f32.mrb[26].mxu0 }
 0xd39   :  { %v6395_v38 = vadd.f32 %v3533_v6, %v8136_v31  ;;  %v3535_v56 = vpop.f32.mrb[27].mxu0 }
 0xd3a   :  { %v6396_v34 = vadd.f32 %v3535_v56, %v8140_v8 }
 0xd3b   :  { %6702 = vtanh.f32 %v6395_v38 }
 0xd3c   :  { %v4940_v47 = vmul.f32 -1.442695, %v6396_v34 }
 0xd3e   :  { %6704 = vpow2.f32 %v4940_v47 }
 0xd45   :  { %v6703_v2 = vpop.eup %6702 }
 0xd46   :  { %v3562_v12 = vmul.f32 %v6703_v2, %v6701_v57 }
 0xd48   :  { %v6705_v26 = vpop.eup %6704  ;;  %v8186_v28 = vadd.f32 %v3562_v12, %v3561_v15 }
 0xd49   :  { %v3558_v32 = vadd.f32 1.0, %v6705_v26 }
 0xd4a   :  { %6706 = vtanh.f32 %v8186_v28 }
 0xd4b   :  { %6708 = vrcp.f32 %v3558_v32 }
 0xd54   :  { %v6707_v46 = vpop.eup %6706 }
 0xd55   :  { %v6709_v14 = vpop.eup %6708 }
 0xd56   :  { %v3565_v21 = vmul.f32 %v6709_v14, %v6707_v46 }
 0xd58   :  { %3643 = vmatmul.mubr.f32.vlgmr.msra.gmra.mrb[12].mxu0 %v3565_v21 }
 0xd59   :  { %5960 = vmatpush1.bf16.msra.mxu0 %v8054_v45  ;;  %3713 = vmatprep.mubr.f32.mxu0 %v6934_v1 }
 0xd5a   :  { %5962 = vmatprep.subr.bf16.mxu0 %v8057_v62 }
 0xd5d   :  { %5964 = vmatpush1.bf16.msra.mxu0 %v8061_v55 }
 0xd5e   :  { %5966 = vmatprep.subr.bf16.mxu0 %v8065_v60 }
 0xd61   :  { %5968 = vmatpush1.bf16.msra.mxu0 %v8068_v33 }
 0xd62   :  { %5970 = vmatprep.subr.bf16.mxu0 %v8071_v20 }
 0xd65   :  { %5972 = vmatpush1.bf16.msra.mxu0 %v8074_v41 }
 0xd66   :  { %5974 = vmatprep.subr.bf16.mxu0 %v8077_v16 }
 0xd69   :  { %5976 = vmatpush1.bf16.msra.mxu0 %v8080_v35 }
 0xd6a   :  { %5978 = vmatprep.subr.bf16.mxu0 %v8083_v40 }
 0xd6d   :  { %5980 = vmatpush1.bf16.msra.mxu0 %v8086_v5 }
 0xd6e   :  { %5982 = vmatprep.subr.bf16.mxu0 %v8089_v13 }
 0xd71   :  { %5984 = vmatpush1.bf16.msra.mxu0 %v8092_v27 }
 0xd72   :  { %5986 = vmatprep.subr.bf16.mxu0 %v8095_v53 }
 0xd75   :  { %5988 = vmatpush1.bf16.msra.mxu0 %v8098_v59 }
 0xd76   :  { %5990 = vmatprep.subr.bf16.mxu0 %v7986_v48 }
 0xd78   :  { %3714 = vmatmul.mubr.f32.vlgmr.msra.gmra.mrb[28].mxu0 %v3565_v21 }
 0xd79   :  { %5992 = vmatpush1.bf16.msra.mxu0 %v7990_v61  ;;  %3824 = vmatprep.mubr.f32.mxu0 %v6934_v1 }
 0xd7a   :  { %5994 = vmatprep.subr.bf16.mxu0 %v7993_v17 }
 0xd7d   :  { %5996 = vmatpush1.bf16.msra.mxu0 %v7998_v10 }
 0xd7e   :  { %5998 = vmatprep.subr.bf16.mxu0 %v8001_v19 }
 0xd81   :  { %6000 = vmatpush1.bf16.msra.mxu0 %v8006_v22 }
 0xd82   :  { %6002 = vmatprep.subr.bf16.mxu0 %v8009_v30 }
 0xd85   :  { %6004 = vmatpush1.bf16.msra.mxu0 %v8014_v37 }
 0xd86   :  { %6006 = vmatprep.subr.bf16.mxu0 %v8017_v0 }
 0xd89   :  { %6008 = vmatpush1.bf16.msra.mxu0 %v8022_v51 }
 0xd8a   :  { %6010 = vmatprep.subr.bf16.mxu0 %v8025_v39 }
 0xd8d   :  { %6012 = vmatpush1.bf16.msra.mxu0 %v8030_v11 }
 0xd8e   :  { %6014 = vmatprep.subr.bf16.mxu0 %v8033_v58 }
 0xd91   :  { %6016 = vmatpush1.bf16.msra.mxu0 %v8038_v44 }
 0xd92   :  { %6018 = vmatprep.subr.bf16.mxu0 %v8041_v23 }
 0xd95   :  { %6020 = vmatpush1.bf16.msra.mxu0 %v8046_v42 }
 0xd96   :  { %6022 = vmatprep.subr.bf16.mxu0 %v8049_v52 }
 0xe2b   :  { %v3644_v63 = vpop.f32.mrb[12].mxu0 }
 0xe2c   :  { %v3646_v7 = vpop.f32.mrb[13].mxu0  ;;  %v6381_v49 = vadd.f32 %v3644_v63, %v8130_v36 }
 0xe2d   :  { %v6382_v43 = vadd.f32 %v3646_v7, %v8126_v54 }
 0xe2e   :  { %v4941_v4 = vmul.f32 -1.442695, %v6381_v49 }
 0xe2f   :  { %v4942_v3 = vmul.f32 -1.442695, %v6382_v43 }
 0xe31   :  { %6710 = vpow2.f32 %v4942_v3 }
 0xe32   :  { %6712 = vpow2.f32 %v4941_v4 }
 0xe3b   :  { %v6711_v9 = vpop.eup %6710 }
 0xe3c   :  { %v6713_v24 = vpop.eup %6712  ;;  %v3733_v25 = vadd.f32 1.0, %v6711_v9 }
 0xe3d   :  { %v3727_v29 = vadd.f32 1.0, %v6713_v24 }
 0xe3e   :  { %6714 = vrcp.f32 %v3733_v25 }
 0xe3f   :  { %6716 = vrcp.f32 %v3727_v29 }
 0xe48   :  { %v6715_v47 = vpop.eup %6714 }
 0xe49   :  { %v6717_v50 = vpop.eup %6716  ;;  %v3743_v2 = vmul.f32 %v6715_v47, %v8186_v28 }
 0xe4b   :  { %v3715_v18 = vpop.f32.mrb[28].mxu0 }
 0xe4c   :  { %v6397_v6 = vadd.f32 %v3715_v18, %v8136_v31  ;;  %v3717_v38 = vpop.f32.mrb[29].mxu0 }
 0xe4d   :  { %v6398_v56 = vadd.f32 %v3717_v38, %v8140_v8 }
 0xe4e   :  { %6718 = vtanh.f32 %v6397_v6 }
 0xe4f   :  { %v4943_v34 = vmul.f32 -1.442695, %v6398_v56 }
 0xe51   :  { %6720 = vpow2.f32 %v4943_v34 }
 0xe58   :  { %v6719_v57 = vpop.eup %6718 }
 0xe59   :  { %v3744_v15 = vmul.f32 %v6719_v57, %v6717_v50 }
 0xe5b   :  { %v6721_v12 = vpop.eup %6720  ;;  %v8228_v26 = vadd.f32 %v3744_v15, %v3743_v2 }
 0xe5c   :  { %v3740_v32 = vadd.f32 1.0, %v6721_v12 }
 0xe5d   :  { %6722 = vtanh.f32 %v8228_v26 }
 0xe5e   :  { %6724 = vrcp.f32 %v3740_v32 }
 0xe67   :  { %v6723_v46 = vpop.eup %6722 }
 0xe68   :  { %v6725_v14 = vpop.eup %6724 }
 0xe69   :  { %v3747_v21 = vmul.f32 %v6725_v14, %v6723_v46 }
 0xe6b   :  { %3825 = vmatmul.mubr.f32.vlgmr.msra.gmra.mrb[14].mxu0 %v3747_v21 }
 0xe6c   :  { %6024 = vmatpush1.bf16.msra.mxu0 %v8054_v45  ;;  %3895 = vmatprep.mubr.f32.mxu0 %v6934_v1 }
 0xe6d   :  { %6026 = vmatprep.subr.bf16.mxu0 %v8057_v62 }
 0xe70   :  { %6028 = vmatpush1.bf16.msra.mxu0 %v8061_v55 }
 0xe71   :  { %6030 = vmatprep.subr.bf16.mxu0 %v8065_v60 }
 0xe74   :  { %6032 = vmatpush1.bf16.msra.mxu0 %v8068_v33 }
 0xe75   :  { %6034 = vmatprep.subr.bf16.mxu0 %v8071_v20 }
 0xe78   :  { %6036 = vmatpush1.bf16.msra.mxu0 %v8074_v41 }
 0xe79   :  { %6038 = vmatprep.subr.bf16.mxu0 %v8077_v16 }
 0xe7c   :  { %6040 = vmatpush1.bf16.msra.mxu0 %v8080_v35 }
 0xe7d   :  { %6042 = vmatprep.subr.bf16.mxu0 %v8083_v40 }
 0xe80   :  { %6044 = vmatpush1.bf16.msra.mxu0 %v8086_v5 }
 0xe81   :  { %6046 = vmatprep.subr.bf16.mxu0 %v8089_v13 }
 0xe84   :  { %6048 = vmatpush1.bf16.msra.mxu0 %v8092_v27 }
 0xe85   :  { %6050 = vmatprep.subr.bf16.mxu0 %v8095_v53 }
 0xe88   :  { %6052 = vmatpush1.bf16.msra.mxu0 %v8098_v59 }
 0xe89   :  { %6054 = vmatprep.subr.bf16.mxu0 %v7986_v48 }
 0xe8b   :  { %3896 = vmatmul.mubr.f32.vlgmr.msra.gmra.mrb[30].mxu0 %v3747_v21 }
 0xe8c   :  { %6056 = vmatpush1.bf16.msra.mxu0 %v7990_v61  ;;  %4006 = vmatprep.mubr.f32.mxu0 %v6934_v1 }
 0xe8d   :  { %6058 = vmatprep.subr.bf16.mxu0 %v7993_v17 }
 0xe90   :  { %6060 = vmatpush1.bf16.msra.mxu0 %v7998_v10 }
 0xe91   :  { %6062 = vmatprep.subr.bf16.mxu0 %v8001_v19 }
 0xe94   :  { %6064 = vmatpush1.bf16.msra.mxu0 %v8006_v22 }
 0xe95   :  { %6066 = vmatprep.subr.bf16.mxu0 %v8009_v30 }
 0xe98   :  { %6068 = vmatpush1.bf16.msra.mxu0 %v8014_v37 }
 0xe99   :  { %6070 = vmatprep.subr.bf16.mxu0 %v8017_v0 }
 0xe9c   :  { %6072 = vmatpush1.bf16.msra.mxu0 %v8022_v51 }
 0xe9d   :  { %6074 = vmatprep.subr.bf16.mxu0 %v8025_v39 }
 0xea0   :  { %6076 = vmatpush1.bf16.msra.mxu0 %v8030_v11 }
 0xea1   :  { %6078 = vmatprep.subr.bf16.mxu0 %v8033_v58 }
 0xea4   :  { %6080 = vmatpush1.bf16.msra.mxu0 %v8038_v44 }
 0xea5   :  { %6082 = vmatprep.subr.bf16.mxu0 %v8041_v23 }
 0xea8   :  { %6084 = vmatpush1.bf16.msra.mxu0 %v8046_v42 }
 0xea9   :  { %6086 = vmatprep.subr.bf16.mxu0 %v8049_v52 }
 0xf3e   :  { %v3826_v28 = vpop.f32.mrb[14].mxu0 }
 0xf3f   :  { %v3828_v63 = vpop.f32.mrb[15].mxu0  ;;  %v6383_v43 = vadd.f32 %v3826_v28, %v8130_v36 }
 0xf40   :  { %v6384_v7 = vadd.f32 %v3828_v63, %v8126_v54 }
 0xf41   :  { %v4944_v3 = vmul.f32 -1.442695, %v6383_v43 }
 0xf42   :  { %v4945_v49 = vmul.f32 -1.442695, %v6384_v7 }
 0xf44   :  { %6726 = vpow2.f32 %v4945_v49 }
 0xf45   :  { %6728 = vpow2.f32 %v4944_v3 }
 0xf4e   :  { %v6727_v4 = vpop.eup %6726 }
 0xf4f   :  { %v6729_v9 = vpop.eup %6728  ;;  %v3915_v24 = vadd.f32 1.0, %v6727_v4 }
 0xf50   :  { %v3909_v25 = vadd.f32 1.0, %v6729_v9 }
 0xf51   :  { %6730 = vrcp.f32 %v3915_v24 }
 0xf52   :  { %6732 = vrcp.f32 %v3909_v25 }
 0xf5b   :  { %v6731_v34 = vpop.eup %6730 }
 0xf5c   :  { %v6733_v47 = vpop.eup %6732  ;;  %v3925_v57 = vmul.f32 %v6731_v34, %v8228_v26 }
 0xf5e   :  { %v3897_v29 = vpop.f32.mrb[30].mxu0 }
 0xf5f   :  { %v6399_v18 = vadd.f32 %v3897_v29, %v8136_v31  ;;  %v3899_v6 = vpop.f32.mrb[31].mxu0 }
 0xf60   :  { %v6400_v38 = vadd.f32 %v3899_v6, %v8140_v8 }
 0xf61   :  { %6734 = vtanh.f32 %v6399_v18 }
 0xf62   :  { %v4946_v56 = vmul.f32 -1.442695, %v6400_v38 }
 0xf64   :  { %6736 = vpow2.f32 %v4946_v56 }
 0xf6b   :  { %v6735_v50 = vpop.eup %6734 }
 0xf6c   :  { %v3926_v2 = vmul.f32 %v6735_v50, %v6733_v47 }
 0xf6e   :  { %v6737_v15 = vpop.eup %6736  ;;  %v8270_v12 = vadd.f32 %v3926_v2, %v3925_v57 }
 0xf6f   :  { %v3922_v32 = vadd.f32 1.0, %v6737_v15 }
 0xf70   :  { %6738 = vtanh.f32 %v8270_v12 }
 0xf71   :  { %6740 = vrcp.f32 %v3922_v32 }
 0xf7a   :  { %v6739_v46 = vpop.eup %6738 }
 0xf7b   :  { %v6741_v14 = vpop.eup %6740 }
 0xf7c   :  { %v3929_v21 = vmul.f32 %v6741_v14, %v6739_v46 }
 0xf7e   :  { %4007 = vmatmul.mubr.f32.vlgmr.msra.gmra.mrb[16].mxu0 %v3929_v21 }
 0xf7f   :  { %6088 = vmatpush1.bf16.msra.mxu0 %v8054_v45  ;;  %4077 = vmatprep.mubr.f32.mxu0 %v6934_v1 }
 0xf80   :  { %6090 = vmatprep.subr.bf16.mxu0 %v8057_v62 }
 0xf83   :  { %6092 = vmatpush1.bf16.msra.mxu0 %v8061_v55 }
 0xf84   :  { %6094 = vmatprep.subr.bf16.mxu0 %v8065_v60 }
 0xf87   :  { %6096 = vmatpush1.bf16.msra.mxu0 %v8068_v33 }
 0xf88   :  { %6098 = vmatprep.subr.bf16.mxu0 %v8071_v20 }
 0xf8b   :  { %6100 = vmatpush1.bf16.msra.mxu0 %v8074_v41 }
 0xf8c   :  { %6102 = vmatprep.subr.bf16.mxu0 %v8077_v16 }
 0xf8f   :  { %6104 = vmatpush1.bf16.msra.mxu0 %v8080_v35 }
 0xf90   :  { %6106 = vmatprep.subr.bf16.mxu0 %v8083_v40 }
 0xf93   :  { %6108 = vmatpush1.bf16.msra.mxu0 %v8086_v5 }
 0xf94   :  { %6110 = vmatprep.subr.bf16.mxu0 %v8089_v13 }
 0xf97   :  { %6112 = vmatpush1.bf16.msra.mxu0 %v8092_v27 }
 0xf98   :  { %6114 = vmatprep.subr.bf16.mxu0 %v8095_v53 }
 0xf9b   :  { %6116 = vmatpush1.bf16.msra.mxu0 %v8098_v59 }
 0xf9c   :  { %6118 = vmatprep.subr.bf16.mxu0 %v7986_v48 }
 0xf9e   :  { %4078 = vmatmul.mubr.f32.vlgmr.msra.gmra.mrb[32].mxu0 %v3929_v21 }
 0xf9f   :  { %6120 = vmatpush1.bf16.msra.mxu0 %v7990_v61  ;;  %4188 = vmatprep.mubr.f32.mxu0 %v6934_v1 }
 0xfa0   :  { %6122 = vmatprep.subr.bf16.mxu0 %v7993_v17 }
 0xfa3   :  { %6124 = vmatpush1.bf16.msra.mxu0 %v7998_v10 }
 0xfa4   :  { %6126 = vmatprep.subr.bf16.mxu0 %v8001_v19 }
 0xfa7   :  { %6128 = vmatpush1.bf16.msra.mxu0 %v8006_v22 }
 0xfa8   :  { %6130 = vmatprep.subr.bf16.mxu0 %v8009_v30 }
 0xfab   :  { %6132 = vmatpush1.bf16.msra.mxu0 %v8014_v37 }
 0xfac   :  { %6134 = vmatprep.subr.bf16.mxu0 %v8017_v0 }
 0xfaf   :  { %6136 = vmatpush1.bf16.msra.mxu0 %v8022_v51 }
 0xfb0   :  { %6138 = vmatprep.subr.bf16.mxu0 %v8025_v39 }
 0xfb3   :  { %6140 = vmatpush1.bf16.msra.mxu0 %v8030_v11 }
 0xfb4   :  { %6142 = vmatprep.subr.bf16.mxu0 %v8033_v58 }
 0xfb7   :  { %6144 = vmatpush1.bf16.msra.mxu0 %v8038_v44 }
 0xfb8   :  { %6146 = vmatprep.subr.bf16.mxu0 %v8041_v23 }
 0xfbb   :  { %6148 = vmatpush1.bf16.msra.mxu0 %v8046_v42 }
 0xfbc   :  { %6150 = vmatprep.subr.bf16.mxu0 %v8049_v52 }
0x1051   :  { %v4008_v26 = vpop.f32.mrb[16].mxu0 }
0x1052   :  { %v4010_v28 = vpop.f32.mrb[17].mxu0  ;;  %v6385_v7 = vadd.f32 %v4008_v26, %v8130_v36 }
0x1053   :  { %v6386_v63 = vadd.f32 %v4010_v28, %v8126_v54 }
0x1054   :  { %v4947_v49 = vmul.f32 -1.442695, %v6385_v7 }
0x1055   :  { %v4948_v43 = vmul.f32 -1.442695, %v6386_v63 }
0x1057   :  { %6742 = vpow2.f32 %v4948_v43 }
0x1058   :  { %6744 = vpow2.f32 %v4947_v49 }
0x1061   :  { %v6743_v3 = vpop.eup %6742 }
0x1062   :  { %v6745_v4 = vpop.eup %6744  ;;  %v4097_v9 = vadd.f32 1.0, %v6743_v3 }
0x1063   :  { %v4091_v24 = vadd.f32 1.0, %v6745_v4 }
0x1064   :  { %6746 = vrcp.f32 %v4097_v9 }
0x1065   :  { %6748 = vrcp.f32 %v4091_v24 }
0x106e   :  { %v6747_v56 = vpop.eup %6746 }
0x106f   :  { %v6749_v34 = vpop.eup %6748  ;;  %v4107_v50 = vmul.f32 %v6747_v56, %v8270_v12 }
0x1071   :  { %v4079_v25 = vpop.f32.mrb[32].mxu0 }
0x1072   :  { %v6401_v29 = vadd.f32 %v4079_v25, %v8136_v31  ;;  %v4081_v18 = vpop.f32.mrb[33].mxu0 }
0x1073   :  { %v6402_v6 = vadd.f32 %v4081_v18, %v8140_v8 }
0x1074   :  { %6750 = vtanh.f32 %v6401_v29 }
0x1075   :  { %v4949_v38 = vmul.f32 -1.442695, %v6402_v6 }
0x1077   :  { %6752 = vpow2.f32 %v4949_v38 }
0x107e   :  { %v6751_v47 = vpop.eup %6750 }
0x107f   :  { %v4108_v57 = vmul.f32 %v6751_v47, %v6749_v34 }
0x1081   :  { %v6753_v2 = vpop.eup %6752  ;;  %v8312_v15 = vadd.f32 %v4108_v57, %v4107_v50 }
0x1082   :  { %v4104_v32 = vadd.f32 1.0, %v6753_v2 }
0x1083   :  { %6754 = vtanh.f32 %v8312_v15 }
0x1084   :  { %6756 = vrcp.f32 %v4104_v32 }
0x108d   :  { %v6755_v46 = vpop.eup %6754 }
0x108e   :  { %v6757_v14 = vpop.eup %6756 }
0x108f   :  { %v4111_v21 = vmul.f32 %v6757_v14, %v6755_v46 }
0x1091   :  { %4189 = vmatmul.mubr.f32.vlgmr.msra.gmra.mrb[18].mxu0 %v4111_v21 }
0x1092   :  { %6152 = vmatpush1.bf16.msra.mxu0 %v8054_v45  ;;  %4259 = vmatprep.mubr.f32.mxu0 %v6934_v1 }
0x1093   :  { %6154 = vmatprep.subr.bf16.mxu0 %v8057_v62 }
0x1096   :  { %6156 = vmatpush1.bf16.msra.mxu0 %v8061_v55 }
0x1097   :  { %6158 = vmatprep.subr.bf16.mxu0 %v8065_v60 }
0x109a   :  { %6160 = vmatpush1.bf16.msra.mxu0 %v8068_v33 }
0x109b   :  { %6162 = vmatprep.subr.bf16.mxu0 %v8071_v20 }
0x109e   :  { %6164 = vmatpush1.bf16.msra.mxu0 %v8074_v41 }
0x109f   :  { %6166 = vmatprep.subr.bf16.mxu0 %v8077_v16 }
0x10a2   :  { %6168 = vmatpush1.bf16.msra.mxu0 %v8080_v35 }
0x10a3   :  { %6170 = vmatprep.subr.bf16.mxu0 %v8083_v40 }
0x10a6   :  { %6172 = vmatpush1.bf16.msra.mxu0 %v8086_v5 }
0x10a7   :  { %6174 = vmatprep.subr.bf16.mxu0 %v8089_v13 }
0x10aa   :  { %6176 = vmatpush1.bf16.msra.mxu0 %v8092_v27 }
0x10ab   :  { %6178 = vmatprep.subr.bf16.mxu0 %v8095_v53 }
0x10ae   :  { %6180 = vmatpush1.bf16.msra.mxu0 %v8098_v59 }
0x10af   :  { %6182 = vmatprep.subr.bf16.mxu0 %v7986_v48 }
0x10b1   :  { %4260 = vmatmul.mubr.f32.vlgmr.msra.gmra.mrb[34].mxu0 %v4111_v21 }
0x10b2   :  { %6184 = vmatpush1.bf16.msra.mxu0 %v7990_v61  ;;  %4370 = vmatprep.mubr.f32.mxu0 %v6934_v1 }
0x10b3   :  { %6186 = vmatprep.subr.bf16.mxu0 %v7993_v17 }
0x10b6   :  { %6188 = vmatpush1.bf16.msra.mxu0 %v7998_v10 }
0x10b7   :  { %6190 = vmatprep.subr.bf16.mxu0 %v8001_v19 }
0x10ba   :  { %6192 = vmatpush1.bf16.msra.mxu0 %v8006_v22 }
0x10bb   :  { %6194 = vmatprep.subr.bf16.mxu0 %v8009_v30 }
0x10be   :  { %6196 = vmatpush1.bf16.msra.mxu0 %v8014_v37 }
0x10bf   :  { %6198 = vmatprep.subr.bf16.mxu0 %v8017_v0 }
0x10c2   :  { %6200 = vmatpush1.bf16.msra.mxu0 %v8022_v51 }
0x10c3   :  { %6202 = vmatprep.subr.bf16.mxu0 %v8025_v39 }
0x10c6   :  { %6204 = vmatpush1.bf16.msra.mxu0 %v8030_v11 }
0x10c7   :  { %6206 = vmatprep.subr.bf16.mxu0 %v8033_v58 }
0x10ca   :  { %6208 = vmatpush1.bf16.msra.mxu0 %v8038_v44 }
0x10cb   :  { %6210 = vmatprep.subr.bf16.mxu0 %v8041_v23 }
0x10ce   :  { %6212 = vmatpush1.bf16.msra.mxu0 %v8046_v42 }
0x10cf   :  { %6214 = vmatprep.subr.bf16.mxu0 %v8049_v52 }
0x1164   :  { %v4190_v12 = vpop.f32.mrb[18].mxu0 }
0x1165   :  { %v4192_v26 = vpop.f32.mrb[19].mxu0  ;;  %v6387_v63 = vadd.f32 %v4190_v12, %v8130_v36 }
0x1166   :  { %v6388_v28 = vadd.f32 %v4192_v26, %v8126_v54 }
0x1167   :  { %v4950_v43 = vmul.f32 -1.442695, %v6387_v63 }
0x1168   :  { %v4951_v7 = vmul.f32 -1.442695, %v6388_v28 }
0x116a   :  { %6758 = vpow2.f32 %v4951_v7 }
0x116b   :  { %6760 = vpow2.f32 %v4950_v43 }
0x1174   :  { %v6759_v49 = vpop.eup %6758 }
0x1175   :  { %v6761_v3 = vpop.eup %6760  ;;  %v4279_v4 = vadd.f32 1.0, %v6759_v49 }
0x1176   :  { %v4273_v9 = vadd.f32 1.0, %v6761_v3 }
0x1177   :  { %6762 = vrcp.f32 %v4279_v4 }
0x1178   :  { %6764 = vrcp.f32 %v4273_v9  ;;  %v4668_v9 = vld [vmem:[%s8530_s10 + $0x50] sm:$0xff] }
0x1181   :  { %v6763_v38 = vpop.eup %6762 }
0x1182   :  { %v6765_v56 = vpop.eup %6764  ;;  %v4289_v47 = vmul.f32 %v6763_v38, %v8312_v15  ;;  %v4672_v38 = vld [vmem:[%s8530_s10 + $0x70] sm:$0xff] }
0x1184   :  { %v4261_v24 = vpop.f32.mrb[34].mxu0 }
0x1185   :  { %v6403_v25 = vadd.f32 %v4261_v24, %v8136_v31  ;;  %v4263_v29 = vpop.f32.mrb[35].mxu0  ;;  %v4669_v24 = vld [vmem:[%s8530_s10 + $0x58] sm:$0xff] }
0x1186   :  { %v6404_v18 = vadd.f32 %v4263_v29, %v8140_v8  ;;  %v4670_v29 = vld [vmem:[%s8530_s10 + $0x60] sm:$0xff] }
0x1187   :  { %6766 = vtanh.f32 %v6403_v25  ;;  %v6325_v25 = vpack.c.bf16 %v4669_v24, %v4668_v9 }
0x1188   :  { %v4952_v6 = vmul.f32 -1.442695, %v6404_v18  ;;  %v4671_v18 = vld [vmem:[%s8530_s10 + $0x68] sm:$0xff] }
0x118a   :  { %6768 = vpow2.f32 %v4952_v6  ;;  %v6328_v6 = vpack.c.bf16 %v4671_v18, %v4670_v29 }
0x1191   :  { %v6767_v34 = vpop.eup %6766 }
0x1192   :  { %v4290_v50 = vmul.f32 %v6767_v34, %v6765_v56  ;;  %v4673_v56 = vld [vmem:[%s8530_s10 + $0x78] sm:$0xff] }
0x1193   :  { %v6331_v34 = vpack.c.bf16 %v4673_v56, %v4672_v38 }
0x1194   :  { %v6769_v57 = vpop.eup %6768  ;;  %v8354_v2 = vadd.f32 %v4290_v50, %v4289_v47 }
0x1195   :  { %v4286_v32 = vadd.f32 1.0, %v6769_v57 }
0x1196   :  { %6770 = vtanh.f32 %v8354_v2 }
0x1197   :  { %6772 = vrcp.f32 %v4286_v32 }
0x11a0   :  { %v6771_v46 = vpop.eup %6770 }
0x11a1   :  { %v6773_v14 = vpop.eup %6772 }
0x11a2   :  { %v4293_v21 = vmul.f32 %v6773_v14, %v6771_v46 }
0x11a4   :  { %4371 = vmatmul.mubr.f32.vlgmr.msra.gmra.mrb[20].mxu0 %v4293_v21 }
0x11a5   :  { %6216 = vmatpush1.bf16.msra.mxu0 %v8054_v45  ;;  %4441 = vmatprep.mubr.f32.mxu0 %v6934_v1 }
0x11a6   :  { %6218 = vmatprep.subr.bf16.mxu0 %v8057_v62 }
0x11a9   :  { %6220 = vmatpush1.bf16.msra.mxu0 %v8061_v55 }
0x11aa   :  { %6222 = vmatprep.subr.bf16.mxu0 %v8065_v60 }
0x11ad   :  { %6224 = vmatpush1.bf16.msra.mxu0 %v8068_v33 }
0x11ae   :  { %6226 = vmatprep.subr.bf16.mxu0 %v8071_v20 }
0x11b1   :  { %6228 = vmatpush1.bf16.msra.mxu0 %v8074_v41 }
0x11b2   :  { %6230 = vmatprep.subr.bf16.mxu0 %v8077_v16 }
0x11b5   :  { %6232 = vmatpush1.bf16.msra.mxu0 %v8080_v35 }
0x11b6   :  { %6234 = vmatprep.subr.bf16.mxu0 %v8083_v40 }
0x11b9   :  { %6236 = vmatpush1.bf16.msra.mxu0 %v8086_v5 }
0x11ba   :  { %6238 = vmatprep.subr.bf16.mxu0 %v8089_v13 }
0x11bd   :  { %6240 = vmatpush1.bf16.msra.mxu0 %v8092_v27 }
0x11be   :  { %6242 = vmatprep.subr.bf16.mxu0 %v8095_v53 }
0x11c1   :  { %6244 = vmatpush1.bf16.msra.mxu0 %v8098_v59 }
0x11c2   :  { %6246 = vmatprep.subr.bf16.mxu0 %v7986_v48 }
0x11c4   :  { %4442 = vmatmul.mubr.f32.vlgmr.msra.gmra.mrb[36].mxu0 %v4293_v21 }
0x11c5   :  { %6248 = vmatpush1.bf16.msra.mxu0 %v7990_v61  ;;  %4552 = vmatprep.mubr.f32.mxu0 %v6934_v1 }
0x11c6   :  { %6250 = vmatprep.subr.bf16.mxu0 %v7993_v17 }
0x11c9   :  { %6252 = vmatpush1.bf16.msra.mxu0 %v7998_v10 }
0x11ca   :  { %6254 = vmatprep.subr.bf16.mxu0 %v8001_v19 }
0x11cd   :  { %6256 = vmatpush1.bf16.msra.mxu0 %v8006_v22 }
0x11ce   :  { %6258 = vmatprep.subr.bf16.mxu0 %v8009_v30 }
0x11d1   :  { %6260 = vmatpush1.bf16.msra.mxu0 %v8014_v37 }
0x11d2   :  { %6262 = vmatprep.subr.bf16.mxu0 %v8017_v0 }
0x11d5   :  { %6264 = vmatpush1.bf16.msra.mxu0 %v8022_v51 }
0x11d6   :  { %6266 = vmatprep.subr.bf16.mxu0 %v8025_v39 }
0x11d9   :  { %6268 = vmatpush1.bf16.msra.mxu0 %v8030_v11 }
0x11da   :  { %6270 = vmatprep.subr.bf16.mxu0 %v8033_v58 }
0x11dd   :  { %6272 = vmatpush1.bf16.msra.mxu0 %v8038_v44 }
0x11de   :  { %6274 = vmatprep.subr.bf16.mxu0 %v8041_v23 }
0x11e1   :  { %6276 = vmatpush1.bf16.msra.mxu0 %v8046_v42 }
0x11e2   :  { %6278 = vmatprep.subr.bf16.mxu0 %v8049_v52 }
0x1277   :  { %v4372_v48 = vpop.f32.mrb[20].mxu0 }
0x1278   :  { %v4374_v61 = vpop.f32.mrb[21].mxu0  ;;  %v6389_v10 = vadd.f32 %v4372_v48, %v8130_v36 }
0x1279   :  { %v6390_v17 = vadd.f32 %v4374_v61, %v8126_v54 }
0x127a   :  { %v4953_v22 = vmul.f32 -1.442695, %v6389_v10 }
0x127b   :  { %v4954_v19 = vmul.f32 -1.442695, %v6390_v17 }
0x127d   :  { %6774 = vpow2.f32 %v4954_v19 }
0x127e   :  { %6776 = vpow2.f32 %v4953_v22 }
0x1287   :  { %v6775_v30 = vpop.eup %6774 }
0x1288   :  { %v6777_v37 = vpop.eup %6776  ;;  %v4461_v0 = vadd.f32 1.0, %v6775_v30 }
0x1289   :  { %v4455_v51 = vadd.f32 1.0, %v6777_v37 }
0x128a   :  { %6778 = vrcp.f32 %v4461_v0 }
0x128b   :  { %6780 = vrcp.f32 %v4455_v51 }
0x1294   :  { %v6779_v42 = vpop.eup %6778 }
0x1295   :  { %v6781_v52 = vpop.eup %6780  ;;  %v4471_v12 = vmul.f32 %v6779_v42, %v8354_v2 }
0x1297   :  { %v4443_v39 = vpop.f32.mrb[36].mxu0 }
0x1298   :  { %v6405_v11 = vadd.f32 %v4443_v39, %v8136_v31  ;;  %v4445_v58 = vpop.f32.mrb[37].mxu0 }
0x1299   :  { %v6406_v44 = vadd.f32 %v4445_v58, %v8140_v8 }
0x129a   :  { %6782 = vtanh.f32 %v6405_v11 }
0x129b   :  { %v4955_v23 = vmul.f32 -1.442695, %v6406_v44 }
0x129d   :  { %6784 = vpow2.f32 %v4955_v23 }
0x12a4   :  { %v6783_v15 = vpop.eup %6782 }
0x12a5   :  { %v4472_v26 = vmul.f32 %v6783_v15, %v6781_v52  ;;  %v4754_v15 = vld [vmem:[%s8532_s12 + $0x10] sm:$0xff] }
0x12a7   :  { %v6785_v28 = vpop.eup %6784  ;;  %v8396_v63 = vadd.f32 %v4472_v26, %v4471_v12  ;;  %v4755_v12 = vld [vmem:[%s8532_s12 + $0x18] sm:$0xff] }
0x12a8   :  { %v4468_v7 = vadd.f32 1.0, %v6785_v28  ;;  %v6337_v26 = vpack.c.bf16 %v4755_v12, %v4754_v15  ;;  %v4756_v28 = vld [vmem:[%s8532_s12 + $0x20] sm:$0xff] }
0x12a9   :  { %6786 = vtanh.f32 %v8396_v63 }
0x12aa   :  { %6788 = vrcp.f32 %v4468_v7 }
0x12b3   :  { %v6787_v43 = vpop.eup %6786 }
0x12b4   :  { %v6789_v49 = vpop.eup %6788 }
0x12b5   :  { %v4475_v3 = vmul.f32 %v6789_v49, %v6787_v43  ;;  %v4759_v43 = vld [vmem:[%s8532_s12 + $0x38] sm:$0xff] }
0x12b7   :  { %4553 = vmatmul.mubr.f32.vlgmr.msra.gmra.mrb[22].mxu0 %v4475_v3 }
0x12b8   :  { %6280 = vmatpush1.bf16.msra.mxu0 %v8054_v45  ;;  %4623 = vmatprep.mubr.f32.mxu0 %v6934_v1  ;;  %v4658_v45 = vld [vmem:[%s8530_s10] sm:$0xff] }
0x12b9   :  { %6282 = vmatprep.subr.bf16.mxu0 %v8057_v62  ;;  %v4659_v62 = vld [vmem:[%s8530_s10 + $0x8] sm:$0xff] }
0x12bc   :  { %6284 = vmatpush1.bf16.msra.mxu0 %v8061_v55  ;;  %v6310_v55 = vpack.c.bf16 %v4659_v62, %v4658_v45 }
0x12bd   :  { %6286 = vmatprep.subr.bf16.mxu0 %v8065_v60  ;;  %v6935_v60 = vmov 0.0|0.0  }
0x12be   :  { %6309 = vmatprep.subr.bf16.mxu1 %v6935_v60 }
0x12bf   :  { %6311 = vmatpush3.bf16.msra.mxu1 %v6310_v55 }
0x12c0   :  { %6288 = vmatpush1.bf16.msra.mxu0 %v8068_v33  ;;  %6312 = vmatprep.subr.bf16.mxu1 %v6935_v60  ;;  %v4660_v33 = vld [vmem:[%s8530_s10 + $0x10] sm:$0xff] }
0x12c1   :  { %6290 = vmatprep.subr.bf16.mxu0 %v8071_v20  ;;  %v4661_v20 = vld [vmem:[%s8530_s10 + $0x18] sm:$0xff] }
0x12c4   :  { %6292 = vmatpush1.bf16.msra.mxu0 %v8074_v41  ;;  %v6313_v41 = vpack.c.bf16 %v4661_v20, %v4660_v33 }
0x12c5   :  { %6294 = vmatprep.subr.bf16.mxu0 %v8077_v16  ;;  %v4662_v16 = vld [vmem:[%s8530_s10 + $0x20] sm:$0xff] }
0x12c6   :  { %6314 = vmatpush3.bf16.msra.mxu1 %v6313_v41 }
0x12c7   :  { %6315 = vmatprep.subr.bf16.mxu1 %v6935_v60 }
0x12c8   :  { %6296 = vmatpush1.bf16.msra.mxu0 %v8080_v35  ;;  %v4663_v35 = vld [vmem:[%s8530_s10 + $0x28] sm:$0xff] }
0x12c9   :  { %6298 = vmatprep.subr.bf16.mxu0 %v8083_v40  ;;  %v6316_v40 = vpack.c.bf16 %v4663_v35, %v4662_v16 }
0x12cb   :  { %6317 = vmatpush3.bf16.msra.mxu1 %v6316_v40 }
0x12cc   :  { %6300 = vmatpush1.bf16.msra.mxu0 %v8086_v5  ;;  %6318 = vmatprep.subr.bf16.mxu1 %v6935_v60  ;;  %v4664_v5 = vld [vmem:[%s8530_s10 + $0x30] sm:$0xff] }
0x12cd   :  { %6302 = vmatprep.subr.bf16.mxu0 %v8089_v13  ;;  %v4665_v13 = vld [vmem:[%s8530_s10 + $0x38] sm:$0xff] }
0x12d0   :  { %6304 = vmatpush1.bf16.msra.mxu0 %v8092_v27  ;;  %v6319_v27 = vpack.c.bf16 %v4665_v13, %v4664_v5 }
0x12d1   :  { %6306 = vmatprep.subr.bf16.mxu0 %v8095_v53  ;;  %v4666_v53 = vld [vmem:[%s8530_s10 + $0x40] sm:$0xff] }
0x12d2   :  { %6320 = vmatpush3.bf16.msra.mxu1 %v6319_v27 }
0x12d3   :  { %6321 = vmatprep.subr.bf16.mxu1 %v6935_v60 }
0x12d4   :  { %6308 = vmatpush1.bf16.msra.mxu0 %v8098_v59  ;;  %v4667_v59 = vld [vmem:[%s8530_s10 + $0x48] sm:$0xff] }
0x12d5   :  { %v6322_v4 = vpack.c.bf16 %v4667_v59, %v4666_v53 }
0x12d7   :  { %4624 = vmatmul.mubr.f32.vlgmr.msra.gmra.mrb[38].mxu0 %v4475_v3  ;;  %6323 = vmatpush3.bf16.msra.mxu1 %v6322_v4  ;;  %v4959_v3 = vld [vmem:[%s8531_s11] ss:$0 sm:$0xff] }
0x12d8   :  { %6324 = vmatprep.subr.bf16.mxu1 %v6935_v60 }
0x12db   :  { %6326 = vmatpush3.bf16.msra.mxu1 %v6325_v25 }
0x12dc   :  { %6327 = vmatprep.subr.bf16.mxu1 %v6935_v60 }
0x12df   :  { %6329 = vmatpush3.bf16.msra.mxu1 %v6328_v6 }
0x12e0   :  { %6330 = vmatprep.subr.bf16.mxu1 %v6935_v60 }
0x12e3   :  { %6332 = vmatpush3.bf16.msra.mxu1 %v6331_v34 }
0x12e4   :  { %6333 = vmatprep.subr.bf16.mxu1 %v6935_v60 }
0x138a   :  { %v4554_v47 = vpop.f32.mrb[22].mxu0 }
0x138b   :  { %v4556_v50 = vpop.f32.mrb[23].mxu0  ;;  %v6391_v2 = vadd.f32 %v4554_v47, %v8130_v36 }
0x138c   :  { %v6392_v57 = vadd.f32 %v4556_v50, %v8126_v54 }
0x138d   :  { %v4956_v46 = vmul.f32 -1.442695, %v6391_v2 }
0x138e   :  { %v4957_v32 = vmul.f32 -1.442695, %v6392_v57 }
0x1390   :  { %6790 = vpow2.f32 %v4957_v32 }
0x1391   :  { %6792 = vpow2.f32 %v4956_v46 }
0x139a   :  { %v6791_v14 = vpop.eup %6790 }
0x139b   :  { %v6793_v21 = vpop.eup %6792  ;;  %v4643_v48 = vadd.f32 1.0, %v6791_v14 }
0x139c   :  { %v4637_v61 = vadd.f32 1.0, %v6793_v21 }
0x139d   :  { %6794 = vrcp.f32 %v4643_v48 }
0x139e   :  { %6796 = vrcp.f32 %v4637_v61 }
0x13a7   :  { %v6795_v36 = vpop.eup %6794 }
0x13a8   :  { %v6797_v30 = vpop.eup %6796  ;;  %v4653_v0 = vmul.f32 %v6795_v36, %v8396_v63  ;;  %v4757_v63 = vld [vmem:[%s8532_s12 + $0x28] sm:$0xff] }
0x13a9   :  { %v6340_v7 = vpack.c.bf16 %v4757_v63, %v4756_v28 }
0x13aa   :  { %v4625_v17 = vpop.f32.mrb[38].mxu0 }
0x13ab   :  { %v6407_v10 = vadd.f32 %v4625_v17, %v8136_v31  ;;  %v4627_v19 = vpop.f32.mrb[39].mxu0  ;;  %v4752_v31 = vld [vmem:[%s8532_s12] sm:$0xff] }
0x13ac   :  { %v6408_v22 = vadd.f32 %v4627_v19, %v8140_v8  ;;  %v4753_v8 = vld [vmem:[%s8532_s12 + $0x8] sm:$0xff] }
0x13ad   :  { %6798 = vtanh.f32 %v6407_v10  ;;  %v6334_v42 = vpack.c.bf16 %v4753_v8, %v4752_v31 }
0x13ae   :  { %v4958_v54 = vmul.f32 -1.442695, %v6408_v22 }
0x13b0   :  { %6800 = vpow2.f32 %v4958_v54 }
0x13b7   :  { %v6799_v37 = vpop.eup %6798 }
0x13b8   :  { %v4654_v51 = vmul.f32 %v6799_v37, %v6797_v30 }
0x13ba   :  { %v6801_v39 = vpop.eup %6800  ;;  %v4655_v11 = vadd.f32 %v4654_v51, %v4653_v0 }
0x13bb   :  { %v4650_v58 = vadd.f32 1.0, %v6801_v39 }
0x13bc   :  { %6802 = vtanh.f32 %v4655_v11 }
0x13bd   :  { %6804 = vrcp.f32 %v4650_v58 }
0x13c6   :  { %v6803_v44 = vpop.eup %6802 }
0x13c7   :  { %v6805_v23 = vpop.eup %6804 }
0x13c8   :  { %v4657_v52 = vmul.f32 %v6805_v23, %v6803_v44 }
0x13ca   :  { %5080 = vmatmul.mubr.f32.vlgmr.msra.gmra.mrb[32].mxu1 %v4657_v52 }
0x13cb   :  { %6335 = vmatpush3.bf16.msra.mxu1 %v6334_v42  ;;  %5098 = vmatprep.mubr.msk.f32.mxu1 %vm6936_vm11, %v6934_v1  ;;  %v4758_v1 = vld [vmem:[%s8532_s12 + $0x30] sm:$0xff] }
0x13cc   :  { %6336 = vmatprep.subr.bf16.mxu1 %v6935_v60  ;;  %v6343_v49 = vpack.c.bf16 %v4759_v43, %v4758_v1 }
0x13cf   :  { %6338 = vmatpush3.bf16.msra.mxu1 %v6337_v26 }
0x13d0   :  { %6339 = vmatprep.subr.bf16.mxu1 %v6935_v60 }
0x13d3   :  { %6341 = vmatpush3.bf16.msra.mxu1 %v6340_v7 }
0x13d4   :  { %6342 = vmatprep.subr.bf16.mxu1 %v6935_v60  ;;  %v4960_v60 = vld [vmem:[%s8533_s13] ss:$0 sm:$0xff] }
0x13d7   :  { %6344 = vmatpush3.bf16.msra.mxu1 %v6343_v49 }
0x149d   :  { %v4747_v45 = vpop.f32.mrb[32].mxu1 }
0x149e   :  { %v4748_v62 = vadd.f32 %v4959_v3, %v4747_v45  ;;  %v5081_v55 = vpop.f32.mrb[33].mxu1 }
0x14a0   :  { %v4751_v33 = vmax.f32 %v4748_v62, 0.0 }
0x14a2   :  { %5099 = vmatmul.mubr.msk.f32.vlgmr.msra.gmra.mrb[34].mxu1 %vm4767_vm12, %v4751_v33 }
0x1575   :  { %v4837_v20 = vpop.f32.mrb[34].mxu1 }
0x1576   :  { %v4838_v41 = vadd.f32 %v4960_v60, %v4837_v20  ;;  %v5100_v16 = vpop.f32.mrb[35].mxu1 }
0x1578   :  { %v4842_v35 = vsel %vm4841_vm13, %v4838_v41, -inf }
0x1579   :  { %4843 = vmax.xlane.f32.xlu0 %v4842_v35 }
0x1606   :  { %v4844_v40 = vpop.xlane.xlu0 %4843 }
0x1607   :  { %v4845_v5 = vsub.f32 %v4838_v41, %v4844_v40 }
0x1609   :  { %v4846_v13 = vmul.f32 1.442695, %v4845_v5 }
0x160b   :  { %6806 = vpow2.f32 %v4846_v13 }
0x1615   :  { %v6807_v27 = vpop.eup %6806 }
0x1616   :  { %v4848_v53 = vsel %vm4841_vm13, %v6807_v27, 0.0 }
0x1617   :  { %4849 = vadd.xlane.f32.xlu1 %v4848_v53 }
0x16a4   :  { %v4850_v59 = vpop.xlane.xlu1 %4849 }
0x16a5   :  { %6808 = vlog2.f32 %v4850_v59 }
0x16af   :  { %v6809_v4 = vpop.eup %6808 }
0x16b0   :  { %v4852_v9 = vmul.f32 0.6931472, %v6809_v4 }
0x16b2   :  { %v4853_v24 = vsub.f32 %v4845_v5, %v4852_v9 }
0x16b4   :  { %4854 = vst.msk [vmem:[%s8534_s14] sm:$0xff] %vm4841_vm13, %v4853_v24 }
0x16b5   :  { %4859 = vsyncpa [#allocation6], 1 }
0x16b6   :  { %4860 = vsyncpa [#allocation8], 1 }
0x16b7   :  { %4861 = vsyncpa [#allocation11], 1 }

</bundles_post_ra>
